<compile_context>
chip_gen: v5e
topology: v5e:2x2
jax: 0.10.0
libtpu: 0.0.40
codegen_flags: <defaults>
</compile_context>

<pallas_src>
import jax
import jax.numpy as jnp
import numpy as np
from jax.experimental import pallas as pl
from jax.experimental.pallas import tpu as pltpu

# ---------------------------------------------------------------------------
# Model sizes (small, deterministic synthetic config; ONet defaults scaled down)
# ---------------------------------------------------------------------------
B = 2          # batch (folded into the row axis inside the kernel)
N_IN = 64      # input (conditioning) points per cloud
T_Q = 64       # query points per cloud
HIDDEN = 32    # hidden size of encoder & decoder
C_DIM = 32     # conditioning latent dim
N_BLOCKS = 5   # ResNet blocks in both encoder and decoder (ONet default)

_PACK_W = 2 * HIDDEN   # lane width of the packed weight block

assert B == 2, "kernel folds exactly two batch elements into the row axis"


# ---------------------------------------------------------------------------
# Static layout of the packed weight block: name -> (row_offset, rows, cols).
# Every entry starts at an 8-row-aligned offset so in-kernel ref slices stay
# sublane-aligned.
# ---------------------------------------------------------------------------
def _build_layout():
    layout = {}
    off = 0

    def add(name, rows, cols):
        nonlocal off
        layout[name] = (off, rows, cols)
        off += ((rows + 7) // 8) * 8

    H, C = HIDDEN, C_DIM
    # encoder: ResnetPointnet
    add("w_pos", 3, 2 * H)
    add("b_pos", 1, 2 * H)
    # block 0: operates on the raw 2H-wide fc_pos output (no pooled concat)
    add("enc_w0_0", 2 * H, H)
    add("enc_b0_0", 1, H)
    add("enc_w1_0", H, H)
    add("enc_b1_0", 1, H)
    add("enc_ws_0", 2 * H, H)
    # blocks 1..4: the 2H-wide fc_0 / shortcut weights are pre-split host-side
    # into the `net` half (rows 0:H) and the pooled half (rows H:2H) so the
    # kernel never concatenates along lanes.
    for i in range(1, N_BLOCKS):
        add(f"enc_w0t_{i}", H, H)
        add(f"enc_w0b_{i}", H, H)
        add(f"enc_b0_{i}", 1, H)
        add(f"enc_w1_{i}", H, H)
        add(f"enc_b1_{i}", 1, H)
        add(f"enc_wst_{i}", H, H)
        add(f"enc_wsb_{i}", H, H)
    add("w_c", H, C)
    add("b_c", 1, C)
    # decoder: Decoder(dim=3, z_dim=0, c_dim=C, hidden_size=H)
    add("w_p", 3, H)
    add("b_p", 1, H)
    add("w_cd", C, H)
    add("b_cd", 1, H)
    for i in range(N_BLOCKS):
        add(f"dec_w0_{i}", H, H)
        add(f"dec_b0_{i}", 1, H)
        add(f"dec_w1_{i}", H, H)
        add(f"dec_b1_{i}", 1, H)
    add("w_out_t", 1, H)   # stored transposed -> lane row
    add("b_out", 1, 1)
    total_rows = ((off + 7) // 8) * 8
    return layout, total_rows


_LAYOUT, _PACK_ROWS = _build_layout()


# ---------------------------------------------------------------------------
# Pallas kernel: whole forward (encoder + decoder) in one grid-less invocation
# ---------------------------------------------------------------------------
def _onet_kernel(inputs_ref, p_ref, pk_ref, out_ref):
    f32 = jnp.float32
    H = HIDDEN
    relu = lambda v: jnp.maximum(v, 0.0)

    def get(name):
        off, r, c = _LAYOUT[name]
        return pk_ref[off:off + r, 0:c]

    def dot(a, b):
        return jnp.dot(a, b, preferred_element_type=f32)

    def batch_mask(rows):
        # Rows are ordered [batch-0 rows | batch-1 rows]; True selects batch 0.
        rid = jax.lax.broadcasted_iota(jnp.int32, (rows, H), 0)
        return rid < (rows // 2)

    mask_enc = batch_mask(2 * N_IN)   # hoisted once (iota/broadcast are not CSE'd)
    mask_dec = batch_mask(2 * T_Q)

    def pool_bcast(net, mask):
        # Per-batch max over the point rows, broadcast back to one row per
        # point/query via a select against the hoisted batch mask.
        m0 = jnp.max(net[0:N_IN, :], axis=0, keepdims=True)           # (1, H)
        m1 = jnp.max(net[N_IN:2 * N_IN, :], axis=0, keepdims=True)    # (1, H)
        return jnp.where(mask, m0, m1)                                # (rows, H)

    # ---------------- Encoder: ResnetPointnet (batch folded into rows) -------
    x = inputs_ref[...]                                        # (2N, 3)
    net2 = dot(x, get("w_pos")) + get("b_pos")                 # (2N, 2H)

    # Block 0: plain 2H-wide ResNet-FC block (no pooled concat on its input).
    hh = dot(relu(net2), get("enc_w0_0")) + get("enc_b0_0")
    dx = dot(relu(hh), get("enc_w1_0")) + get("enc_b1_0")
    net = dot(net2, get("enc_ws_0")) + dx                      # (2N, H)

    # Blocks 1..4: the reference input is concat([net, broadcast(pooled)], -1);
    # with split weights the pooled contribution is a separate matmul on the
    # already-broadcast pooled rows (relu commutes with the broadcast/select).
    for i in range(1, N_BLOCKS):
        pooled = pool_bcast(net, mask_enc)                     # (2N, H)
        hh = (dot(relu(net), get(f"enc_w0t_{i}"))
              + dot(relu(pooled), get(f"enc_w0b_{i}"))
              + get(f"enc_b0_{i}"))
        dx = dot(relu(hh), get(f"enc_w1_{i}")) + get(f"enc_b1_{i}")
        net = (dot(net, get(f"enc_wst_{i}"))
               + dot(pooled, get(f"enc_wsb_{i}"))
               + dx)

    # Final per-batch pool -> conditioning code c -> decoder conditioning rows,
    # computed directly on the broadcast rows (valid because every row of a
    # batch sees the same pooled vector; avoids any per-batch row extraction).
    pooled = pool_bcast(net, mask_dec)                         # (2T, H)  (N_IN == T_Q)
    c_rows = dot(relu(pooled), get("w_c")) + get("b_c")        # (2T, C)
    cond = dot(c_rows, get("w_cd")) + get("b_cd")              # (2T, H)

    # z ~ p0_z = Normal([], []) is a zero-dim latent (decoder z_dim = 0): no compute.

    # ---------------- Decoder: conditioned ResNet-FC MLP ---------------------
    q = p_ref[...]                                             # (2T, 3)
    net = dot(q, get("w_p")) + get("b_p") + cond               # (2T, H)
    for i in range(N_BLOCKS):                                  # identity shortcuts
        hh = dot(relu(net), get(f"dec_w0_{i}")) + get(f"dec_b0_{i}")
        dx = dot(relu(hh), get(f"dec_w1_{i}")) + get(f"dec_b1_{i}")
        net = net + dx

    # Lane-dense (1, 2T) logits row straight off the MXU:
    #   (1, H) x (2T, H) contracted over H (transposed-RHS dot) -> (1, 2T).
    logits = jax.lax.dot_general(
        get("w_out_t"), relu(net),
        dimension_numbers=(((1,), (1,)), ((), ())),
        preferred_element_type=f32)
    out_ref[...] = logits + get("b_out")                       # full-lane row store


# ---------------------------------------------------------------------------
# Wrapper: one grid-less pallas_call, batch folded into rows, weights resident
# ---------------------------------------------------------------------------
@jax.jit
def occupancy_network_forward(p, inputs, packed_w):
    """Returns (logits, probs) of the Bernoulli occupancy distribution p_r."""
    bsz, t, _ = p.shape
    _, n_in, _ = inputs.shape
    assert bsz == B and t == T_Q and n_in == N_IN, "shapes must match kernel constants"

    # Fold batch into the sublane axis (row r = b * T + t).
    in_flat = inputs.reshape(bsz * n_in, 3)
    p_flat = p.reshape(bsz * t, 3)

    logits_row = pl.pallas_call(
        _onet_kernel,
        out_shape=jax.ShapeDtypeStruct((1, bsz * t), jnp.float32),
        in_specs=[
            pl.BlockSpec(memory_space=pltpu.MemorySpace.VMEM),   # inputs (128, 3)
            pl.BlockSpec(memory_space=pltpu.MemorySpace.VMEM),   # queries (128, 3)
            pl.BlockSpec(memory_space=pltpu.MemorySpace.VMEM),   # packed weights
        ],
        out_specs=pl.BlockSpec(memory_space=pltpu.MemorySpace.VMEM),
    )(in_flat, p_flat, packed_w)

    logits = logits_row.reshape(bsz, t)                  # (B, T)
    probs = jax.nn.sigmoid(logits)                       # Bernoulli(logits=logits).probs
    return logits, probs


# ---------------------------------------------------------------------------
# Deterministic parameter initialization (synthetic; shapes from ONet defaults)
# ---------------------------------------------------------------------------
def init_params(key, hidden=HIDDEN, c_dim=C_DIM):
    H, C = hidden, c_dim
    keys = iter(jax.random.split(key, 64))

    def w(shape, fan_in):
        return (jax.random.normal(next(keys), shape, jnp.float32) / np.sqrt(fan_in)).astype(jnp.float32)

    def b(shape):
        return (0.01 * jax.random.normal(next(keys), shape, jnp.float32)).astype(jnp.float32)

    params = {
        # encoder: ResnetPointnet(c_dim, dim=3, hidden_dim=H)
        "w_pos": w((3, 2 * H), 3), "b_pos": b((1, 2 * H)),
        "enc_w0": w((N_BLOCKS, 2 * H, H), 2 * H), "enc_b0": b((N_BLOCKS, 1, H)),
        # NOTE: PyTorch zero-inits fc_1 weights; we use random to exercise the path.
        "enc_w1": w((N_BLOCKS, H, H), H), "enc_b1": b((N_BLOCKS, 1, H)),
        "enc_ws": w((N_BLOCKS, 2 * H, H), 2 * H),            # shortcut, bias=False
        "w_c": w((H, C), H), "b_c": b((1, C)),
        # decoder: Decoder(dim=3, z_dim=0, c_dim=C, hidden_size=H)
        "w_p": w((3, H), 3), "b_p": b((1, H)),
        "w_cd": w((C, H), C), "b_cd": b((1, H)),
        "dec_w0": w((N_BLOCKS, H, H), H), "dec_b0": b((N_BLOCKS, 1, H)),
        "dec_w1": w((N_BLOCKS, H, H), H), "dec_b1": b((N_BLOCKS, 1, H)),
        "w_out": w((H, 1), H), "b_out": b((1, 1)),
    }
    return params


def pack_params(params):
    """Pack all weights/biases into one (rows, 64) f32 block (single resident DMA)."""
    buf = np.zeros((_PACK_ROWS, _PACK_W), np.float32)
    H = HIDDEN

    def put(name, arr):
        off, r, c = _LAYOUT[name]
        buf[off:off + r, :c] = np.asarray(arr, np.float32).reshape(r, c)

    put("w_pos", params["w_pos"]); put("b_pos", params["b_pos"])
    put("enc_w0_0", params["enc_w0"][0]); put("enc_b0_0", params["enc_b0"][0])
    put("enc_w1_0", params["enc_w1"][0]); put("enc_b1_0", params["enc_b1"][0])
    put("enc_ws_0", params["enc_ws"][0])
    for i in range(1, N_BLOCKS):
        w0 = np.asarray(params["enc_w0"][i])
        ws = np.asarray(params["enc_ws"][i])
        put(f"enc_w0t_{i}", w0[:H]); put(f"enc_w0b_{i}", w0[H:])
        put(f"enc_b0_{i}", params["enc_b0"][i])
        put(f"enc_w1_{i}", params["enc_w1"][i]); put(f"enc_b1_{i}", params["enc_b1"][i])
        put(f"enc_wst_{i}", ws[:H]); put(f"enc_wsb_{i}", ws[H:])
    put("w_c", params["w_c"]); put("b_c", params["b_c"])
    put("w_p", params["w_p"]); put("b_p", params["b_p"])
    put("w_cd", params["w_cd"]); put("b_cd", params["b_cd"])
    for i in range(N_BLOCKS):
        put(f"dec_w0_{i}", params["dec_w0"][i]); put(f"dec_b0_{i}", params["dec_b0"][i])
        put(f"dec_w1_{i}", params["dec_w1"][i]); put(f"dec_b1_{i}", params["dec_b1"][i])
    put("w_out_t", np.asarray(params["w_out"]).T)
    put("b_out", params["b_out"])
    return jnp.asarray(buf)


# ---------------------------------------------------------------------------
# Pure-JAX reference (HIGHEST precision) for the self-test
# ---------------------------------------------------------------------------
def onet_reference(p, inputs, params):
    relu = lambda x: jnp.maximum(x, 0.0)
    hp = jax.lax.Precision.HIGHEST
    dot = lambda x, w: jnp.dot(x, w, precision=hp)
    lin = lambda x, w, bb: dot(x, w) + bb
    # encoder
    net = lin(inputs, params["w_pos"], params["b_pos"])
    for i in range(N_BLOCKS):
        h = lin(relu(net), params["enc_w0"][i], params["enc_b0"][i])
        dx = lin(relu(h), params["enc_w1"][i], params["enc_b1"][i])
        net = dot(net, params["enc_ws"][i]) + dx
        if i < N_BLOCKS - 1:
            pooled = jnp.max(net, axis=1, keepdims=True)
            net = jnp.concatenate([net, jnp.broadcast_to(pooled, net.shape)], axis=-1)
    pooled = jnp.max(net, axis=1)                         # (B, H)
    c = lin(relu(pooled), params["w_c"], params["b_c"])   # (B, C)
    # decoder
    net = lin(p, params["w_p"], params["b_p"])
    net = net + lin(c, params["w_cd"], params["b_cd"])[:, None, :]
    for i in range(N_BLOCKS):
        h = lin(relu(net), params["dec_w0"][i], params["dec_b0"][i])
        dx = lin(relu(h), params["dec_w1"][i], params["dec_b1"][i])
        net = net + dx
    return lin(relu(net), params["w_out"], params["b_out"])[..., 0]


if __name__ == "__main__":
    key = jax.random.PRNGKey(0)
    k_in, k_p, k_w = jax.random.split(key, 3)

    inputs = jax.random.normal(k_in, (B, N_IN, 3), jnp.float32)          # conditioning point cloud
    p = jax.random.uniform(k_p, (B, T_Q, 3), jnp.float32, -0.5, 0.5)     # query points
    params = init_params(k_w)
    packed_w = pack_params(params)                                       # packed once, host-side

    logits, probs = occupancy_network_forward(p, inputs, packed_w)
    jax.block_until_ready((logits, probs))

    ref = onet_reference(p, inputs, params)
    np.testing.assert_allclose(np.asarray(logits), np.asarray(ref), rtol=1e-3, atol=1e-3)
    np.testing.assert_allclose(np.asarray(probs), np.asarray(jax.nn.sigmoid(ref)),
                               rtol=1e-3, atol=1e-3)

    print("KERNEL_OK")
</pallas_src>

<mosaic_0001>
module attributes {stable_mosaic.version = 11 : i64} {
  func.func @_onet_kernel(%arg0: memref<128x3xf32, #tpu.memory_space<vmem>>, %arg1: memref<128x3xf32, #tpu.memory_space<vmem>>, %arg2: memref<1408x64xf32, #tpu.memory_space<vmem>>, %arg3: memref<1x128xf32, #tpu.memory_space<vmem>>) attributes {dimension_semantics = [], scalar_prefetch = 0 : i64, scratch_operands = 0 : i64, tpu.core_type = #tpu.core_type<tc>} {
    %0 = tpu.iota {dimensions = array<i32: 0>} : vector<128x32xi32>
    %c64_i32 = arith.constant 64 : i32
    %1 = vector.broadcast %c64_i32 : i32 to vector<128x32xi32>
    %2 = arith.cmpi slt, %0, %1 : vector<128x32xi32>
    %3 = tpu.iota {dimensions = array<i32: 0>} : vector<128x32xi32>
    %c64_i32_0 = arith.constant 64 : i32
    %4 = vector.broadcast %c64_i32_0 : i32 to vector<128x32xi32>
    %5 = arith.cmpi slt, %3, %4 : vector<128x32xi32>
    %c0 = arith.constant 0 : index
    %c0_1 = arith.constant 0 : index
    %6 = vector.load %arg0[%c0, %c0_1] : memref<128x3xf32, #tpu.memory_space<vmem>>, vector<128x3xf32>
    %c0_2 = arith.constant 0 : index
    %c0_3 = arith.constant 0 : index
    %7 = vector.load %arg2[%c0_2, %c0_3] : memref<1408x64xf32, #tpu.memory_space<vmem>>, vector<3x64xf32>
    %cst = arith.constant dense<0.000000e+00> : vector<128x64xf32>
    %8 = tpu.matmul %6, %7, %cst {dimension_numbers = #tpu.dot_dimension_numbers<[1], [0], [0], [1], [0, 0, 1, 1], [], []>} : vector<128x3xf32>, vector<3x64xf32>, vector<128x64xf32> -> vector<128x64xf32>
    %c8 = arith.constant 8 : index
    %c0_4 = arith.constant 0 : index
    %9 = vector.load %arg2[%c8, %c0_4] : memref<1408x64xf32, #tpu.memory_space<vmem>>, vector<1x64xf32>
    %10 = vector.broadcast %9 : vector<1x64xf32> to vector<128x64xf32>
    %11 = arith.addf %8, %10 : vector<128x64xf32>
    %cst_5 = arith.constant 0.000000e+00 : f32
    %12 = vector.broadcast %cst_5 : f32 to vector<128x64xf32>
    %13 = arith.maximumf %11, %12 : vector<128x64xf32>
    %c16 = arith.constant 16 : index
    %c0_6 = arith.constant 0 : index
    %14 = vector.load %arg2[%c16, %c0_6] : memref<1408x64xf32, #tpu.memory_space<vmem>>, vector<64x32xf32>
    %cst_7 = arith.constant dense<0.000000e+00> : vector<128x32xf32>
    %15 = tpu.matmul %13, %14, %cst_7 {dimension_numbers = #tpu.dot_dimension_numbers<[1], [0], [0], [1], [0, 0, 1, 1], [], []>} : vector<128x64xf32>, vector<64x32xf32>, vector<128x32xf32> -> vector<128x32xf32>
    %c80 = arith.constant 80 : index
    %c0_8 = arith.constant 0 : index
    %16 = vector.load %arg2[%c80, %c0_8] : memref<1408x64xf32, #tpu.memory_space<vmem>>, vector<1x32xf32>
    %17 = vector.broadcast %16 : vector<1x32xf32> to vector<128x32xf32>
    %18 = arith.addf %15, %17 : vector<128x32xf32>
    %cst_9 = arith.constant 0.000000e+00 : f32
    %19 = vector.broadcast %cst_9 : f32 to vector<128x32xf32>
    %20 = arith.maximumf %18, %19 : vector<128x32xf32>
    %c88 = arith.constant 88 : index
    %c0_10 = arith.constant 0 : index
    %21 = vector.load %arg2[%c88, %c0_10] : memref<1408x64xf32, #tpu.memory_space<vmem>>, vector<32x32xf32>
    %cst_11 = arith.constant dense<0.000000e+00> : vector<128x32xf32>
    %22 = tpu.matmul %20, %21, %cst_11 {dimension_numbers = #tpu.dot_dimension_numbers<[1], [0], [0], [1], [0, 0, 1, 1], [], []>} : vector<128x32xf32>, vector<32x32xf32>, vector<128x32xf32> -> vector<128x32xf32>
    %c120 = arith.constant 120 : index
    %c0_12 = arith.constant 0 : index
    %23 = vector.load %arg2[%c120, %c0_12] : memref<1408x64xf32, #tpu.memory_space<vmem>>, vector<1x32xf32>
    %24 = vector.broadcast %23 : vector<1x32xf32> to vector<128x32xf32>
    %25 = arith.addf %22, %24 : vector<128x32xf32>
    %c128 = arith.constant 128 : index
    %c0_13 = arith.constant 0 : index
    %26 = vector.load %arg2[%c128, %c0_13] : memref<1408x64xf32, #tpu.memory_space<vmem>>, vector<64x32xf32>
    %cst_14 = arith.constant dense<0.000000e+00> : vector<128x32xf32>
    %27 = tpu.matmul %11, %26, %cst_14 {dimension_numbers = #tpu.dot_dimension_numbers<[1], [0], [0], [1], [0, 0, 1, 1], [], []>} : vector<128x64xf32>, vector<64x32xf32>, vector<128x32xf32> -> vector<128x32xf32>
    %28 = arith.addf %27, %25 : vector<128x32xf32>
    %29 = vector.extract_strided_slice %28 {offsets = [0, 0], sizes = [64, 32], strides = [1, 1]} : vector<128x32xf32> to vector<64x32xf32>
    %cst_15 = arith.constant dense<0xFF800000> : vector<32xf32>
    %30 = vector.multi_reduction <maximumf>, %29, %cst_15 [0] : vector<64x32xf32> to vector<32xf32>
    %31 = vector.shape_cast %30 : vector<32xf32> to vector<1x32xf32>
    %32 = vector.extract_strided_slice %28 {offsets = [64, 0], sizes = [64, 32], strides = [1, 1]} : vector<128x32xf32> to vector<64x32xf32>
    %cst_16 = arith.constant dense<0xFF800000> : vector<32xf32>
    %33 = vector.multi_reduction <maximumf>, %32, %cst_16 [0] : vector<64x32xf32> to vector<32xf32>
    %34 = vector.shape_cast %33 : vector<32xf32> to vector<1x32xf32>
    %35 = vector.shape_cast %31 : vector<1x32xf32> to vector<1x32xf32>
    %36 = vector.broadcast %35 : vector<1x32xf32> to vector<128x32xf32>
    %37 = vector.shape_cast %34 : vector<1x32xf32> to vector<1x32xf32>
    %38 = vector.broadcast %37 : vector<1x32xf32> to vector<128x32xf32>
    %39 = arith.select %2, %36, %38 : vector<128x32xi1>, vector<128x32xf32>
    %cst_17 = arith.constant 0.000000e+00 : f32
    %40 = vector.broadcast %cst_17 : f32 to vector<128x32xf32>
    %41 = arith.maximumf %28, %40 : vector<128x32xf32>
    %c192 = arith.constant 192 : index
    %c0_18 = arith.constant 0 : index
    %42 = vector.load %arg2[%c192, %c0_18] : memref<1408x64xf32, #tpu.memory_space<vmem>>, vector<32x32xf32>
    %cst_19 = arith.constant dense<0.000000e+00> : vector<128x32xf32>
    %43 = tpu.matmul %41, %42, %cst_19 {dimension_numbers = #tpu.dot_dimension_numbers<[1], [0], [0], [1], [0, 0, 1, 1], [], []>} : vector<128x32xf32>, vector<32x32xf32>, vector<128x32xf32> -> vector<128x32xf32>
    %cst_20 = arith.constant 0.000000e+00 : f32
    %44 = vector.broadcast %cst_20 : f32 to vector<128x32xf32>
    %45 = arith.maximumf %39, %44 : vector<128x32xf32>
    %c224 = arith.constant 224 : index
    %c0_21 = arith.constant 0 : index
    %46 = vector.load %arg2[%c224, %c0_21] : memref<1408x64xf32, #tpu.memory_space<vmem>>, vector<32x32xf32>
    %cst_22 = arith.constant dense<0.000000e+00> : vector<128x32xf32>
    %47 = tpu.matmul %45, %46, %cst_22 {dimension_numbers = #tpu.dot_dimension_numbers<[1], [0], [0], [1], [0, 0, 1, 1], [], []>} : vector<128x32xf32>, vector<32x32xf32>, vector<128x32xf32> -> vector<128x32xf32>
    %48 = arith.addf %43, %47 : vector<128x32xf32>
    %c256 = arith.constant 256 : index
    %c0_23 = arith.constant 0 : index
    %49 = vector.load %arg2[%c256, %c0_23] : memref<1408x64xf32, #tpu.memory_space<vmem>>, vector<1x32xf32>
    %50 = vector.broadcast %49 : vector<1x32xf32> to vector<128x32xf32>
    %51 = arith.addf %48, %50 : vector<128x32xf32>
    %cst_24 = arith.constant 0.000000e+00 : f32
    %52 = vector.broadcast %cst_24 : f32 to vector<128x32xf32>
    %53 = arith.maximumf %51, %52 : vector<128x32xf32>
    %c264 = arith.constant 264 : index
    %c0_25 = arith.constant 0 : index
    %54 = vector.load %arg2[%c264, %c0_25] : memref<1408x64xf32, #tpu.memory_space<vmem>>, vector<32x32xf32>
    %cst_26 = arith.constant dense<0.000000e+00> : vector<128x32xf32>
    %55 = tpu.matmul %53, %54, %cst_26 {dimension_numbers = #tpu.dot_dimension_numbers<[1], [0], [0], [1], [0, 0, 1, 1], [], []>} : vector<128x32xf32>, vector<32x32xf32>, vector<128x32xf32> -> vector<128x32xf32>
    %c296 = arith.constant 296 : index
    %c0_27 = arith.constant 0 : index
    %56 = vector.load %arg2[%c296, %c0_27] : memref<1408x64xf32, #tpu.memory_space<vmem>>, vector<1x32xf32>
    %57 = vector.broadcast %56 : vector<1x32xf32> to vector<128x32xf32>
    %58 = arith.addf %55, %57 : vector<128x32xf32>
    %c304 = arith.constant 304 : index
    %c0_28 = arith.constant 0 : index
    %59 = vector.load %arg2[%c304, %c0_28] : memref<1408x64xf32, #tpu.memory_space<vmem>>, vector<32x32xf32>
    %cst_29 = arith.constant dense<0.000000e+00> : vector<128x32xf32>
    %60 = tpu.matmul %28, %59, %cst_29 {dimension_numbers = #tpu.dot_dimension_numbers<[1], [0], [0], [1], [0, 0, 1, 1], [], []>} : vector<128x32xf32>, vector<32x32xf32>, vector<128x32xf32> -> vector<128x32xf32>
    %c336 = arith.constant 336 : index
    %c0_30 = arith.constant 0 : index
    %61 = vector.load %arg2[%c336, %c0_30] : memref<1408x64xf32, #tpu.memory_space<vmem>>, vector<32x32xf32>
    %cst_31 = arith.constant dense<0.000000e+00> : vector<128x32xf32>
    %62 = tpu.matmul %39, %61, %cst_31 {dimension_numbers = #tpu.dot_dimension_numbers<[1], [0], [0], [1], [0, 0, 1, 1], [], []>} : vector<128x32xf32>, vector<32x32xf32>, vector<128x32xf32> -> vector<128x32xf32>
    %63 = arith.addf %60, %62 : vector<128x32xf32>
    %64 = arith.addf %63, %58 : vector<128x32xf32>
    %65 = vector.extract_strided_slice %64 {offsets = [0, 0], sizes = [64, 32], strides = [1, 1]} : vector<128x32xf32> to vector<64x32xf32>
    %cst_32 = arith.constant dense<0xFF800000> : vector<32xf32>
    %66 = vector.multi_reduction <maximumf>, %65, %cst_32 [0] : vector<64x32xf32> to vector<32xf32>
    %67 = vector.shape_cast %66 : vector<32xf32> to vector<1x32xf32>
    %68 = vector.extract_strided_slice %64 {offsets = [64, 0], sizes = [64, 32], strides = [1, 1]} : vector<128x32xf32> to vector<64x32xf32>
    %cst_33 = arith.constant dense<0xFF800000> : vector<32xf32>
    %69 = vector.multi_reduction <maximumf>, %68, %cst_33 [0] : vector<64x32xf32> to vector<32xf32>
    %70 = vector.shape_cast %69 : vector<32xf32> to vector<1x32xf32>
    %71 = vector.shape_cast %67 : vector<1x32xf32> to vector<1x32xf32>
    %72 = vector.broadcast %71 : vector<1x32xf32> to vector<128x32xf32>
    %73 = vector.shape_cast %70 : vector<1x32xf32> to vector<1x32xf32>
    %74 = vector.broadcast %73 : vector<1x32xf32> to vector<128x32xf32>
    %75 = arith.select %2, %72, %74 : vector<128x32xi1>, vector<128x32xf32>
    %cst_34 = arith.constant 0.000000e+00 : f32
    %76 = vector.broadcast %cst_34 : f32 to vector<128x32xf32>
    %77 = arith.maximumf %64, %76 : vector<128x32xf32>
    %c368 = arith.constant 368 : index
    %c0_35 = arith.constant 0 : index
    %78 = vector.load %arg2[%c368, %c0_35] : memref<1408x64xf32, #tpu.memory_space<vmem>>, vector<32x32xf32>
    %cst_36 = arith.constant dense<0.000000e+00> : vector<128x32xf32>
    %79 = tpu.matmul %77, %78, %cst_36 {dimension_numbers = #tpu.dot_dimension_numbers<[1], [0], [0], [1], [0, 0, 1, 1], [], []>} : vector<128x32xf32>, vector<32x32xf32>, vector<128x32xf32> -> vector<128x32xf32>
    %cst_37 = arith.constant 0.000000e+00 : f32
    %80 = vector.broadcast %cst_37 : f32 to vector<128x32xf32>
    %81 = arith.maximumf %75, %80 : vector<128x32xf32>
    %c400 = arith.constant 400 : index
    %c0_38 = arith.constant 0 : index
    %82 = vector.load %arg2[%c400, %c0_38] : memref<1408x64xf32, #tpu.memory_space<vmem>>, vector<32x32xf32>
    %cst_39 = arith.constant dense<0.000000e+00> : vector<128x32xf32>
    %83 = tpu.matmul %81, %82, %cst_39 {dimension_numbers = #tpu.dot_dimension_numbers<[1], [0], [0], [1], [0, 0, 1, 1], [], []>} : vector<128x32xf32>, vector<32x32xf32>, vector<128x32xf32> -> vector<128x32xf32>
    %84 = arith.addf %79, %83 : vector<128x32xf32>
    %c432 = arith.constant 432 : index
    %c0_40 = arith.constant 0 : index
    %85 = vector.load %arg2[%c432, %c0_40] : memref<1408x64xf32, #tpu.memory_space<vmem>>, vector<1x32xf32>
    %86 = vector.broadcast %85 : vector<1x32xf32> to vector<128x32xf32>
    %87 = arith.addf %84, %86 : vector<128x32xf32>
    %cst_41 = arith.constant 0.000000e+00 : f32
    %88 = vector.broadcast %cst_41 : f32 to vector<128x32xf32>
    %89 = arith.maximumf %87, %88 : vector<128x32xf32>
    %c440 = arith.constant 440 : index
    %c0_42 = arith.constant 0 : index
    %90 = vector.load %arg2[%c440, %c0_42] : memref<1408x64xf32, #tpu.memory_space<vmem>>, vector<32x32xf32>
    %cst_43 = arith.constant dense<0.000000e+00> : vector<128x32xf32>
    %91 = tpu.matmul %89, %90, %cst_43 {dimension_numbers = #tpu.dot_dimension_numbers<[1], [0], [0], [1], [0, 0, 1, 1], [], []>} : vector<128x32xf32>, vector<32x32xf32>, vector<128x32xf32> -> vector<128x32xf32>
    %c472 = arith.constant 472 : index
    %c0_44 = arith.constant 0 : index
    %92 = vector.load %arg2[%c472, %c0_44] : memref<1408x64xf32, #tpu.memory_space<vmem>>, vector<1x32xf32>
    %93 = vector.broadcast %92 : vector<1x32xf32> to vector<128x32xf32>
    %94 = arith.addf %91, %93 : vector<128x32xf32>
    %c480 = arith.constant 480 : index
    %c0_45 = arith.constant 0 : index
    %95 = vector.load %arg2[%c480, %c0_45] : memref<1408x64xf32, #tpu.memory_space<vmem>>, vector<32x32xf32>
    %cst_46 = arith.constant dense<0.000000e+00> : vector<128x32xf32>
    %96 = tpu.matmul %64, %95, %cst_46 {dimension_numbers = #tpu.dot_dimension_numbers<[1], [0], [0], [1], [0, 0, 1, 1], [], []>} : vector<128x32xf32>, vector<32x32xf32>, vector<128x32xf32> -> vector<128x32xf32>
    %c512 = arith.constant 512 : index
    %c0_47 = arith.constant 0 : index
    %97 = vector.load %arg2[%c512, %c0_47] : memref<1408x64xf32, #tpu.memory_space<vmem>>, vector<32x32xf32>
    %cst_48 = arith.constant dense<0.000000e+00> : vector<128x32xf32>
    %98 = tpu.matmul %75, %97, %cst_48 {dimension_numbers = #tpu.dot_dimension_numbers<[1], [0], [0], [1], [0, 0, 1, 1], [], []>} : vector<128x32xf32>, vector<32x32xf32>, vector<128x32xf32> -> vector<128x32xf32>
    %99 = arith.addf %96, %98 : vector<128x32xf32>
    %100 = arith.addf %99, %94 : vector<128x32xf32>
    %101 = vector.extract_strided_slice %100 {offsets = [0, 0], sizes = [64, 32], strides = [1, 1]} : vector<128x32xf32> to vector<64x32xf32>
    %cst_49 = arith.constant dense<0xFF800000> : vector<32xf32>
    %102 = vector.multi_reduction <maximumf>, %101, %cst_49 [0] : vector<64x32xf32> to vector<32xf32>
    %103 = vector.shape_cast %102 : vector<32xf32> to vector<1x32xf32>
    %104 = vector.extract_strided_slice %100 {offsets = [64, 0], sizes = [64, 32], strides = [1, 1]} : vector<128x32xf32> to vector<64x32xf32>
    %cst_50 = arith.constant dense<0xFF800000> : vector<32xf32>
    %105 = vector.multi_reduction <maximumf>, %104, %cst_50 [0] : vector<64x32xf32> to vector<32xf32>
    %106 = vector.shape_cast %105 : vector<32xf32> to vector<1x32xf32>
    %107 = vector.shape_cast %103 : vector<1x32xf32> to vector<1x32xf32>
    %108 = vector.broadcast %107 : vector<1x32xf32> to vector<128x32xf32>
    %109 = vector.shape_cast %106 : vector<1x32xf32> to vector<1x32xf32>
    %110 = vector.broadcast %109 : vector<1x32xf32> to vector<128x32xf32>
    %111 = arith.select %2, %108, %110 : vector<128x32xi1>, vector<128x32xf32>
    %cst_51 = arith.constant 0.000000e+00 : f32
    %112 = vector.broadcast %cst_51 : f32 to vector<128x32xf32>
    %113 = arith.maximumf %100, %112 : vector<128x32xf32>
    %c544 = arith.constant 544 : index
    %c0_52 = arith.constant 0 : index
    %114 = vector.load %arg2[%c544, %c0_52] : memref<1408x64xf32, #tpu.memory_space<vmem>>, vector<32x32xf32>
    %cst_53 = arith.constant dense<0.000000e+00> : vector<128x32xf32>
    %115 = tpu.matmul %113, %114, %cst_53 {dimension_numbers = #tpu.dot_dimension_numbers<[1], [0], [0], [1], [0, 0, 1, 1], [], []>} : vector<128x32xf32>, vector<32x32xf32>, vector<128x32xf32> -> vector<128x32xf32>
    %cst_54 = arith.constant 0.000000e+00 : f32
    %116 = vector.broadcast %cst_54 : f32 to vector<128x32xf32>
    %117 = arith.maximumf %111, %116 : vector<128x32xf32>
    %c576 = arith.constant 576 : index
    %c0_55 = arith.constant 0 : index
    %118 = vector.load %arg2[%c576, %c0_55] : memref<1408x64xf32, #tpu.memory_space<vmem>>, vector<32x32xf32>
    %cst_56 = arith.constant dense<0.000000e+00> : vector<128x32xf32>
    %119 = tpu.matmul %117, %118, %cst_56 {dimension_numbers = #tpu.dot_dimension_numbers<[1], [0], [0], [1], [0, 0, 1, 1], [], []>} : vector<128x32xf32>, vector<32x32xf32>, vector<128x32xf32> -> vector<128x32xf32>
    %120 = arith.addf %115, %119 : vector<128x32xf32>
    %c608 = arith.constant 608 : index
    %c0_57 = arith.constant 0 : index
    %121 = vector.load %arg2[%c608, %c0_57] : memref<1408x64xf32, #tpu.memory_space<vmem>>, vector<1x32xf32>
    %122 = vector.broadcast %121 : vector<1x32xf32> to vector<128x32xf32>
    %123 = arith.addf %120, %122 : vector<128x32xf32>
    %cst_58 = arith.constant 0.000000e+00 : f32
    %124 = vector.broadcast %cst_58 : f32 to vector<128x32xf32>
    %125 = arith.maximumf %123, %124 : vector<128x32xf32>
    %c616 = arith.constant 616 : index
    %c0_59 = arith.constant 0 : index
    %126 = vector.load %arg2[%c616, %c0_59] : memref<1408x64xf32, #tpu.memory_space<vmem>>, vector<32x32xf32>
    %cst_60 = arith.constant dense<0.000000e+00> : vector<128x32xf32>
    %127 = tpu.matmul %125, %126, %cst_60 {dimension_numbers = #tpu.dot_dimension_numbers<[1], [0], [0], [1], [0, 0, 1, 1], [], []>} : vector<128x32xf32>, vector<32x32xf32>, vector<128x32xf32> -> vector<128x32xf32>
    %c648 = arith.constant 648 : index
    %c0_61 = arith.constant 0 : index
    %128 = vector.load %arg2[%c648, %c0_61] : memref<1408x64xf32, #tpu.memory_space<vmem>>, vector<1x32xf32>
    %129 = vector.broadcast %128 : vector<1x32xf32> to vector<128x32xf32>
    %130 = arith.addf %127, %129 : vector<128x32xf32>
    %c656 = arith.constant 656 : index
    %c0_62 = arith.constant 0 : index
    %131 = vector.load %arg2[%c656, %c0_62] : memref<1408x64xf32, #tpu.memory_space<vmem>>, vector<32x32xf32>
    %cst_63 = arith.constant dense<0.000000e+00> : vector<128x32xf32>
    %132 = tpu.matmul %100, %131, %cst_63 {dimension_numbers = #tpu.dot_dimension_numbers<[1], [0], [0], [1], [0, 0, 1, 1], [], []>} : vector<128x32xf32>, vector<32x32xf32>, vector<128x32xf32> -> vector<128x32xf32>
    %c688 = arith.constant 688 : index
    %c0_64 = arith.constant 0 : index
    %133 = vector.load %arg2[%c688, %c0_64] : memref<1408x64xf32, #tpu.memory_space<vmem>>, vector<32x32xf32>
    %cst_65 = arith.constant dense<0.000000e+00> : vector<128x32xf32>
    %134 = tpu.matmul %111, %133, %cst_65 {dimension_numbers = #tpu.dot_dimension_numbers<[1], [0], [0], [1], [0, 0, 1, 1], [], []>} : vector<128x32xf32>, vector<32x32xf32>, vector<128x32xf32> -> vector<128x32xf32>
    %135 = arith.addf %132, %134 : vector<128x32xf32>
    %136 = arith.addf %135, %130 : vector<128x32xf32>
    %137 = vector.extract_strided_slice %136 {offsets = [0, 0], sizes = [64, 32], strides = [1, 1]} : vector<128x32xf32> to vector<64x32xf32>
    %cst_66 = arith.constant dense<0xFF800000> : vector<32xf32>
    %138 = vector.multi_reduction <maximumf>, %137, %cst_66 [0] : vector<64x32xf32> to vector<32xf32>
    %139 = vector.shape_cast %138 : vector<32xf32> to vector<1x32xf32>
    %140 = vector.extract_strided_slice %136 {offsets = [64, 0], sizes = [64, 32], strides = [1, 1]} : vector<128x32xf32> to vector<64x32xf32>
    %cst_67 = arith.constant dense<0xFF800000> : vector<32xf32>
    %141 = vector.multi_reduction <maximumf>, %140, %cst_67 [0] : vector<64x32xf32> to vector<32xf32>
    %142 = vector.shape_cast %141 : vector<32xf32> to vector<1x32xf32>
    %143 = vector.shape_cast %139 : vector<1x32xf32> to vector<1x32xf32>
    %144 = vector.broadcast %143 : vector<1x32xf32> to vector<128x32xf32>
    %145 = vector.shape_cast %142 : vector<1x32xf32> to vector<1x32xf32>
    %146 = vector.broadcast %145 : vector<1x32xf32> to vector<128x32xf32>
    %147 = arith.select %2, %144, %146 : vector<128x32xi1>, vector<128x32xf32>
    %cst_68 = arith.constant 0.000000e+00 : f32
    %148 = vector.broadcast %cst_68 : f32 to vector<128x32xf32>
    %149 = arith.maximumf %136, %148 : vector<128x32xf32>
    %c720 = arith.constant 720 : index
    %c0_69 = arith.constant 0 : index
    %150 = vector.load %arg2[%c720, %c0_69] : memref<1408x64xf32, #tpu.memory_space<vmem>>, vector<32x32xf32>
    %cst_70 = arith.constant dense<0.000000e+00> : vector<128x32xf32>
    %151 = tpu.matmul %149, %150, %cst_70 {dimension_numbers = #tpu.dot_dimension_numbers<[1], [0], [0], [1], [0, 0, 1, 1], [], []>} : vector<128x32xf32>, vector<32x32xf32>, vector<128x32xf32> -> vector<128x32xf32>
    %cst_71 = arith.constant 0.000000e+00 : f32
    %152 = vector.broadcast %cst_71 : f32 to vector<128x32xf32>
    %153 = arith.maximumf %147, %152 : vector<128x32xf32>
    %c752 = arith.constant 752 : index
    %c0_72 = arith.constant 0 : index
    %154 = vector.load %arg2[%c752, %c0_72] : memref<1408x64xf32, #tpu.memory_space<vmem>>, vector<32x32xf32>
    %cst_73 = arith.constant dense<0.000000e+00> : vector<128x32xf32>
    %155 = tpu.matmul %153, %154, %cst_73 {dimension_numbers = #tpu.dot_dimension_numbers<[1], [0], [0], [1], [0, 0, 1, 1], [], []>} : vector<128x32xf32>, vector<32x32xf32>, vector<128x32xf32> -> vector<128x32xf32>
    %156 = arith.addf %151, %155 : vector<128x32xf32>
    %c784 = arith.constant 784 : index
    %c0_74 = arith.constant 0 : index
    %157 = vector.load %arg2[%c784, %c0_74] : memref<1408x64xf32, #tpu.memory_space<vmem>>, vector<1x32xf32>
    %158 = vector.broadcast %157 : vector<1x32xf32> to vector<128x32xf32>
    %159 = arith.addf %156, %158 : vector<128x32xf32>
    %cst_75 = arith.constant 0.000000e+00 : f32
    %160 = vector.broadcast %cst_75 : f32 to vector<128x32xf32>
    %161 = arith.maximumf %159, %160 : vector<128x32xf32>
    %c792 = arith.constant 792 : index
    %c0_76 = arith.constant 0 : index
    %162 = vector.load %arg2[%c792, %c0_76] : memref<1408x64xf32, #tpu.memory_space<vmem>>, vector<32x32xf32>
    %cst_77 = arith.constant dense<0.000000e+00> : vector<128x32xf32>
    %163 = tpu.matmul %161, %162, %cst_77 {dimension_numbers = #tpu.dot_dimension_numbers<[1], [0], [0], [1], [0, 0, 1, 1], [], []>} : vector<128x32xf32>, vector<32x32xf32>, vector<128x32xf32> -> vector<128x32xf32>
    %c824 = arith.constant 824 : index
    %c0_78 = arith.constant 0 : index
    %164 = vector.load %arg2[%c824, %c0_78] : memref<1408x64xf32, #tpu.memory_space<vmem>>, vector<1x32xf32>
    %165 = vector.broadcast %164 : vector<1x32xf32> to vector<128x32xf32>
    %166 = arith.addf %163, %165 : vector<128x32xf32>
    %c832 = arith.constant 832 : index
    %c0_79 = arith.constant 0 : index
    %167 = vector.load %arg2[%c832, %c0_79] : memref<1408x64xf32, #tpu.memory_space<vmem>>, vector<32x32xf32>
    %cst_80 = arith.constant dense<0.000000e+00> : vector<128x32xf32>
    %168 = tpu.matmul %136, %167, %cst_80 {dimension_numbers = #tpu.dot_dimension_numbers<[1], [0], [0], [1], [0, 0, 1, 1], [], []>} : vector<128x32xf32>, vector<32x32xf32>, vector<128x32xf32> -> vector<128x32xf32>
    %c864 = arith.constant 864 : index
    %c0_81 = arith.constant 0 : index
    %169 = vector.load %arg2[%c864, %c0_81] : memref<1408x64xf32, #tpu.memory_space<vmem>>, vector<32x32xf32>
    %cst_82 = arith.constant dense<0.000000e+00> : vector<128x32xf32>
    %170 = tpu.matmul %147, %169, %cst_82 {dimension_numbers = #tpu.dot_dimension_numbers<[1], [0], [0], [1], [0, 0, 1, 1], [], []>} : vector<128x32xf32>, vector<32x32xf32>, vector<128x32xf32> -> vector<128x32xf32>
    %171 = arith.addf %168, %170 : vector<128x32xf32>
    %172 = arith.addf %171, %166 : vector<128x32xf32>
    %173 = vector.extract_strided_slice %172 {offsets = [0, 0], sizes = [64, 32], strides = [1, 1]} : vector<128x32xf32> to vector<64x32xf32>
    %cst_83 = arith.constant dense<0xFF800000> : vector<32xf32>
    %174 = vector.multi_reduction <maximumf>, %173, %cst_83 [0] : vector<64x32xf32> to vector<32xf32>
    %175 = vector.shape_cast %174 : vector<32xf32> to vector<1x32xf32>
    %176 = vector.extract_strided_slice %172 {offsets = [64, 0], sizes = [64, 32], strides = [1, 1]} : vector<128x32xf32> to vector<64x32xf32>
    %cst_84 = arith.constant dense<0xFF800000> : vector<32xf32>
    %177 = vector.multi_reduction <maximumf>, %176, %cst_84 [0] : vector<64x32xf32> to vector<32xf32>
    %178 = vector.shape_cast %177 : vector<32xf32> to vector<1x32xf32>
    %179 = vector.shape_cast %175 : vector<1x32xf32> to vector<1x32xf32>
    %180 = vector.broadcast %179 : vector<1x32xf32> to vector<128x32xf32>
    %181 = vector.shape_cast %178 : vector<1x32xf32> to vector<1x32xf32>
    %182 = vector.broadcast %181 : vector<1x32xf32> to vector<128x32xf32>
    %183 = arith.select %5, %180, %182 : vector<128x32xi1>, vector<128x32xf32>
    %cst_85 = arith.constant 0.000000e+00 : f32
    %184 = vector.broadcast %cst_85 : f32 to vector<128x32xf32>
    %185 = arith.maximumf %183, %184 : vector<128x32xf32>
    %c896 = arith.constant 896 : index
    %c0_86 = arith.constant 0 : index
    %186 = vector.load %arg2[%c896, %c0_86] : memref<1408x64xf32, #tpu.memory_space<vmem>>, vector<32x32xf32>
    %cst_87 = arith.constant dense<0.000000e+00> : vector<128x32xf32>
    %187 = tpu.matmul %185, %186, %cst_87 {dimension_numbers = #tpu.dot_dimension_numbers<[1], [0], [0], [1], [0, 0, 1, 1], [], []>} : vector<128x32xf32>, vector<32x32xf32>, vector<128x32xf32> -> vector<128x32xf32>
    %c928 = arith.constant 928 : index
    %c0_88 = arith.constant 0 : index
    %188 = vector.load %arg2[%c928, %c0_88] : memref<1408x64xf32, #tpu.memory_space<vmem>>, vector<1x32xf32>
    %189 = vector.broadcast %188 : vector<1x32xf32> to vector<128x32xf32>
    %190 = arith.addf %187, %189 : vector<128x32xf32>
    %c952 = arith.constant 952 : index
    %c0_89 = arith.constant 0 : index
    %191 = vector.load %arg2[%c952, %c0_89] : memref<1408x64xf32, #tpu.memory_space<vmem>>, vector<32x32xf32>
    %cst_90 = arith.constant dense<0.000000e+00> : vector<128x32xf32>
    %192 = tpu.matmul %190, %191, %cst_90 {dimension_numbers = #tpu.dot_dimension_numbers<[1], [0], [0], [1], [0, 0, 1, 1], [], []>} : vector<128x32xf32>, vector<32x32xf32>, vector<128x32xf32> -> vector<128x32xf32>
    %c984 = arith.constant 984 : index
    %c0_91 = arith.constant 0 : index
    %193 = vector.load %arg2[%c984, %c0_91] : memref<1408x64xf32, #tpu.memory_space<vmem>>, vector<1x32xf32>
    %194 = vector.broadcast %193 : vector<1x32xf32> to vector<128x32xf32>
    %195 = arith.addf %192, %194 : vector<128x32xf32>
    %c0_92 = arith.constant 0 : index
    %c0_93 = arith.constant 0 : index
    %196 = vector.load %arg1[%c0_92, %c0_93] : memref<128x3xf32, #tpu.memory_space<vmem>>, vector<128x3xf32>
    %c936 = arith.constant 936 : index
    %c0_94 = arith.constant 0 : index
    %197 = vector.load %arg2[%c936, %c0_94] : memref<1408x64xf32, #tpu.memory_space<vmem>>, vector<3x32xf32>
    %cst_95 = arith.constant dense<0.000000e+00> : vector<128x32xf32>
    %198 = tpu.matmul %196, %197, %cst_95 {dimension_numbers = #tpu.dot_dimension_numbers<[1], [0], [0], [1], [0, 0, 1, 1], [], []>} : vector<128x3xf32>, vector<3x32xf32>, vector<128x32xf32> -> vector<128x32xf32>
    %c944 = arith.constant 944 : index
    %c0_96 = arith.constant 0 : index
    %199 = vector.load %arg2[%c944, %c0_96] : memref<1408x64xf32, #tpu.memory_space<vmem>>, vector<1x32xf32>
    %200 = vector.broadcast %199 : vector<1x32xf32> to vector<128x32xf32>
    %201 = arith.addf %198, %200 : vector<128x32xf32>
    %202 = arith.addf %201, %195 : vector<128x32xf32>
    %cst_97 = arith.constant 0.000000e+00 : f32
    %203 = vector.broadcast %cst_97 : f32 to vector<128x32xf32>
    %204 = arith.maximumf %202, %203 : vector<128x32xf32>
    %c992 = arith.constant 992 : index
    %c0_98 = arith.constant 0 : index
    %205 = vector.load %arg2[%c992, %c0_98] : memref<1408x64xf32, #tpu.memory_space<vmem>>, vector<32x32xf32>
    %cst_99 = arith.constant dense<0.000000e+00> : vector<128x32xf32>
    %206 = tpu.matmul %204, %205, %cst_99 {dimension_numbers = #tpu.dot_dimension_numbers<[1], [0], [0], [1], [0, 0, 1, 1], [], []>} : vector<128x32xf32>, vector<32x32xf32>, vector<128x32xf32> -> vector<128x32xf32>
    %c1024 = arith.constant 1024 : index
    %c0_100 = arith.constant 0 : index
    %207 = vector.load %arg2[%c1024, %c0_100] : memref<1408x64xf32, #tpu.memory_space<vmem>>, vector<1x32xf32>
    %208 = vector.broadcast %207 : vector<1x32xf32> to vector<128x32xf32>
    %209 = arith.addf %206, %208 : vector<128x32xf32>
    %cst_101 = arith.constant 0.000000e+00 : f32
    %210 = vector.broadcast %cst_101 : f32 to vector<128x32xf32>
    %211 = arith.maximumf %209, %210 : vector<128x32xf32>
    %c1032 = arith.constant 1032 : index
    %c0_102 = arith.constant 0 : index
    %212 = vector.load %arg2[%c1032, %c0_102] : memref<1408x64xf32, #tpu.memory_space<vmem>>, vector<32x32xf32>
    %cst_103 = arith.constant dense<0.000000e+00> : vector<128x32xf32>
    %213 = tpu.matmul %211, %212, %cst_103 {dimension_numbers = #tpu.dot_dimension_numbers<[1], [0], [0], [1], [0, 0, 1, 1], [], []>} : vector<128x32xf32>, vector<32x32xf32>, vector<128x32xf32> -> vector<128x32xf32>
    %c1064 = arith.constant 1064 : index
    %c0_104 = arith.constant 0 : index
    %214 = vector.load %arg2[%c1064, %c0_104] : memref<1408x64xf32, #tpu.memory_space<vmem>>, vector<1x32xf32>
    %215 = vector.broadcast %214 : vector<1x32xf32> to vector<128x32xf32>
    %216 = arith.addf %213, %215 : vector<128x32xf32>
    %217 = arith.addf %202, %216 : vector<128x32xf32>
    %cst_105 = arith.constant 0.000000e+00 : f32
    %218 = vector.broadcast %cst_105 : f32 to vector<128x32xf32>
    %219 = arith.maximumf %217, %218 : vector<128x32xf32>
    %c1072 = arith.constant 1072 : index
    %c0_106 = arith.constant 0 : index
    %220 = vector.load %arg2[%c1072, %c0_106] : memref<1408x64xf32, #tpu.memory_space<vmem>>, vector<32x32xf32>
    %cst_107 = arith.constant dense<0.000000e+00> : vector<128x32xf32>
    %221 = tpu.matmul %219, %220, %cst_107 {dimension_numbers = #tpu.dot_dimension_numbers<[1], [0], [0], [1], [0, 0, 1, 1], [], []>} : vector<128x32xf32>, vector<32x32xf32>, vector<128x32xf32> -> vector<128x32xf32>
    %c1104 = arith.constant 1104 : index
    %c0_108 = arith.constant 0 : index
    %222 = vector.load %arg2[%c1104, %c0_108] : memref<1408x64xf32, #tpu.memory_space<vmem>>, vector<1x32xf32>
    %223 = vector.broadcast %222 : vector<1x32xf32> to vector<128x32xf32>
    %224 = arith.addf %221, %223 : vector<128x32xf32>
    %cst_109 = arith.constant 0.000000e+00 : f32
    %225 = vector.broadcast %cst_109 : f32 to vector<128x32xf32>
    %226 = arith.maximumf %224, %225 : vector<128x32xf32>
    %c1112 = arith.constant 1112 : index
    %c0_110 = arith.constant 0 : index
    %227 = vector.load %arg2[%c1112, %c0_110] : memref<1408x64xf32, #tpu.memory_space<vmem>>, vector<32x32xf32>
    %cst_111 = arith.constant dense<0.000000e+00> : vector<128x32xf32>
    %228 = tpu.matmul %226, %227, %cst_111 {dimension_numbers = #tpu.dot_dimension_numbers<[1], [0], [0], [1], [0, 0, 1, 1], [], []>} : vector<128x32xf32>, vector<32x32xf32>, vector<128x32xf32> -> vector<128x32xf32>
    %c1144 = arith.constant 1144 : index
    %c0_112 = arith.constant 0 : index
    %229 = vector.load %arg2[%c1144, %c0_112] : memref<1408x64xf32, #tpu.memory_space<vmem>>, vector<1x32xf32>
    %230 = vector.broadcast %229 : vector<1x32xf32> to vector<128x32xf32>
    %231 = arith.addf %228, %230 : vector<128x32xf32>
    %232 = arith.addf %217, %231 : vector<128x32xf32>
    %cst_113 = arith.constant 0.000000e+00 : f32
    %233 = vector.broadcast %cst_113 : f32 to vector<128x32xf32>
    %234 = arith.maximumf %232, %233 : vector<128x32xf32>
    %c1152 = arith.constant 1152 : index
    %c0_114 = arith.constant 0 : index
    %235 = vector.load %arg2[%c1152, %c0_114] : memref<1408x64xf32, #tpu.memory_space<vmem>>, vector<32x32xf32>
    %cst_115 = arith.constant dense<0.000000e+00> : vector<128x32xf32>
    %236 = tpu.matmul %234, %235, %cst_115 {dimension_numbers = #tpu.dot_dimension_numbers<[1], [0], [0], [1], [0, 0, 1, 1], [], []>} : vector<128x32xf32>, vector<32x32xf32>, vector<128x32xf32> -> vector<128x32xf32>
    %c1184 = arith.constant 1184 : index
    %c0_116 = arith.constant 0 : index
    %237 = vector.load %arg2[%c1184, %c0_116] : memref<1408x64xf32, #tpu.memory_space<vmem>>, vector<1x32xf32>
    %238 = vector.broadcast %237 : vector<1x32xf32> to vector<128x32xf32>
    %239 = arith.addf %236, %238 : vector<128x32xf32>
    %cst_117 = arith.constant 0.000000e+00 : f32
    %240 = vector.broadcast %cst_117 : f32 to vector<128x32xf32>
    %241 = arith.maximumf %239, %240 : vector<128x32xf32>
    %c1192 = arith.constant 1192 : index
    %c0_118 = arith.constant 0 : index
    %242 = vector.load %arg2[%c1192, %c0_118] : memref<1408x64xf32, #tpu.memory_space<vmem>>, vector<32x32xf32>
    %cst_119 = arith.constant dense<0.000000e+00> : vector<128x32xf32>
    %243 = tpu.matmul %241, %242, %cst_119 {dimension_numbers = #tpu.dot_dimension_numbers<[1], [0], [0], [1], [0, 0, 1, 1], [], []>} : vector<128x32xf32>, vector<32x32xf32>, vector<128x32xf32> -> vector<128x32xf32>
    %c1224 = arith.constant 1224 : index
    %c0_120 = arith.constant 0 : index
    %244 = vector.load %arg2[%c1224, %c0_120] : memref<1408x64xf32, #tpu.memory_space<vmem>>, vector<1x32xf32>
    %245 = vector.broadcast %244 : vector<1x32xf32> to vector<128x32xf32>
    %246 = arith.addf %243, %245 : vector<128x32xf32>
    %247 = arith.addf %232, %246 : vector<128x32xf32>
    %cst_121 = arith.constant 0.000000e+00 : f32
    %248 = vector.broadcast %cst_121 : f32 to vector<128x32xf32>
    %249 = arith.maximumf %247, %248 : vector<128x32xf32>
    %c1232 = arith.constant 1232 : index
    %c0_122 = arith.constant 0 : index
    %250 = vector.load %arg2[%c1232, %c0_122] : memref<1408x64xf32, #tpu.memory_space<vmem>>, vector<32x32xf32>
    %cst_123 = arith.constant dense<0.000000e+00> : vector<128x32xf32>
    %251 = tpu.matmul %249, %250, %cst_123 {dimension_numbers = #tpu.dot_dimension_numbers<[1], [0], [0], [1], [0, 0, 1, 1], [], []>} : vector<128x32xf32>, vector<32x32xf32>, vector<128x32xf32> -> vector<128x32xf32>
    %c1264 = arith.constant 1264 : index
    %c0_124 = arith.constant 0 : index
    %252 = vector.load %arg2[%c1264, %c0_124] : memref<1408x64xf32, #tpu.memory_space<vmem>>, vector<1x32xf32>
    %253 = vector.broadcast %252 : vector<1x32xf32> to vector<128x32xf32>
    %254 = arith.addf %251, %253 : vector<128x32xf32>
    %cst_125 = arith.constant 0.000000e+00 : f32
    %255 = vector.broadcast %cst_125 : f32 to vector<128x32xf32>
    %256 = arith.maximumf %254, %255 : vector<128x32xf32>
    %c1272 = arith.constant 1272 : index
    %c0_126 = arith.constant 0 : index
    %257 = vector.load %arg2[%c1272, %c0_126] : memref<1408x64xf32, #tpu.memory_space<vmem>>, vector<32x32xf32>
    %cst_127 = arith.constant dense<0.000000e+00> : vector<128x32xf32>
    %258 = tpu.matmul %256, %257, %cst_127 {dimension_numbers = #tpu.dot_dimension_numbers<[1], [0], [0], [1], [0, 0, 1, 1], [], []>} : vector<128x32xf32>, vector<32x32xf32>, vector<128x32xf32> -> vector<128x32xf32>
    %c1304 = arith.constant 1304 : index
    %c0_128 = arith.constant 0 : index
    %259 = vector.load %arg2[%c1304, %c0_128] : memref<1408x64xf32, #tpu.memory_space<vmem>>, vector<1x32xf32>
    %260 = vector.broadcast %259 : vector<1x32xf32> to vector<128x32xf32>
    %261 = arith.addf %258, %260 : vector<128x32xf32>
    %262 = arith.addf %247, %261 : vector<128x32xf32>
    %cst_129 = arith.constant 0.000000e+00 : f32
    %263 = vector.broadcast %cst_129 : f32 to vector<128x32xf32>
    %264 = arith.maximumf %262, %263 : vector<128x32xf32>
    %c1312 = arith.constant 1312 : index
    %c0_130 = arith.constant 0 : index
    %265 = vector.load %arg2[%c1312, %c0_130] : memref<1408x64xf32, #tpu.memory_space<vmem>>, vector<32x32xf32>
    %cst_131 = arith.constant dense<0.000000e+00> : vector<128x32xf32>
    %266 = tpu.matmul %264, %265, %cst_131 {dimension_numbers = #tpu.dot_dimension_numbers<[1], [0], [0], [1], [0, 0, 1, 1], [], []>} : vector<128x32xf32>, vector<32x32xf32>, vector<128x32xf32> -> vector<128x32xf32>
    %c1344 = arith.constant 1344 : index
    %c0_132 = arith.constant 0 : index
    %267 = vector.load %arg2[%c1344, %c0_132] : memref<1408x64xf32, #tpu.memory_space<vmem>>, vector<1x32xf32>
    %268 = vector.broadcast %267 : vector<1x32xf32> to vector<128x32xf32>
    %269 = arith.addf %266, %268 : vector<128x32xf32>
    %cst_133 = arith.constant 0.000000e+00 : f32
    %270 = vector.broadcast %cst_133 : f32 to vector<128x32xf32>
    %271 = arith.maximumf %269, %270 : vector<128x32xf32>
    %c1352 = arith.constant 1352 : index
    %c0_134 = arith.constant 0 : index
    %272 = vector.load %arg2[%c1352, %c0_134] : memref<1408x64xf32, #tpu.memory_space<vmem>>, vector<32x32xf32>
    %cst_135 = arith.constant dense<0.000000e+00> : vector<128x32xf32>
    %273 = tpu.matmul %271, %272, %cst_135 {dimension_numbers = #tpu.dot_dimension_numbers<[1], [0], [0], [1], [0, 0, 1, 1], [], []>} : vector<128x32xf32>, vector<32x32xf32>, vector<128x32xf32> -> vector<128x32xf32>
    %c1384 = arith.constant 1384 : index
    %c0_136 = arith.constant 0 : index
    %274 = vector.load %arg2[%c1384, %c0_136] : memref<1408x64xf32, #tpu.memory_space<vmem>>, vector<1x32xf32>
    %275 = vector.broadcast %274 : vector<1x32xf32> to vector<128x32xf32>
    %276 = arith.addf %273, %275 : vector<128x32xf32>
    %277 = arith.addf %262, %276 : vector<128x32xf32>
    %c1392 = arith.constant 1392 : index
    %c0_137 = arith.constant 0 : index
    %278 = vector.load %arg2[%c1392, %c0_137] : memref<1408x64xf32, #tpu.memory_space<vmem>>, vector<1x32xf32>
    %cst_138 = arith.constant 0.000000e+00 : f32
    %279 = vector.broadcast %cst_138 : f32 to vector<128x32xf32>
    %280 = arith.maximumf %277, %279 : vector<128x32xf32>
    %cst_139 = arith.constant dense<0.000000e+00> : vector<1x128xf32>
    %281 = tpu.matmul %278, %280, %cst_139 {dimension_numbers = #tpu.dot_dimension_numbers<[1], [1], [0], [0], [0, 0, 1, 0], [], []>} : vector<1x32xf32>, vector<128x32xf32>, vector<1x128xf32> -> vector<1x128xf32>
    %c1400 = arith.constant 1400 : index
    %c0_140 = arith.constant 0 : index
    %282 = vector.load %arg2[%c1400, %c0_140] : memref<1408x64xf32, #tpu.memory_space<vmem>>, vector<1x1xf32>
    %283 = vector.broadcast %282 : vector<1x1xf32> to vector<1x128xf32>
    %284 = arith.addf %281, %283 : vector<1x128xf32>
    %c0_141 = arith.constant 0 : index
    %c0_142 = arith.constant 0 : index
    %285 = vector.load %arg3[%c0_141, %c0_142] : memref<1x128xf32, #tpu.memory_space<vmem>>, vector<1x128xf32>
    tpu.vector_store %arg3[%c0_141, %c0_142], %284 {strides = array<i32>} : memref<1x128xf32, #tpu.memory_space<vmem>>, vector<1x128xf32>,
    return
  }
}

</mosaic_0001>

<bundles_post_ra>
// kernel: occupancy_network_forward.1
= control target key start
LH: loop header
LB: loop body
LE: loop exit
PB: predicated region body
PF: predicated region fallthrough
CT: control target
= control target key end

     0   :  { %vm115_vm0 = vcmask 1042432   ;;  %vm66_vm1 = vcmask 23552   ;;  %vm210_vm2 = vcmask 523264   ;;  %vm346_vm3 = vcmask 261120   ;;  %s8608_s2 = inlined_call_operand.vmem [shape: f32[1408,64], index: 2, kind: input, shape index: {}]   ;;  %s8609_s0 = inlined_call_operand.vmem [shape: f32[128,3], index: 0, kind: input, shape index: {}]   ;;  %s8610_s1 = inlined_call_operand.vmem [shape: f32[128,3], index: 1, kind: input, shape index: {}]   ;;  %s8611_s3 = inlined_call_operand.vmem [shape: f32[1,128], index: 3, kind: output, shape index: {}]  }
   0x1   :  { %v63_v0 = vld [vmem:[%s8608_s2] sm:$0x7]  ;;  %v52_v2 = vld [vmem:[%s8609_s0 + $0x28] sm:$0xff]  ;;  %v57_v3 = vld [vmem:[%s8609_s0 + $0x50] sm:$0xff] }
   0x2   :  { %v47_v1 = vld [vmem:[%s8609_s0] sm:$0xff]  ;;  %5481 = vmatpush.msk.msra.mxu0 %vm115_vm0, %v63_v0  ;;  %6092 = vmatpush.msk.msra.mxu1 %vm115_vm0, %v63_v0  ;;  %v58_v4 = vld [vmem:[%s8609_s0 + $0x58] sm:$0xff]  ;;  %v207_v6 = vld [vmem:[%s8608_s2 + $0x48] sm:$0xff] }
   0x3   :  { %5482 = vmatmul.msk.f32.vlgmr.msra.gmra.mxu0 %vm66_vm1, %v47_v1  ;;  %6093 = vmatpush.msk.msra.mxu2 %vm115_vm0, %v63_v0  ;;  %v467_v5 = vld [vmem:[%s8608_s2 + $0xb8] sm:$0xff]  ;;  %v466_v7 = vld [vmem:[%s8608_s2 + $0xb0] sm:$0xff]  ;;  %v206_v8 = vld [vmem:[%s8608_s2 + $0x40] sm:$0xff] }
   0x4   :  { %5487 = vmatmul.msk.f32.vlgmr.msra.gmra.mxu1 %vm66_vm1, %v52_v2  ;;  %6094 = vmatpush.msk.msra.mxu3 %vm115_vm0, %v63_v0  ;;  %v48_v9 = vld [vmem:[%s8609_s0 + $0x8] sm:$0xff]  ;;  %v53_v10 = vld [vmem:[%s8609_s0 + $0x30] sm:$0xff]  ;;  %v59_v12 = vld [vmem:[%s8609_s0 + $0x60] sm:$0xff] }
   0x5   :  { %5492 = vmatmul.msk.f32.vlgmr.msra.gmra.mxu2 %vm66_vm1, %v57_v3  ;;  %5493 = vmatmul.msk.f32.vlgmr.msra.gmra.mxu3 %vm66_vm1, %v58_v4  ;;  %v465_v11 = vld [vmem:[%s8608_s2 + $0xa8] sm:$0xff]  ;;  %v205_v13 = vld [vmem:[%s8608_s2 + $0x38] sm:$0xff]  ;;  %v464_v14 = vld [vmem:[%s8608_s2 + $0xa0] sm:$0xff] }
   0x6   :  { %524 = vmatpush.msrb.mxu3 %v467_v5  ;;  %267 = vmatpush.msrb.mxu1 %v207_v6  ;;  %v204_v15 = vld [vmem:[%s8608_s2 + $0x30] sm:$0xff]  ;;  %v463_v16 = vld [vmem:[%s8608_s2 + $0x98] sm:$0xff]  ;;  %v203_v17 = vld [vmem:[%s8608_s2 + $0x28] sm:$0xff] }
   0x7   :  { %v462_v18 = vld [vmem:[%s8608_s2 + $0x90] sm:$0xff]  ;;  %v54_v20 = vld [vmem:[%s8609_s0 + $0x38] sm:$0xff]  ;;  %v60_v21 = vld [vmem:[%s8609_s0 + $0x68] sm:$0xff] }
   0x8   :  { %525 = vmatpush.msrb.mxu3 %v466_v7  ;;  %268 = vmatpush.msrb.mxu1 %v206_v8  ;;  %v49_v19 = vld [vmem:[%s8609_s0 + $0x10] sm:$0xff]  ;;  %v50_v22 = vld [vmem:[%s8609_s0 + $0x18] sm:$0xff]  ;;  %v55_v23 = vld [vmem:[%s8609_s0 + $0x40] sm:$0xff] }
   0x9   :  { %v61_v24 = vld [vmem:[%s8609_s0 + $0x70] sm:$0xff]  ;;  %v51_v25 = vld [vmem:[%s8609_s0 + $0x20] sm:$0xff]  ;;  %v56_v26 = vld [vmem:[%s8609_s0 + $0x48] sm:$0xff] }
   0xa   :  { %526 = vmatpush.msrb.mxu3 %v465_v11  ;;  %269 = vmatpush.msrb.mxu1 %v205_v13  ;;  %v62_v27 = vld [vmem:[%s8609_s0 + $0x78] sm:$0xff]  ;;  %v202_v28 = vld [vmem:[%s8608_s2 + $0x20] sm:$0xff]  ;;  %v461_v29 = vld [vmem:[%s8608_s2 + $0x88] sm:$0xff] }
   0xb   :  { %5483 = vmatmul.msk.f32.gmra.mxu0 %vm66_vm1, %v48_v9  ;;  %v201_v30 = vld [vmem:[%s8608_s2 + $0x18] sm:$0xff]  ;;  %v460_v31 = vld [vmem:[%s8608_s2 + $0x80] sm:$0xff]  ;;  %v200_v32 = vld [vmem:[%s8608_s2 + $0x10] sm:$0xff] }
   0xc   :  { %5488 = vmatmul.msk.f32.gmra.mxu1 %vm66_vm1, %v53_v10  ;;  %527 = vmatpush.msrb.mxu3 %v464_v14  ;;  %v6264_v33 = vld [vmem:[%s8608_s2 + $0x8] ss:$0 sm:$0xff]  ;;  %v343_v8 = vld [vmem:[%s8608_s2 + $0x70] sm:$0xff]  ;;  %v340_v14 = vld [vmem:[%s8608_s2 + $0x58] sm:$0xff] }
   0xd   :  { %5494 = vmatmul.msk.f32.gmra.mxu3 %vm66_vm1, %v59_v12  ;;  %270 = vmatpush.msrb.mxu1 %v204_v15  ;;  %v342_v11 = vld [vmem:[%s8608_s2 + $0x68] sm:$0xff]  ;;  %v341_v12 = vld [vmem:[%s8608_s2 + $0x60] sm:$0xff] }
   0xe   :  { %528 = vmatpush.msrb.mxu3 %v463_v16  ;;  %407 = vmatpush.msrb.mxu2 %v343_v8 }
   0xf   :  { %271 = vmatpush.msrb.mxu1 %v203_v17 }
  0x10   :  { %529 = vmatpush.msrb.mxu3 %v462_v18  ;;  %408 = vmatpush.msrb.mxu2 %v342_v11 }
  0x11   :  { %272 = vmatpush.msrb.mxu1 %v202_v28 }
  0x12   :  { %530 = vmatpush.msrb.mxu3 %v461_v29  ;;  %409 = vmatpush.msrb.mxu2 %v341_v12 }
  0x13   :  { %5484 = vmatmul.msk.f32.gmra.mxu0 %vm66_vm1, %v49_v19  ;;  %273 = vmatpush.msrb.mxu1 %v201_v30 }
  0x14   :  { %5489 = vmatmul.msk.f32.gmra.mxu1 %vm66_vm1, %v54_v20  ;;  %531 = vmatpush.msrb.mxu3 %v460_v31 }
  0x15   :  { %5495 = vmatmul.msk.f32.gmra.mxu3 %vm66_vm1, %v60_v21  ;;  %274 = vmatpush.msrb.mxu1 %v200_v32 }
  0x16   :  { %410 = vmatpush.msrb.mxu2 %v340_v14  ;;  %v6378_v14 = vld [vmem:[%s8608_s2 + $0x78] ss:$0 sm:$0xff] }
  0x1b   :  { %5485 = vmatmul.msk.f32.gmra.mxu0 %vm66_vm1, %v50_v22  ;;  %v6329_v22 = vld [vmem:[%s8608_s2 + $0x50] ss:$0 sm:$0xff] }
  0x1c   :  { %5490 = vmatmul.msk.f32.gmra.mxu1 %vm66_vm1, %v55_v23 }
  0x1d   :  { %5496 = vmatmul.msk.f32.gmra.mxu3 %vm66_vm1, %v61_v24 }
  0x23   :  { %5486 = vmatmul.msk.f32.gmra.mxu0 %vm66_vm1, %v51_v25 }
  0x24   :  { %5491 = vmatmul.msk.f32.gmra.mxu1 %vm66_vm1, %v56_v26 }
  0x25   :  { %5497 = vmatmul.msk.f32.gmra.mxu3 %vm66_vm1, %v62_v27 }
  0x80   :  { %v136_v34 = vpop.f32.mrf.mxu0 }
  0x81   :  { %v137_v35 = vadd.f32 %v6264_v33, %v136_v34  ;;  %v151_v45 = vpop.f32.mrf.mxu1 }
  0x82   :  { %v152_v51 = vadd.f32 %v6264_v33, %v151_v45 }
  0x83   :  { %v184_v36 = vmax.f32 %v137_v35, 0.0  ;;  %5530 = vmatmul.msk.f32.vlgmr.msrb.gmra.mxu3 %vm210_vm2, %v137_v35 }
  0x84   :  { %v189_v52 = vmax.f32 %v152_v51, 0.0 }
  0x85   :  { %5498 = vmatmul.msk.f32.vlgmr.msrb.gmra.mxu1 %vm210_vm2, %v184_v36 }
  0x88   :  { %v139_v37 = vpop.f32.mrf.mxu0  ;;  %v166_v0 = vpop.f32.mrf.mxu2 }
  0x89   :  { %v140_v38 = vadd.f32 %v6264_v33, %v139_v37  ;;  %v154_v50 = vpop.f32.mrf.mxu1  ;;  %v169_v1 = vpop.f32.mrf.mxu3  ;;  %v167_v2 = vadd.f32 %v6264_v33, %v166_v0 }
  0x8a   :  { %v155_v53 = vadd.f32 %v6264_v33, %v154_v50  ;;  %v170_v5 = vadd.f32 %v6264_v33, %v169_v1  ;;  %v657_v1 = vld [vmem:[%s8608_s2 + $0xd0] sm:$0xff] }
  0x8b   :  { %v185_v39 = vmax.f32 %v140_v38, 0.0  ;;  %5531 = vmatmul.msk.f32.gmra.mxu3 %vm210_vm2, %v140_v38  ;;  %v194_v3 = vmax.f32 %v167_v2, 0.0 }
  0x8c   :  { %v190_v55 = vmax.f32 %v155_v53, 0.0  ;;  %v195_v6 = vmax.f32 %v170_v5, 0.0 }
  0x8d   :  { %5499 = vmatmul.msk.f32.gmra.mxu1 %vm210_vm2, %v185_v39 }
  0x90   :  { %v142_v40 = vpop.f32.mrf.mxu0 }
  0x91   :  { %v143_v41 = vadd.f32 %v6264_v33, %v142_v40  ;;  %v157_v54 = vpop.f32.mrf.mxu1  ;;  %v172_v4 = vpop.f32.mrf.mxu3 }
  0x92   :  { %v158_v56 = vadd.f32 %v6264_v33, %v157_v54  ;;  %v173_v7 = vadd.f32 %v6264_v33, %v172_v4 }
  0x93   :  { %v186_v42 = vmax.f32 %v143_v41, 0.0  ;;  %5532 = vmatmul.msk.f32.gmra.mxu3 %vm210_vm2, %v143_v41 }
  0x94   :  { %v191_v58 = vmax.f32 %v158_v56, 0.0  ;;  %v196_v10 = vmax.f32 %v173_v7, 0.0 }
  0x95   :  { %5500 = vmatmul.msk.f32.gmra.mxu1 %vm210_vm2, %v186_v42 }
  0x98   :  { %v145_v43 = vpop.f32.mrf.mxu0 }
  0x99   :  { %v146_v44 = vadd.f32 %v6264_v33, %v145_v43  ;;  %v160_v57 = vpop.f32.mrf.mxu1  ;;  %v175_v9 = vpop.f32.mrf.mxu3 }
  0x9a   :  { %v161_v59 = vadd.f32 %v6264_v33, %v160_v57  ;;  %v176_v13 = vadd.f32 %v6264_v33, %v175_v9 }
  0x9b   :  { %v187_v46 = vmax.f32 %v146_v44, 0.0  ;;  %5533 = vmatmul.msk.f32.gmra.mxu3 %vm210_vm2, %v146_v44 }
  0x9c   :  { %v192_v60 = vmax.f32 %v161_v59, 0.0  ;;  %v197_v16 = vmax.f32 %v176_v13, 0.0 }
  0x9d   :  { %5501 = vmatmul.msk.f32.gmra.mxu1 %vm210_vm2, %v187_v46 }
  0xa0   :  { %v148_v47 = vpop.f32.mrf.mxu0 }
  0xa1   :  { %v149_v48 = vadd.f32 %v6264_v33, %v148_v47  ;;  %v163_v61 = vpop.f32.mrf.mxu1  ;;  %v178_v15 = vpop.f32.mrf.mxu3 }
  0xa2   :  { %v164_v62 = vadd.f32 %v6264_v33, %v163_v61  ;;  %v179_v17 = vadd.f32 %v6264_v33, %v178_v15 }
  0xa3   :  { %v188_v49 = vmax.f32 %v149_v48, 0.0  ;;  %5534 = vmatmul.msk.f32.gmra.mxu3 %vm210_vm2, %v149_v48 }
  0xa4   :  { %v193_v63 = vmax.f32 %v164_v62, 0.0  ;;  %v198_v18 = vmax.f32 %v179_v17, 0.0 }
  0xa5   :  { %5502 = vmatmul.msk.f32.gmra.mxu1 %vm210_vm2, %v188_v49 }
  0xa9   :  { %v181_v19 = vpop.f32.mrf.mxu3 }
  0xaa   :  { %v182_v20 = vadd.f32 %v6264_v33, %v181_v19 }
  0xab   :  { %5535 = vmatmul.msk.f32.gmra.mxu3 %vm210_vm2, %v152_v51 }
  0xac   :  { %v199_v21 = vmax.f32 %v182_v20, 0.0 }
  0xad   :  { %5503 = vmatmul.msk.f32.gmra.mxu1 %vm210_vm2, %v189_v52 }
  0xb3   :  { %5536 = vmatmul.msk.f32.gmra.mxu3 %vm210_vm2, %v155_v53 }
  0xb5   :  { %5504 = vmatmul.msk.f32.gmra.mxu1 %vm210_vm2, %v190_v55 }
  0xbb   :  { %5537 = vmatmul.msk.f32.gmra.mxu3 %vm210_vm2, %v158_v56 }
  0xbd   :  { %5505 = vmatmul.msk.f32.gmra.mxu1 %vm210_vm2, %v191_v58 }
  0xc3   :  { %5538 = vmatmul.msk.f32.gmra.mxu3 %vm210_vm2, %v161_v59 }
  0xc5   :  { %5506 = vmatmul.msk.f32.gmra.mxu1 %vm210_vm2, %v192_v60 }
  0xcb   :  { %5539 = vmatmul.msk.f32.gmra.mxu3 %vm210_vm2, %v164_v62  ;;  %v658_v62 = vld [vmem:[%s8608_s2 + $0xd8] sm:$0xff] }
  0xcc   :  { %852 = vmatpush.msra.mxu2 %v658_v62 }
  0xcd   :  { %5507 = vmatmul.msk.f32.gmra.mxu1 %vm210_vm2, %v193_v63 }
  0xce   :  { %853 = vmatpush.msra.mxu2 %v657_v1 }
  0xd3   :  { %5540 = vmatmul.msk.f32.gmra.mxu3 %vm210_vm2, %v167_v2 }
  0xd5   :  { %5508 = vmatmul.msk.f32.gmra.mxu1 %vm210_vm2, %v194_v3  ;;  %v656_v3 = vld [vmem:[%s8608_s2 + $0xc8] sm:$0xff] }
  0xd6   :  { %854 = vmatpush.msra.mxu2 %v656_v3 }
  0xdb   :  { %5541 = vmatmul.msk.f32.gmra.mxu3 %vm210_vm2, %v170_v5  ;;  %v655_v5 = vld [vmem:[%s8608_s2 + $0xc0] sm:$0xff] }
  0xdc   :  { %855 = vmatpush.msra.mxu2 %v655_v5 }
  0xdd   :  { %5509 = vmatmul.msk.f32.gmra.mxu1 %vm210_vm2, %v195_v6 }
  0xe3   :  { %5542 = vmatmul.msk.f32.gmra.mxu3 %vm210_vm2, %v173_v7 }
  0xe5   :  { %5510 = vmatmul.msk.f32.gmra.mxu1 %vm210_vm2, %v196_v10 }
  0xeb   :  { %5543 = vmatmul.msk.f32.gmra.mxu3 %vm210_vm2, %v176_v13 }
  0xed   :  { %5511 = vmatmul.msk.f32.gmra.mxu1 %vm210_vm2, %v197_v16 }
  0xf3   :  { %5544 = vmatmul.msk.f32.gmra.mxu3 %vm210_vm2, %v179_v17 }
  0xf5   :  { %5512 = vmatmul.msk.f32.gmra.mxu1 %vm210_vm2, %v198_v18 }
  0xfb   :  { %5545 = vmatmul.msk.f32.gmra.mxu3 %vm210_vm2, %v182_v20 }
  0xfd   :  { %5513 = vmatmul.msk.f32.gmra.mxu1 %vm210_vm2, %v199_v21 }
 0x102   :  { %v276_v23 = vpop.f32.mrf.mxu1 }
 0x103   :  { %v277_v24 = vadd.f32 %v6329_v22, %v276_v23 }
 0x105   :  { %v324_v25 = vmax.f32 %v277_v24, 0.0 }
 0x106   :  { %v533_v4 = vpop.f32.mrf.mxu3 }
 0x107   :  { %5514 = vmatmul.msk.f32.vlgmr.msrb.gmra.mxu2 %vm346_vm3, %v324_v25 }
 0x10a   :  { %v279_v26 = vpop.f32.mrf.mxu1 }
 0x10b   :  { %v280_v27 = vadd.f32 %v6329_v22, %v279_v26 }
 0x10d   :  { %v325_v28 = vmax.f32 %v280_v27, 0.0 }
 0x10e   :  { %v536_v9 = vpop.f32.mrf.mxu3 }
 0x10f   :  { %5515 = vmatmul.msk.f32.gmra.mxu2 %vm346_vm3, %v325_v28 }
 0x112   :  { %v282_v29 = vpop.f32.mrf.mxu1 }
 0x113   :  { %v283_v30 = vadd.f32 %v6329_v22, %v282_v29 }
 0x115   :  { %v326_v31 = vmax.f32 %v283_v30, 0.0 }
 0x116   :  { %v539_v13 = vpop.f32.mrf.mxu3 }
 0x117   :  { %5516 = vmatmul.msk.f32.gmra.mxu2 %vm346_vm3, %v326_v31 }
 0x11a   :  { %v285_v32 = vpop.f32.mrf.mxu1 }
 0x11b   :  { %v286_v33 = vadd.f32 %v6329_v22, %v285_v32 }
 0x11d   :  { %v327_v34 = vmax.f32 %v286_v33, 0.0 }
 0x11e   :  { %v542_v17 = vpop.f32.mrf.mxu3 }
 0x11f   :  { %5517 = vmatmul.msk.f32.gmra.mxu2 %vm346_vm3, %v327_v34 }
 0x122   :  { %v288_v35 = vpop.f32.mrf.mxu1 }
 0x123   :  { %v289_v36 = vadd.f32 %v6329_v22, %v288_v35 }
 0x125   :  { %v328_v37 = vmax.f32 %v289_v36, 0.0 }
 0x126   :  { %v545_v23 = vpop.f32.mrf.mxu3 }
 0x127   :  { %5518 = vmatmul.msk.f32.gmra.mxu2 %vm346_vm3, %v328_v37 }
 0x12a   :  { %v291_v38 = vpop.f32.mrf.mxu1 }
 0x12b   :  { %v292_v39 = vadd.f32 %v6329_v22, %v291_v38 }
 0x12d   :  { %v329_v40 = vmax.f32 %v292_v39, 0.0 }
 0x12e   :  { %v548_v29 = vpop.f32.mrf.mxu3 }
 0x12f   :  { %5519 = vmatmul.msk.f32.gmra.mxu2 %vm346_vm3, %v329_v40  ;;  %v1065_v40 = vld [vmem:[%s8608_s2 + $0x168] sm:$0xff] }
 0x130   :  { %1126 = vmatpush.msra.mxu3 %v1065_v40 }
 0x132   :  { %v294_v41 = vpop.f32.mrf.mxu1 }
 0x133   :  { %v295_v42 = vadd.f32 %v6329_v22, %v294_v41 }
 0x135   :  { %v330_v43 = vmax.f32 %v295_v42, 0.0 }
 0x136   :  { %v551_v34 = vpop.f32.mrf.mxu3 }
 0x137   :  { %5520 = vmatmul.msk.f32.gmra.mxu2 %vm346_vm3, %v330_v43  ;;  %v678_v43 = vld [vmem:[%s8608_s2 + $0xf8] sm:$0xff] }
 0x138   :  { %739 = vmatpush.msrb.mxu0 %v678_v43 }
 0x13a   :  { %v297_v44 = vpop.f32.mrf.mxu1 }
 0x13b   :  { %v298_v45 = vadd.f32 %v6329_v22, %v297_v44  ;;  %v1064_v44 = vld [vmem:[%s8608_s2 + $0x160] sm:$0xff] }
 0x13c   :  { %1127 = vmatpush.msra.mxu3 %v1064_v44 }
 0x13d   :  { %v331_v46 = vmax.f32 %v298_v45, 0.0 }
 0x13e   :  { %v554_v42 = vpop.f32.mrf.mxu3 }
 0x13f   :  { %5521 = vmatmul.msk.f32.gmra.mxu2 %vm346_vm3, %v331_v46  ;;  %v677_v46 = vld [vmem:[%s8608_s2 + $0xf0] sm:$0xff] }
 0x140   :  { %740 = vmatpush.msrb.mxu0 %v677_v46 }
 0x142   :  { %v300_v47 = vpop.f32.mrf.mxu1 }
 0x143   :  { %v301_v48 = vadd.f32 %v6329_v22, %v300_v47  ;;  %v1063_v47 = vld [vmem:[%s8608_s2 + $0x158] sm:$0xff] }
 0x144   :  { %1128 = vmatpush.msra.mxu3 %v1063_v47 }
 0x145   :  { %v332_v49 = vmax.f32 %v301_v48, 0.0 }
 0x147   :  { %5522 = vmatmul.msk.f32.gmra.mxu2 %vm346_vm3, %v332_v49  ;;  %v676_v49 = vld [vmem:[%s8608_s2 + $0xe8] sm:$0xff] }
 0x148   :  { %741 = vmatpush.msrb.mxu0 %v676_v49 }
 0x14a   :  { %v303_v50 = vpop.f32.mrf.mxu1 }
 0x14b   :  { %v304_v51 = vadd.f32 %v6329_v22, %v303_v50  ;;  %v1062_v50 = vld [vmem:[%s8608_s2 + $0x150] sm:$0xff] }
 0x14c   :  { %1129 = vmatpush.msra.mxu3 %v1062_v50 }
 0x14d   :  { %v333_v52 = vmax.f32 %v304_v51, 0.0 }
 0x14f   :  { %5523 = vmatmul.msk.f32.gmra.mxu2 %vm346_vm3, %v333_v52  ;;  %v675_v52 = vld [vmem:[%s8608_s2 + $0xe0] sm:$0xff] }
 0x150   :  { %742 = vmatpush.msrb.mxu0 %v675_v52 }
 0x152   :  { %v306_v53 = vpop.f32.mrf.mxu1 }
 0x153   :  { %v307_v54 = vadd.f32 %v6329_v22, %v306_v53 }
 0x155   :  { %v334_v55 = vmax.f32 %v307_v54, 0.0 }
 0x157   :  { %5524 = vmatmul.msk.f32.gmra.mxu2 %vm346_vm3, %v334_v55  ;;  %v557_v55 = vpop.f32.mrf.mxu3 }
 0x15a   :  { %v309_v56 = vpop.f32.mrf.mxu1 }
 0x15b   :  { %v310_v57 = vadd.f32 %v6329_v22, %v309_v56 }
 0x15d   :  { %v335_v58 = vmax.f32 %v310_v57, 0.0 }
 0x15f   :  { %5525 = vmatmul.msk.f32.gmra.mxu2 %vm346_vm3, %v335_v58 }
 0x162   :  { %v312_v59 = vpop.f32.mrf.mxu1 }
 0x163   :  { %v313_v60 = vadd.f32 %v6329_v22, %v312_v59 }
 0x165   :  { %v336_v61 = vmax.f32 %v313_v60, 0.0 }
 0x167   :  { %5526 = vmatmul.msk.f32.gmra.mxu2 %vm346_vm3, %v336_v61 }
 0x16a   :  { %v315_v63 = vpop.f32.mrf.mxu1 }
 0x16b   :  { %v316_v0 = vadd.f32 %v6329_v22, %v315_v63 }
 0x16d   :  { %v337_v2 = vmax.f32 %v316_v0, 0.0 }
 0x16f   :  { %5527 = vmatmul.msk.f32.gmra.mxu2 %vm346_vm3, %v337_v2 }
 0x172   :  { %v318_v6 = vpop.f32.mrf.mxu1 }
 0x173   :  { %v319_v7 = vadd.f32 %v6329_v22, %v318_v6  ;;  %v560_v6 = vpop.f32.mrf.mxu3 }
 0x175   :  { %v338_v8 = vmax.f32 %v319_v7, 0.0 }
 0x177   :  { %5528 = vmatmul.msk.f32.gmra.mxu2 %vm346_vm3, %v338_v8 }
 0x17a   :  { %v321_v10 = vpop.f32.mrf.mxu1 }
 0x17b   :  { %v322_v11 = vadd.f32 %v6329_v22, %v321_v10 }
 0x17d   :  { %v339_v12 = vmax.f32 %v322_v11, 0.0 }
 0x17f   :  { %5529 = vmatmul.msk.f32.gmra.mxu2 %vm346_vm3, %v339_v12 }
 0x18a   :  { %v412_v15 = vpop.f32.mrf.mxu2 }
 0x18b   :  { %v413_v16 = vadd.f32 %v6378_v14, %v412_v15 }
 0x18d   :  { %v6381_v18 = vadd.f32 %v533_v4, %v413_v16 }
 0x18f   :  { %v639_v19 = vmax.f32 %v6381_v18, 0.0  ;;  %v581_v0 = vsel %vm346_vm3, %v6381_v18, -inf }
 0x191   :  { %5562 = vmatmul.msk.f32.vlgmr.msra.gmra.mxu2 %vm346_vm3, %v639_v19 }
 0x192   :  { %v415_v20 = vpop.f32.mrf.mxu2 }
 0x193   :  { %v416_v21 = vadd.f32 %v6378_v14, %v415_v20 }
 0x195   :  { %v6386_v22 = vadd.f32 %v536_v9, %v416_v21  ;;  %v563_v21 = vpop.f32.mrf.mxu3 }
 0x197   :  { %v640_v24 = vmax.f32 %v6386_v22, 0.0  ;;  %v582_v60 = vsel %vm346_vm3, %v6386_v22, -inf }
 0x199   :  { %5563 = vmatmul.msk.f32.gmra.mxu2 %vm346_vm3, %v640_v24 }
 0x19a   :  { %v418_v25 = vpop.f32.mrf.mxu2 }
 0x19b   :  { %v419_v26 = vadd.f32 %v6378_v14, %v418_v25 }
 0x19d   :  { %v6391_v27 = vadd.f32 %v539_v13, %v419_v26 }
 0x19f   :  { %v641_v28 = vmax.f32 %v6391_v27, 0.0  ;;  %v583_v2 = vsel %vm346_vm3, %v6391_v27, -inf }
 0x1a1   :  { %5564 = vmatmul.msk.f32.gmra.mxu2 %vm346_vm3, %v641_v28 }
 0x1a2   :  { %v421_v30 = vpop.f32.mrf.mxu2 }
 0x1a3   :  { %v422_v31 = vadd.f32 %v6378_v14, %v421_v30 }
 0x1a5   :  { %v6396_v32 = vadd.f32 %v542_v17, %v422_v31 }
 0x1a7   :  { %v642_v33 = vmax.f32 %v6396_v32, 0.0  ;;  %v584_v3 = vsel %vm346_vm3, %v6396_v32, -inf }
 0x1a9   :  { %5565 = vmatmul.msk.f32.gmra.mxu2 %vm346_vm3, %v642_v33 }
 0x1aa   :  { %v424_v35 = vpop.f32.mrf.mxu2 }
 0x1ab   :  { %v425_v36 = vadd.f32 %v6378_v14, %v424_v35 }
 0x1ad   :  { %v6401_v37 = vadd.f32 %v545_v23, %v425_v36  ;;  %v566_v36 = vpop.f32.mrf.mxu3 }
 0x1af   :  { %v643_v38 = vmax.f32 %v6401_v37, 0.0  ;;  %v585_v61 = vsel %vm346_vm3, %v6401_v37, -inf }
 0x1b0   :  { %v586_v7 = vmax.f32 %v581_v0, %v585_v61 }
 0x1b1   :  { %5566 = vmatmul.msk.f32.gmra.mxu2 %vm346_vm3, %v643_v38 }
 0x1b2   :  { %v427_v39 = vpop.f32.mrf.mxu2 }
 0x1b3   :  { %v428_v41 = vadd.f32 %v6378_v14, %v427_v39 }
 0x1b5   :  { %v6415_v45 = vadd.f32 %v548_v29, %v428_v41  ;;  %v569_v43 = vpop.f32.mrf.mxu3 }
 0x1b7   :  { %v644_v48 = vmax.f32 %v6415_v45, 0.0  ;;  %v587_v58 = vsel %vm346_vm3, %v6415_v45, -inf }
 0x1b8   :  { %v588_v1 = vmax.f32 %v582_v60, %v587_v58  ;;  %v1061_v60 = vld [vmem:[%s8608_s2 + $0x148] sm:$0xff] }
 0x1b9   :  { %5567 = vmatmul.msk.f32.gmra.mxu2 %vm346_vm3, %v644_v48  ;;  %1239 = vmatpush.msra.mxu0 %v1061_v60 }
 0x1ba   :  { %v430_v51 = vpop.f32.mrf.mxu2  ;;  %v593_v10 = vmax.f32 %v586_v7, %v588_v1 }
 0x1bb   :  { %v431_v53 = vadd.f32 %v6378_v14, %v430_v51 }
 0x1bd   :  { %v6435_v54 = vadd.f32 %v551_v34, %v431_v53  ;;  %v572_v50 = vpop.f32.mrf.mxu3 }
 0x1bf   :  { %v645_v56 = vmax.f32 %v6435_v54, 0.0  ;;  %v589_v62 = vsel %vm346_vm3, %v6435_v54, -inf }
 0x1c0   :  { %v590_v8 = vmax.f32 %v583_v2, %v589_v62 }
 0x1c1   :  { %5568 = vmatmul.msk.f32.gmra.mxu2 %vm346_vm3, %v645_v56 }
 0x1c2   :  { %v433_v57 = vpop.f32.mrf.mxu2 }
 0x1c3   :  { %v434_v59 = vadd.f32 %v6378_v14, %v433_v57 }
 0x1c5   :  { %v6448_v63 = vadd.f32 %v554_v42, %v434_v59  ;;  %v575_v56 = vpop.f32.mrf.mxu3  ;;  %v942_v59 = vld [vmem:[%s8608_s2 + $0x120] sm:$0xff] }
 0x1c6   :  { %1005 = vmatpush.msra.mxu1 %v942_v59 }
 0x1c7   :  { %v591_v4 = vsel %vm346_vm3, %v6448_v63, -inf  ;;  %v646_v5 = vmax.f32 %v6448_v63, 0.0 }
 0x1c8   :  { %v592_v9 = vmax.f32 %v584_v3, %v591_v4 }
 0x1c9   :  { %5569 = vmatmul.msk.f32.gmra.mxu2 %vm346_vm3, %v646_v5 }
 0x1ca   :  { %v594_v11 = vmax.f32 %v590_v8, %v592_v9  ;;  %v436_v12 = vpop.f32.mrf.mxu2 }
 0x1cb   :  { %v437_v13 = vadd.f32 %v6378_v14, %v436_v12 }
 0x1cc   :  { %v595_v15 = vmax.f32 %v593_v10, %v594_v11 }
 0x1cd   :  { %v6461_v16 = vadd.f32 %v557_v55, %v437_v13  ;;  %v578_v3 = vpop.f32.mrf.mxu3 }
 0x1ce   :  { %v596_v17 = vrot.slane %v595_v15, 4 }
 0x1cf   :  { %v647_v19 = vmax.f32 %v6461_v16, 0.0  ;;  %v602_v8 = vsel %vm346_vm3, %v6461_v16, -inf }
 0x1d0   :  { %v597_v20 = vmax.f32 %v595_v15, %v596_v17 }
 0x1d1   :  { %5570 = vmatmul.msk.f32.gmra.mxu2 %vm346_vm3, %v647_v19 }
 0x1d2   :  { %v598_v23 = vrot.slane %v597_v20, 2  ;;  %v439_v24 = vpop.f32.mrf.mxu2 }
 0x1d3   :  { %v440_v25 = vadd.f32 %v6378_v14, %v439_v24 }
 0x1d4   :  { %v599_v26 = vmax.f32 %v597_v20, %v598_v23 }
 0x1d5   :  { %v6466_v28 = vadd.f32 %v560_v6, %v440_v25 }
 0x1d6   :  { %v600_v29 = vrot.slane %v599_v26, 1 }
 0x1d7   :  { %v648_v30 = vmax.f32 %v6466_v28, 0.0  ;;  %v603_v4 = vsel %vm346_vm3, %v6466_v28, -inf }
 0x1d8   :  { %v6469_v31 = vmax.f32 %v599_v26, %v600_v29 }
 0x1d9   :  { %5571 = vmatmul.msk.f32.gmra.mxu2 %vm346_vm3, %v648_v30 }
 0x1da   :  { %v442_v33 = vpop.f32.mrf.mxu2  ;;  %5594 = vmatmul.msk.f32.vlgmr.msra.gmra.mxu3 %vm346_vm3, %v6469_v31  ;;  %v6475_v34 = vmax.f32 %v6469_v31, 0.0 }
 0x1db   :  { %v443_v35 = vadd.f32 %v6378_v14, %v442_v33 }
 0x1dc   :  { %5546 = vmatmul.msk.f32.vlgmr.msrb.gmra.mxu0 %vm346_vm3, %v6475_v34 }
 0x1dd   :  { %v6480_v38 = vadd.f32 %v563_v21, %v443_v35  ;;  %v941_v35 = vld [vmem:[%s8608_s2 + $0x118] sm:$0xff] }
 0x1de   :  { %1006 = vmatpush.msra.mxu1 %v941_v35 }
 0x1df   :  { %v649_v39 = vmax.f32 %v6480_v38, 0.0 }
 0x1e1   :  { %5572 = vmatmul.msk.f32.gmra.mxu2 %vm346_vm3, %v649_v39 }
 0x1e2   :  { %v445_v40 = vpop.f32.mrf.mxu2  ;;  %5595 = vmatmul.msk.f32.gmra.mxu3 %vm346_vm3, %v6469_v31 }
 0x1e3   :  { %v446_v41 = vadd.f32 %v6378_v14, %v445_v40  ;;  %v940_v40 = vld [vmem:[%s8608_s2 + $0x110] sm:$0xff] }
 0x1e4   :  { %5547 = vmatmul.msk.f32.gmra.mxu0 %vm346_vm3, %v6475_v34  ;;  %1007 = vmatpush.msra.mxu1 %v940_v40 }
 0x1e5   :  { %v6489_v42 = vadd.f32 %v566_v36, %v446_v41  ;;  %v1060_v36 = vld [vmem:[%s8608_s2 + $0x140] sm:$0xff]  ;;  %v939_v41 = vld [vmem:[%s8608_s2 + $0x108] sm:$0xff] }
 0x1e6   :  { %1240 = vmatpush.msra.mxu0 %v1060_v36  ;;  %1008 = vmatpush.msra.mxu1 %v939_v41 }
 0x1e7   :  { %v650_v44 = vmax.f32 %v6489_v42, 0.0  ;;  %v605_v10 = vsel %vm346_vm3, %v6489_v42, -inf }
 0x1e9   :  { %5573 = vmatmul.msk.f32.gmra.mxu2 %vm346_vm3, %v650_v44 }
 0x1ea   :  { %v448_v46 = vpop.f32.mrf.mxu2  ;;  %5596 = vmatmul.msk.f32.gmra.mxu3 %vm346_vm3, %v6469_v31 }
 0x1eb   :  { %v449_v47 = vadd.f32 %v6378_v14, %v448_v46  ;;  %v6596_v46 = vld [vmem:[%s8608_s2 + $0x100] ss:$0 sm:$0xff] }
 0x1ec   :  { %5548 = vmatmul.msk.f32.gmra.mxu0 %vm346_vm3, %v6475_v34 }
 0x1ed   :  { %v6498_v48 = vadd.f32 %v569_v43, %v449_v47 }
 0x1ef   :  { %v651_v49 = vmax.f32 %v6498_v48, 0.0  ;;  %v606_v5 = vsel %vm346_vm3, %v6498_v48, -inf }
 0x1f0   :  { %v607_v13 = vmax.f32 %v602_v8, %v606_v5 }
 0x1f1   :  { %5574 = vmatmul.msk.f32.gmra.mxu2 %vm346_vm3, %v651_v49 }
 0x1f2   :  { %v451_v51 = vpop.f32.mrf.mxu2  ;;  %5597 = vmatmul.msk.f32.gmra.mxu3 %vm346_vm3, %v6469_v31 }
 0x1f3   :  { %v452_v52 = vadd.f32 %v6378_v14, %v451_v51 }
 0x1f4   :  { %5549 = vmatmul.msk.f32.gmra.mxu0 %vm346_vm3, %v6475_v34 }
 0x1f5   :  { %v6507_v53 = vadd.f32 %v572_v50, %v452_v52 }
 0x1f7   :  { %v652_v55 = vmax.f32 %v6507_v53, 0.0  ;;  %v608_v1 = vsel %vm346_vm3, %v6507_v53, -inf }
 0x1f8   :  { %v609_v9 = vmax.f32 %v603_v4, %v608_v1 }
 0x1f9   :  { %5575 = vmatmul.msk.f32.gmra.mxu2 %vm346_vm3, %v652_v55 }
 0x1fa   :  { %v454_v57 = vpop.f32.mrf.mxu2  ;;  %5598 = vmatmul.msk.f32.gmra.mxu3 %vm346_vm3, %v6469_v31  ;;  %v614_v19 = vmax.f32 %v607_v13, %v609_v9 }
 0x1fb   :  { %v455_v58 = vadd.f32 %v6378_v14, %v454_v57 }
 0x1fc   :  { %5550 = vmatmul.msk.f32.gmra.mxu0 %vm346_vm3, %v6475_v34 }
 0x1fd   :  { %v6522_v61 = vadd.f32 %v575_v56, %v455_v58 }
 0x1ff   :  { %v653_v62 = vmax.f32 %v6522_v61, 0.0  ;;  %v610_v6 = vsel %vm346_vm3, %v6522_v61, -inf }
 0x201   :  { %5576 = vmatmul.msk.f32.gmra.mxu2 %vm346_vm3, %v653_v62 }
 0x202   :  { %v457_v0 = vpop.f32.mrf.mxu2  ;;  %5599 = vmatmul.msk.f32.gmra.mxu3 %vm346_vm3, %v6469_v31 }
 0x203   :  { %v458_v2 = vadd.f32 %v6378_v14, %v457_v0  ;;  %v604_v14 = vsel %vm346_vm3, %v6480_v38, -inf }
 0x204   :  { %5551 = vmatmul.msk.f32.gmra.mxu0 %vm346_vm3, %v6475_v34  ;;  %v611_v15 = vmax.f32 %v604_v14, %v610_v6 }
 0x205   :  { %v6539_v7 = vadd.f32 %v578_v3, %v458_v2 }
 0x207   :  { %v612_v11 = vsel %vm346_vm3, %v6539_v7, -inf  ;;  %v654_v12 = vmax.f32 %v6539_v7, 0.0 }
 0x208   :  { %v613_v17 = vmax.f32 %v605_v10, %v612_v11 }
 0x209   :  { %5577 = vmatmul.msk.f32.gmra.mxu2 %vm346_vm3, %v654_v12 }
 0x20a   :  { %v615_v20 = vmax.f32 %v611_v15, %v613_v17  ;;  %5600 = vmatmul.msk.f32.gmra.mxu3 %vm346_vm3, %v6469_v31 }
 0x20c   :  { %v616_v21 = vmax.f32 %v614_v19, %v615_v20  ;;  %5552 = vmatmul.msk.f32.gmra.mxu0 %vm346_vm3, %v6475_v34 }
 0x20e   :  { %v617_v23 = vrot.slane %v616_v21, 4 }
 0x210   :  { %v618_v24 = vmax.f32 %v616_v21, %v617_v23 }
 0x212   :  { %v619_v25 = vrot.slane %v618_v24, 2  ;;  %5601 = vmatmul.msk.f32.gmra.mxu3 %vm346_vm3, %v6469_v31  ;;  %v1059_v31 = vld [vmem:[%s8608_s2 + $0x138] sm:$0xff] }
 0x213   :  { %1241 = vmatpush.msra.mxu0 %v1059_v31 }
 0x214   :  { %v620_v26 = vmax.f32 %v618_v24, %v619_v25  ;;  %5553 = vmatmul.msk.f32.gmra.mxu0 %vm346_vm3, %v6475_v34  ;;  %v1058_v34 = vld [vmem:[%s8608_s2 + $0x130] sm:$0xff]  ;;  %v857_v39 = vpop.f32.mrf.mxu2 }
 0x215   :  { %1242 = vmatpush.msra.mxu0 %v1058_v34 }
 0x216   :  { %v621_v29 = vrot.slane %v620_v26, 1 }
 0x218   :  { %v622_v30 = vmax.f32 %v620_v26, %v621_v29 }
 0x21a   :  { %5602 = vmatmul.msk.f32.gmra.mxu3 %vm346_vm3, %v622_v30  ;;  %v667_v33 = vmax.f32 %v622_v30, 0.0 }
 0x21c   :  { %5554 = vmatmul.msk.f32.gmra.mxu0 %vm346_vm3, %v667_v33  ;;  %v860_v43 = vpop.f32.mrf.mxu2 }
 0x222   :  { %5603 = vmatmul.msk.f32.gmra.mxu3 %vm346_vm3, %v622_v30 }
 0x224   :  { %5555 = vmatmul.msk.f32.gmra.mxu0 %vm346_vm3, %v667_v33  ;;  %v863_v44 = vpop.f32.mrf.mxu2 }
 0x22a   :  { %5604 = vmatmul.msk.f32.gmra.mxu3 %vm346_vm3, %v622_v30 }
 0x22c   :  { %5556 = vmatmul.msk.f32.gmra.mxu0 %vm346_vm3, %v667_v33  ;;  %v866_v47 = vpop.f32.mrf.mxu2 }
 0x232   :  { %5605 = vmatmul.msk.f32.gmra.mxu3 %vm346_vm3, %v622_v30 }
 0x234   :  { %5557 = vmatmul.msk.f32.gmra.mxu0 %vm346_vm3, %v667_v33  ;;  %v869_v57 = vpop.f32.mrf.mxu2 }
 0x23a   :  { %5606 = vmatmul.msk.f32.gmra.mxu3 %vm346_vm3, %v622_v30 }
 0x23c   :  { %5558 = vmatmul.msk.f32.gmra.mxu0 %vm346_vm3, %v667_v33 }
 0x242   :  { %5607 = vmatmul.msk.f32.gmra.mxu3 %vm346_vm3, %v622_v30 }
 0x244   :  { %5559 = vmatmul.msk.f32.gmra.mxu0 %vm346_vm3, %v667_v33 }
 0x24a   :  { %5608 = vmatmul.msk.f32.gmra.mxu3 %vm346_vm3, %v622_v30 }
 0x24c   :  { %5560 = vmatmul.msk.f32.gmra.mxu0 %vm346_vm3, %v667_v33 }
 0x252   :  { %5609 = vmatmul.msk.f32.gmra.mxu3 %vm346_vm3, %v622_v30 }
 0x254   :  { %5561 = vmatmul.msk.f32.gmra.mxu0 %vm346_vm3, %v667_v33 }
 0x259   :  { %v744_v49 = vpop.f32.mrf.mxu0 }
 0x25a   :  { %v858_v50 = vadd.f32 %v857_v39, %v744_v49 }
 0x25c   :  { %v907_v51 = vadd.f32 %v6596_v46, %v858_v50  ;;  %5610 = vmatmul.msk.f32.vlgmr.msra.gmra.mxu0 %vm346_vm3, %v6381_v18  ;;  %v872_v18 = vpop.f32.mrf.mxu2 }
 0x25e   :  { %v923_v52 = vmax.f32 %v907_v51, 0.0 }
 0x260   :  { %5578 = vmatmul.msk.f32.vlgmr.msra.gmra.mxu1 %vm346_vm3, %v923_v52 }
 0x261   :  { %v747_v55 = vpop.f32.mrf.mxu0 }
 0x262   :  { %v861_v56 = vadd.f32 %v860_v43, %v747_v55 }
 0x264   :  { %v908_v58 = vadd.f32 %v6596_v46, %v861_v56  ;;  %5611 = vmatmul.msk.f32.gmra.mxu0 %vm346_vm3, %v6386_v22  ;;  %v875_v5 = vpop.f32.mrf.mxu2  ;;  %v1131_v56 = vpop.f32.mrf.mxu3 }
 0x266   :  { %v924_v59 = vmax.f32 %v908_v58, 0.0 }
 0x268   :  { %5579 = vmatmul.msk.f32.gmra.mxu1 %vm346_vm3, %v924_v59  ;;  %v1382_v59 = vld [vmem:[%s8608_s2 + $0x170] sm:$0xff] }
 0x269   :  { %v750_v60 = vpop.f32.mrf.mxu0 }
 0x26a   :  { %v864_v62 = vadd.f32 %v863_v44, %v750_v60 }
 0x26c   :  { %v909_v0 = vadd.f32 %v6596_v46, %v864_v62  ;;  %5612 = vmatmul.msk.f32.gmra.mxu0 %vm346_vm3, %v6391_v27  ;;  %v878_v14 = vpop.f32.mrf.mxu2 }
 0x26e   :  { %v925_v1 = vmax.f32 %v909_v0, 0.0 }
 0x270   :  { %5580 = vmatmul.msk.f32.gmra.mxu1 %vm346_vm3, %v925_v1 }
 0x271   :  { %v753_v2 = vpop.f32.mrf.mxu0 }
 0x272   :  { %v867_v3 = vadd.f32 %v866_v47, %v753_v2 }
 0x274   :  { %v910_v4 = vadd.f32 %v6596_v46, %v867_v3  ;;  %5613 = vmatmul.msk.f32.gmra.mxu0 %vm346_vm3, %v6396_v32  ;;  %v881_v17 = vpop.f32.mrf.mxu2 }
 0x276   :  { %v926_v22 = vmax.f32 %v910_v4, 0.0 }
 0x278   :  { %5581 = vmatmul.msk.f32.gmra.mxu1 %vm346_vm3, %v926_v22 }
 0x279   :  { %v756_v6 = vpop.f32.mrf.mxu0 }
 0x27a   :  { %v870_v8 = vadd.f32 %v869_v57, %v756_v6  ;;  %v1383_v57 = vld [vmem:[%s8608_s2 + $0x178] sm:$0xff] }
 0x27c   :  { %v911_v9 = vadd.f32 %v6596_v46, %v870_v8  ;;  %5614 = vmatmul.msk.f32.gmra.mxu0 %vm346_vm3, %v6401_v37 }
 0x27e   :  { %v927_v27 = vmax.f32 %v911_v9, 0.0 }
 0x280   :  { %5582 = vmatmul.msk.f32.gmra.mxu1 %vm346_vm3, %v927_v27 }
 0x281   :  { %v759_v10 = vpop.f32.mrf.mxu0 }
 0x282   :  { %v873_v11 = vadd.f32 %v872_v18, %v759_v10  ;;  %v1134_v18 = vpop.f32.mrf.mxu3 }
 0x284   :  { %v912_v12 = vadd.f32 %v6596_v46, %v873_v11  ;;  %5615 = vmatmul.msk.f32.gmra.mxu0 %vm346_vm3, %v6415_v45  ;;  %v884_v45 = vpop.f32.mrf.mxu2 }
 0x286   :  { %v928_v32 = vmax.f32 %v912_v12, 0.0 }
 0x288   :  { %5583 = vmatmul.msk.f32.gmra.mxu1 %vm346_vm3, %v928_v32 }
 0x289   :  { %v762_v13 = vpop.f32.mrf.mxu0 }
 0x28a   :  { %v876_v15 = vadd.f32 %v875_v5, %v762_v13  ;;  %v1137_v8 = vpop.f32.mrf.mxu3 }
 0x28c   :  { %v913_v19 = vadd.f32 %v6596_v46, %v876_v15  ;;  %5616 = vmatmul.msk.f32.gmra.mxu0 %vm346_vm3, %v6435_v54  ;;  %v887_v30 = vpop.f32.mrf.mxu2 }
 0x28e   :  { %v929_v37 = vmax.f32 %v913_v19, 0.0 }
 0x290   :  { %5584 = vmatmul.msk.f32.gmra.mxu1 %vm346_vm3, %v929_v37 }
 0x291   :  { %v765_v20 = vpop.f32.mrf.mxu0 }
 0x292   :  { %v879_v21 = vadd.f32 %v878_v14, %v765_v20  ;;  %v6680_v14 = vld [vmem:[%s8608_s2 + $0x128] ss:$0 sm:$0xff]  ;;  %v1140_v10 = vpop.f32.mrf.mxu3 }
 0x294   :  { %v914_v23 = vadd.f32 %v6596_v46, %v879_v21  ;;  %5617 = vmatmul.msk.f32.gmra.mxu0 %vm346_vm3, %v6448_v63  ;;  %v890_v31 = vpop.f32.mrf.mxu2 }
 0x296   :  { %v930_v24 = vmax.f32 %v914_v23, 0.0 }
 0x298   :  { %5585 = vmatmul.msk.f32.gmra.mxu1 %vm346_vm3, %v930_v24 }
 0x299   :  { %v768_v25 = vpop.f32.mrf.mxu0 }
 0x29a   :  { %v882_v26 = vadd.f32 %v881_v17, %v768_v25  ;;  %v1143_v37 = vpop.f32.mrf.mxu3 }
 0x29c   :  { %v915_v29 = vadd.f32 %v6596_v46, %v882_v26  ;;  %5618 = vmatmul.msk.f32.gmra.mxu0 %vm346_vm3, %v6461_v16  ;;  %v893_v44 = vpop.f32.mrf.mxu2 }
 0x29e   :  { %v931_v54 = vmax.f32 %v915_v29, 0.0 }
 0x2a0   :  { %5586 = vmatmul.msk.f32.gmra.mxu1 %vm346_vm3, %v931_v54 }
 0x2a1   :  { %v771_v33 = vpop.f32.mrf.mxu0 }
 0x2a2   :  { %v885_v35 = vadd.f32 %v884_v45, %v771_v33  ;;  %v1146_v29 = vpop.f32.mrf.mxu3  ;;  %v1404_v33 = vld [vmem:[%s8608_s2 + $0x1a0] sm:$0xff] }
 0x2a4   :  { %v916_v36 = vadd.f32 %v6596_v46, %v885_v35  ;;  %5619 = vmatmul.msk.f32.gmra.mxu0 %vm346_vm3, %v6466_v28  ;;  %v896_v52 = vpop.f32.mrf.mxu2 }
 0x2a6   :  { %v932_v63 = vmax.f32 %v916_v36, 0.0 }
 0x2a8   :  { %5587 = vmatmul.msk.f32.gmra.mxu1 %vm346_vm3, %v932_v63 }
 0x2a9   :  { %v774_v34 = vpop.f32.mrf.mxu0 }
 0x2aa   :  { %v888_v39 = vadd.f32 %v887_v30, %v774_v34 }
 0x2ac   :  { %v917_v40 = vadd.f32 %v6596_v46, %v888_v39  ;;  %5620 = vmatmul.msk.f32.gmra.mxu0 %vm346_vm3, %v6480_v38  ;;  %v1385_v38 = vld [vmem:[%s8608_s2 + $0x188] sm:$0xff]  ;;  %v899_v0 = vpop.f32.mrf.mxu2 }
 0x2ad   :  { %1579 = vmatpush.msrb.mxu1 %v1385_v38 }
 0x2ae   :  { %v933_v16 = vmax.f32 %v917_v40, 0.0  ;;  %v1149_v40 = vpop.f32.mrf.mxu3 }
 0x2b0   :  { %5588 = vmatmul.msk.f32.gmra.mxu1 %vm346_vm3, %v933_v16 }
 0x2b1   :  { %v777_v41 = vpop.f32.mrf.mxu0 }
 0x2b2   :  { %v891_v43 = vadd.f32 %v890_v31, %v777_v41 }
 0x2b4   :  { %v918_v47 = vadd.f32 %v6596_v46, %v891_v43  ;;  %5621 = vmatmul.msk.f32.gmra.mxu0 %vm346_vm3, %v6489_v42  ;;  %v1384_v42 = vld [vmem:[%s8608_s2 + $0x180] sm:$0xff]  ;;  %v902_v22 = vpop.f32.mrf.mxu2 }
 0x2b5   :  { %1580 = vmatpush.msrb.mxu1 %v1384_v42 }
 0x2b6   :  { %v934_v28 = vmax.f32 %v918_v47, 0.0 }
 0x2b7   :  { %1581 = vmatpush.msrb.mxu1 %v1383_v57  ;;  %v1790_v57 = vld [vmem:[%s8608_s2 + $0x208] sm:$0xff] }
 0x2b8   :  { %5589 = vmatmul.msk.f32.gmra.mxu1 %vm346_vm3, %v934_v28 }
 0x2b9   :  { %v780_v49 = vpop.f32.mrf.mxu0  ;;  %1582 = vmatpush.msrb.mxu1 %v1382_v59  ;;  %v1789_v59 = vld [vmem:[%s8608_s2 + $0x200] sm:$0xff] }
 0x2ba   :  { %v894_v50 = vadd.f32 %v893_v44, %v780_v49  ;;  %v1152_v49 = vpop.f32.mrf.mxu3 }
 0x2bc   :  { %v919_v51 = vadd.f32 %v6596_v46, %v894_v50  ;;  %5622 = vmatmul.msk.f32.gmra.mxu0 %vm346_vm3, %v6498_v48 }
 0x2be   :  { %v935_v55 = vmax.f32 %v919_v51, 0.0  ;;  %v1792_v51 = vld [vmem:[%s8608_s2 + $0x218] sm:$0xff] }
 0x2bf   :  { %1853 = vmatpush.msrb.mxu0 %v1792_v51 }
 0x2c0   :  { %5590 = vmatmul.msk.f32.gmra.mxu1 %vm346_vm3, %v935_v55  ;;  %v1791_v55 = vld [vmem:[%s8608_s2 + $0x210] sm:$0xff] }
 0x2c1   :  { %v783_v48 = vpop.f32.mrf.mxu0  ;;  %1854 = vmatpush.msrb.mxu0 %v1791_v55 }
 0x2c2   :  { %v897_v58 = vadd.f32 %v896_v52, %v783_v48 }
 0x2c3   :  { %1855 = vmatpush.msrb.mxu0 %v1790_v57 }
 0x2c4   :  { %v920_v60 = vadd.f32 %v6596_v46, %v897_v58  ;;  %5623 = vmatmul.msk.f32.gmra.mxu0 %vm346_vm3, %v6507_v53  ;;  %v1405_v53 = vld [vmem:[%s8608_s2 + $0x1a8] sm:$0xff]  ;;  %v1403_v58 = vld [vmem:[%s8608_s2 + $0x198] sm:$0xff] }
 0x2c5   :  { %1466 = vmatpush.msrb.mxu2 %v1405_v53  ;;  %1856 = vmatpush.msrb.mxu0 %v1789_v59 }
 0x2c6   :  { %v936_v62 = vmax.f32 %v920_v60, 0.0 }
 0x2c7   :  { %1467 = vmatpush.msrb.mxu2 %v1404_v33 }
 0x2c8   :  { %5591 = vmatmul.msk.f32.gmra.mxu1 %vm346_vm3, %v936_v62  ;;  %v1402_v62 = vld [vmem:[%s8608_s2 + $0x190] sm:$0xff] }
 0x2c9   :  { %v786_v1 = vpop.f32.mrf.mxu0  ;;  %1468 = vmatpush.msrb.mxu2 %v1403_v58 }
 0x2ca   :  { %v900_v2 = vadd.f32 %v899_v0, %v786_v1  ;;  %v1155_v1 = vpop.f32.mrf.mxu3 }
 0x2cb   :  { %1469 = vmatpush.msrb.mxu2 %v1402_v62 }
 0x2cc   :  { %v921_v3 = vadd.f32 %v6596_v46, %v900_v2  ;;  %5624 = vmatmul.msk.f32.gmra.mxu0 %vm346_vm3, %v6522_v61 }
 0x2ce   :  { %v937_v4 = vmax.f32 %v921_v3, 0.0 }
 0x2d0   :  { %5592 = vmatmul.msk.f32.gmra.mxu1 %vm346_vm3, %v937_v4 }
 0x2d1   :  { %v789_v5 = vpop.f32.mrf.mxu0 }
 0x2d2   :  { %v903_v6 = vadd.f32 %v902_v22, %v789_v5 }
 0x2d4   :  { %v922_v9 = vadd.f32 %v6596_v46, %v903_v6  ;;  %5625 = vmatmul.msk.f32.gmra.mxu0 %vm346_vm3, %v6539_v7 }
 0x2d6   :  { %v938_v27 = vmax.f32 %v922_v9, 0.0 }
 0x2d8   :  { %5593 = vmatmul.msk.f32.gmra.mxu1 %vm346_vm3, %v938_v27 }
 0x2d9   :  { %v1244_v61 = vpop.f32.mrf.mxu0 }
 0x2da   :  { %v1245_v12 = vadd.f32 %v1244_v61, %v1131_v56 }
 0x2dd   :  { %v1010_v11 = vpop.f32.mrf.mxu1 }
 0x2de   :  { %v1011_v32 = vadd.f32 %v6680_v14, %v1010_v11 }
 0x2e0   :  { %v6683_v13 = vadd.f32 %v1245_v12, %v1011_v32 }
 0x2e1   :  { %v1247_v46 = vpop.f32.mrf.mxu0 }
 0x2e2   :  { %v1366_v15 = vmax.f32 %v6683_v13, 0.0  ;;  %v1248_v17 = vadd.f32 %v1247_v46, %v1134_v18  ;;  %v1308_v11 = vsel %vm346_vm3, %v6683_v13, -inf }
 0x2e4   :  { %5642 = vmatmul.msk.f32.vlgmr.msrb.gmra.mxu1 %vm346_vm3, %v1366_v15 }
 0x2e5   :  { %v1013_v7 = vpop.f32.mrf.mxu1 }
 0x2e6   :  { %v1014_v19 = vadd.f32 %v6680_v14, %v1013_v7 }
 0x2e8   :  { %v6688_v20 = vadd.f32 %v1248_v17, %v1014_v19 }
 0x2e9   :  { %v1250_v21 = vpop.f32.mrf.mxu0 }
 0x2ea   :  { %v1367_v23 = vmax.f32 %v6688_v20, 0.0  ;;  %v1251_v24 = vadd.f32 %v1250_v21, %v1137_v8  ;;  %v1309_v8 = vsel %vm346_vm3, %v6688_v20, -inf }
 0x2ec   :  { %5643 = vmatmul.msk.f32.gmra.mxu1 %vm346_vm3, %v1367_v23 }
 0x2ed   :  { %v1016_v45 = vpop.f32.mrf.mxu1 }
 0x2ee   :  { %v1017_v25 = vadd.f32 %v6680_v14, %v1016_v45 }
 0x2f0   :  { %v6693_v26 = vadd.f32 %v1251_v24, %v1017_v25 }
 0x2f1   :  { %v1253_v54 = vpop.f32.mrf.mxu0 }
 0x2f2   :  { %v1368_v30 = vmax.f32 %v6693_v26, 0.0  ;;  %v1254_v36 = vadd.f32 %v1253_v54, %v1140_v10  ;;  %v1158_v10 = vpop.f32.mrf.mxu3  ;;  %v1310_v46 = vsel %vm346_vm3, %v6693_v26, -inf }
 0x2f4   :  { %5644 = vmatmul.msk.f32.gmra.mxu1 %vm346_vm3, %v1368_v30 }
 0x2f5   :  { %v1019_v35 = vpop.f32.mrf.mxu1 }
 0x2f6   :  { %v1020_v63 = vadd.f32 %v6680_v14, %v1019_v35 }
 0x2f8   :  { %v6701_v31 = vadd.f32 %v1254_v36, %v1020_v63 }
 0x2f9   :  { %v1256_v34 = vpop.f32.mrf.mxu0 }
 0x2fa   :  { %v1369_v39 = vmax.f32 %v6701_v31, 0.0  ;;  %v1257_v41 = vadd.f32 %v1256_v34, %v1143_v37  ;;  %v1311_v15 = vsel %vm346_vm3, %v6701_v31, -inf  ;;  %v1161_v63 = vpop.f32.mrf.mxu3 }
 0x2fc   :  { %5645 = vmatmul.msk.f32.gmra.mxu1 %vm346_vm3, %v1369_v39 }
 0x2fd   :  { %v1022_v16 = vpop.f32.mrf.mxu1 }
 0x2fe   :  { %v1023_v43 = vadd.f32 %v6680_v14, %v1022_v16 }
 0x300   :  { %v6706_v44 = vadd.f32 %v1257_v41, %v1023_v43 }
 0x301   :  { %v1259_v47 = vpop.f32.mrf.mxu0 }
 0x302   :  { %v1370_v28 = vmax.f32 %v6706_v44, 0.0  ;;  %v1260_v38 = vadd.f32 %v1259_v47, %v1146_v29  ;;  %v1312_v9 = vsel %vm346_vm3, %v6706_v44, -inf }
 0x303   :  { %v1313_v19 = vmax.f32 %v1308_v11, %v1312_v9 }
 0x304   :  { %5646 = vmatmul.msk.f32.gmra.mxu1 %vm346_vm3, %v1370_v28 }
 0x305   :  { %v1025_v50 = vpop.f32.mrf.mxu1 }
 0x306   :  { %v1026_v52 = vadd.f32 %v6680_v14, %v1025_v50 }
 0x308   :  { %v6717_v42 = vadd.f32 %v1260_v38, %v1026_v52  ;;  %v1164_v38 = vpop.f32.mrf.mxu3 }
 0x309   :  { %v1262_v56 = vpop.f32.mrf.mxu0 }
 0x30a   :  { %v1371_v48 = vmax.f32 %v6717_v42, 0.0  ;;  %v1263_v0 = vadd.f32 %v1262_v56, %v1149_v40  ;;  %v1314_v5 = vsel %vm346_vm3, %v6717_v42, -inf }
 0x30b   :  { %v1315_v12 = vmax.f32 %v1309_v8, %v1314_v5 }
 0x30c   :  { %5647 = vmatmul.msk.f32.gmra.mxu1 %vm346_vm3, %v1371_v48 }
 0x30d   :  { %v1028_v60 = vpop.f32.mrf.mxu1  ;;  %v1320_v23 = vmax.f32 %v1313_v19, %v1315_v12 }
 0x30e   :  { %v1029_v18 = vadd.f32 %v6680_v14, %v1028_v60 }
 0x310   :  { %v6734_v2 = vadd.f32 %v1263_v0, %v1029_v18  ;;  %v1167_v18 = vpop.f32.mrf.mxu3 }
 0x311   :  { %v1265_v3 = vpop.f32.mrf.mxu0 }
 0x312   :  { %v1372_v4 = vmax.f32 %v6734_v2, 0.0  ;;  %v1266_v6 = vadd.f32 %v1265_v3, %v1152_v49  ;;  %v1316_v27 = vsel %vm346_vm3, %v6734_v2, -inf }
 0x313   :  { %v1317_v37 = vmax.f32 %v1310_v46, %v1316_v27 }
 0x314   :  { %5648 = vmatmul.msk.f32.gmra.mxu1 %vm346_vm3, %v1372_v4 }
 0x315   :  { %v1031_v22 = vpop.f32.mrf.mxu1 }
 0x316   :  { %v1032_v53 = vadd.f32 %v6680_v14, %v1031_v22 }
 0x318   :  { %v6747_v61 = vadd.f32 %v1266_v6, %v1032_v53  ;;  %v1170_v8 = vpop.f32.mrf.mxu3 }
 0x319   :  { %v1268_v32 = vpop.f32.mrf.mxu0 }
 0x31a   :  { %v1318_v7 = vsel %vm346_vm3, %v6747_v61, -inf  ;;  %v1373_v17 = vmax.f32 %v6747_v61, 0.0  ;;  %v1269_v25 = vadd.f32 %v1268_v32, %v1155_v1 }
 0x31b   :  { %v1319_v21 = vmax.f32 %v1311_v15, %v1318_v7 }
 0x31c   :  { %5649 = vmatmul.msk.f32.gmra.mxu1 %vm346_vm3, %v1373_v17 }
 0x31d   :  { %v1321_v45 = vmax.f32 %v1317_v37, %v1319_v21  ;;  %v1034_v24 = vpop.f32.mrf.mxu1 }
 0x31e   :  { %v1035_v29 = vadd.f32 %v6680_v14, %v1034_v24 }
 0x31f   :  { %v1322_v54 = vmax.f32 %v1320_v23, %v1321_v45 }
 0x320   :  { %v6760_v30 = vadd.f32 %v1269_v25, %v1035_v29  ;;  %v1173_v7 = vpop.f32.mrf.mxu3 }
 0x321   :  { %v1323_v33 = vrot.slane %v1322_v54, 4  ;;  %v1271_v35 = vpop.f32.mrf.mxu0 }
 0x322   :  { %v1374_v36 = vmax.f32 %v6760_v30, 0.0  ;;  %v1272_v16 = vadd.f32 %v1271_v35, %v1158_v10 }
 0x323   :  { %v1324_v34 = vmax.f32 %v1322_v54, %v1323_v33 }
 0x324   :  { %5650 = vmatmul.msk.f32.gmra.mxu1 %vm346_vm3, %v1374_v36 }
 0x325   :  { %v1325_v39 = vrot.slane %v1324_v34, 2  ;;  %v1037_v40 = vpop.f32.mrf.mxu1 }
 0x326   :  { %v1038_v41 = vadd.f32 %v6680_v14, %v1037_v40 }
 0x327   :  { %v1326_v43 = vmax.f32 %v1324_v34, %v1325_v39  ;;  %v1329_v39 = vsel %vm346_vm3, %v6760_v30, -inf }
 0x328   :  { %v6765_v47 = vadd.f32 %v1272_v16, %v1038_v41  ;;  %v1176_v24 = vpop.f32.mrf.mxu3  ;;  %v1788_v16 = vld [vmem:[%s8608_s2 + $0x1f8] sm:$0xff] }
 0x329   :  { %v1327_v28 = vrot.slane %v1326_v43, 1  ;;  %v1274_v49 = vpop.f32.mrf.mxu0  ;;  %1966 = vmatpush.msra.mxu2 %v1788_v16 }
 0x32a   :  { %v1375_v50 = vmax.f32 %v6765_v47, 0.0  ;;  %v1275_v56 = vadd.f32 %v1274_v49, %v1161_v63  ;;  %v1330_v35 = vsel %vm346_vm3, %v6765_v47, -inf }
 0x32b   :  { %v6768_v51 = vmax.f32 %v1326_v43, %v1327_v28 }
 0x32c   :  { %5651 = vmatmul.msk.f32.gmra.mxu1 %vm346_vm3, %v1375_v50 }
 0x32d   :  { %v1040_v52 = vpop.f32.mrf.mxu1  ;;  %5674 = vmatmul.msk.f32.vlgmr.msrb.gmra.mxu0 %vm346_vm3, %v6768_v51  ;;  %v6774_v55 = vmax.f32 %v6768_v51, 0.0 }
 0x32e   :  { %v1041_v57 = vadd.f32 %v6680_v14, %v1040_v52 }
 0x32f   :  { %5626 = vmatmul.msk.f32.vlgmr.msrb.gmra.mxu2 %vm346_vm3, %v6774_v55 }
 0x330   :  { %v6779_v48 = vadd.f32 %v1275_v56, %v1041_v57 }
 0x331   :  { %v1277_v58 = vpop.f32.mrf.mxu0 }
 0x332   :  { %v1376_v59 = vmax.f32 %v6779_v48, 0.0  ;;  %v1278_v62 = vadd.f32 %v1277_v58, %v1164_v38  ;;  %v1331_v41 = vsel %vm346_vm3, %v6779_v48, -inf }
 0x334   :  { %5652 = vmatmul.msk.f32.gmra.mxu1 %vm346_vm3, %v1376_v59 }
 0x335   :  { %v1043_v60 = vpop.f32.mrf.mxu1  ;;  %5675 = vmatmul.msk.f32.gmra.mxu0 %vm346_vm3, %v6768_v51 }
 0x336   :  { %v1044_v0 = vadd.f32 %v6680_v14, %v1043_v60 }
 0x337   :  { %5627 = vmatmul.msk.f32.gmra.mxu2 %vm346_vm3, %v6774_v55 }
 0x338   :  { %v6788_v1 = vadd.f32 %v1278_v62, %v1044_v0 }
 0x339   :  { %v1280_v3 = vpop.f32.mrf.mxu0 }
 0x33a   :  { %v1377_v4 = vmax.f32 %v6788_v1, 0.0  ;;  %v1281_v5 = vadd.f32 %v1280_v3, %v1167_v18  ;;  %v1332_v43 = vsel %vm346_vm3, %v6788_v1, -inf }
 0x33c   :  { %5653 = vmatmul.msk.f32.gmra.mxu1 %vm346_vm3, %v1377_v4 }
 0x33d   :  { %v1046_v22 = vpop.f32.mrf.mxu1  ;;  %5676 = vmatmul.msk.f32.gmra.mxu0 %vm346_vm3, %v6768_v51 }
 0x33e   :  { %v1047_v6 = vadd.f32 %v6680_v14, %v1046_v22  ;;  %v1668_v22 = vld [vmem:[%s8608_s2 + $0x1c8] sm:$0xff] }
 0x33f   :  { %5628 = vmatmul.msk.f32.gmra.mxu2 %vm346_vm3, %v6774_v55 }
 0x340   :  { %v6797_v53 = vadd.f32 %v1281_v5, %v1047_v6  ;;  %v1785_v5 = vld [vmem:[%s8608_s2 + $0x1e0] sm:$0xff] }
 0x341   :  { %v1283_v9 = vpop.f32.mrf.mxu0 }
 0x342   :  { %v1378_v27 = vmax.f32 %v6797_v53, 0.0  ;;  %v1284_v11 = vadd.f32 %v1283_v9, %v1170_v8  ;;  %v1333_v36 = vsel %vm346_vm3, %v6797_v53, -inf  ;;  %v1667_v8 = vld [vmem:[%s8608_s2 + $0x1c0] sm:$0xff]  ;;  %v1666_v9 = vld [vmem:[%s8608_s2 + $0x1b8] sm:$0xff] }
 0x343   :  { %v1334_v50 = vmax.f32 %v1329_v39, %v1333_v36 }
 0x344   :  { %5654 = vmatmul.msk.f32.gmra.mxu1 %vm346_vm3, %v1378_v27 }
 0x345   :  { %v1049_v10 = vpop.f32.mrf.mxu1  ;;  %5677 = vmatmul.msk.f32.gmra.mxu0 %vm346_vm3, %v6768_v51 }
 0x346   :  { %v1050_v12 = vadd.f32 %v6680_v14, %v1049_v10 }
 0x347   :  { %5629 = vmatmul.msk.f32.gmra.mxu2 %vm346_vm3, %v6774_v55 }
 0x348   :  { %v6806_v32 = vadd.f32 %v1284_v11, %v1050_v12  ;;  %v6897_v11 = vld [vmem:[%s8608_s2 + $0x1b0] ss:$0 sm:$0xff] }
 0x349   :  { %v1286_v46 = vpop.f32.mrf.mxu0 }
 0x34a   :  { %v1379_v15 = vmax.f32 %v6806_v32, 0.0  ;;  %v1287_v19 = vadd.f32 %v1286_v46, %v1173_v7  ;;  %v1335_v29 = vsel %vm346_vm3, %v6806_v32, -inf }
 0x34b   :  { %v1336_v40 = vmax.f32 %v1330_v35, %v1335_v29 }
 0x34c   :  { %5655 = vmatmul.msk.f32.gmra.mxu1 %vm346_vm3, %v1379_v15 }
 0x34d   :  { %v1052_v17 = vpop.f32.mrf.mxu1  ;;  %5678 = vmatmul.msk.f32.gmra.mxu0 %vm346_vm3, %v6768_v51  ;;  %v1341_v56 = vmax.f32 %v1334_v50, %v1336_v40 }
 0x34e   :  { %v1053_v37 = vadd.f32 %v6680_v14, %v1052_v17 }
 0x34f   :  { %5630 = vmatmul.msk.f32.gmra.mxu2 %vm346_vm3, %v6774_v55 }
 0x350   :  { %v6815_v21 = vadd.f32 %v1287_v19, %v1053_v37 }
 0x351   :  { %v1289_v45 = vpop.f32.mrf.mxu0 }
 0x352   :  { %v1380_v23 = vmax.f32 %v6815_v21, 0.0  ;;  %v1290_v54 = vadd.f32 %v1289_v45, %v1176_v24  ;;  %v1337_v63 = vsel %vm346_vm3, %v6815_v21, -inf }
 0x353   :  { %v1338_v38 = vmax.f32 %v1331_v41, %v1337_v63 }
 0x354   :  { %5656 = vmatmul.msk.f32.gmra.mxu1 %vm346_vm3, %v1380_v23 }
 0x355   :  { %v1055_v25 = vpop.f32.mrf.mxu1  ;;  %5679 = vmatmul.msk.f32.gmra.mxu0 %vm346_vm3, %v6768_v51 }
 0x356   :  { %v1056_v33 = vadd.f32 %v6680_v14, %v1055_v25  ;;  %v1669_v14 = vld [vmem:[%s8608_s2 + $0x1d0] sm:$0xff] }
 0x357   :  { %5631 = vmatmul.msk.f32.gmra.mxu2 %vm346_vm3, %v6774_v55  ;;  %1732 = vmatpush.msrb.mxu3 %v1669_v14 }
 0x358   :  { %v6832_v34 = vadd.f32 %v1290_v54, %v1056_v33 }
 0x359   :  { %1733 = vmatpush.msrb.mxu3 %v1668_v22 }
 0x35a   :  { %v1339_v28 = vsel %vm346_vm3, %v6832_v34, -inf  ;;  %v1381_v49 = vmax.f32 %v6832_v34, 0.0 }
 0x35b   :  { %v1340_v52 = vmax.f32 %v1332_v43, %v1339_v28  ;;  %1734 = vmatpush.msrb.mxu3 %v1667_v8 }
 0x35c   :  { %5657 = vmatmul.msk.f32.gmra.mxu1 %vm346_vm3, %v1381_v49 }
 0x35d   :  { %v1342_v57 = vmax.f32 %v1338_v38, %v1340_v52  ;;  %5680 = vmatmul.msk.f32.gmra.mxu0 %vm346_vm3, %v6768_v51  ;;  %1735 = vmatpush.msrb.mxu3 %v1666_v9 }
 0x35f   :  { %v1343_v58 = vmax.f32 %v1341_v56, %v1342_v57  ;;  %5632 = vmatmul.msk.f32.gmra.mxu2 %vm346_vm3, %v6774_v55 }
 0x361   :  { %v1344_v59 = vrot.slane %v1343_v58, 4  ;;  %v1584_v6 = vpop.f32.mrf.mxu1 }
 0x363   :  { %v1345_v60 = vmax.f32 %v1343_v58, %v1344_v59 }
 0x365   :  { %v1346_v62 = vrot.slane %v1345_v60, 2  ;;  %5681 = vmatmul.msk.f32.gmra.mxu0 %vm346_vm3, %v6768_v51  ;;  %v1787_v51 = vld [vmem:[%s8608_s2 + $0x1f0] sm:$0xff] }
 0x366   :  { %1967 = vmatpush.msra.mxu2 %v1787_v51 }
 0x367   :  { %v1347_v0 = vmax.f32 %v1345_v60, %v1346_v62  ;;  %5633 = vmatmul.msk.f32.gmra.mxu2 %vm346_vm3, %v6774_v55  ;;  %v1786_v55 = vld [vmem:[%s8608_s2 + $0x1e8] sm:$0xff] }
 0x368   :  { %1968 = vmatpush.msra.mxu2 %v1786_v55 }
 0x369   :  { %v1348_v18 = vrot.slane %v1347_v0, 1  ;;  %v1587_v27 = vpop.f32.mrf.mxu1 }
 0x36a   :  { %1969 = vmatpush.msra.mxu2 %v1785_v5 }
 0x36b   :  { %v1349_v3 = vmax.f32 %v1347_v0, %v1348_v18 }
 0x36d   :  { %5682 = vmatmul.msk.f32.gmra.mxu0 %vm346_vm3, %v1349_v3  ;;  %v1394_v4 = vmax.f32 %v1349_v3, 0.0 }
 0x36f   :  { %5634 = vmatmul.msk.f32.gmra.mxu2 %vm346_vm3, %v1394_v4 }
 0x371   :  { %v1590_v10 = vpop.f32.mrf.mxu1 }
 0x375   :  { %5683 = vmatmul.msk.f32.gmra.mxu0 %vm346_vm3, %v1349_v3 }
 0x377   :  { %5635 = vmatmul.msk.f32.gmra.mxu2 %vm346_vm3, %v1394_v4 }
 0x379   :  { %v1593_v12 = vpop.f32.mrf.mxu1 }
 0x37d   :  { %5684 = vmatmul.msk.f32.gmra.mxu0 %vm346_vm3, %v1349_v3 }
 0x37f   :  { %5636 = vmatmul.msk.f32.gmra.mxu2 %vm346_vm3, %v1394_v4 }
 0x381   :  { %v1596_v23 = vpop.f32.mrf.mxu1 }
 0x385   :  { %5685 = vmatmul.msk.f32.gmra.mxu0 %vm346_vm3, %v1349_v3 }
 0x387   :  { %5637 = vmatmul.msk.f32.gmra.mxu2 %vm346_vm3, %v1394_v4 }
 0x389   :  { %v1599_v54 = vpop.f32.mrf.mxu1 }
 0x38d   :  { %5686 = vmatmul.msk.f32.gmra.mxu0 %vm346_vm3, %v1349_v3 }
 0x38f   :  { %5638 = vmatmul.msk.f32.gmra.mxu2 %vm346_vm3, %v1394_v4 }
 0x395   :  { %5687 = vmatmul.msk.f32.gmra.mxu0 %vm346_vm3, %v1349_v3 }
 0x397   :  { %5639 = vmatmul.msk.f32.gmra.mxu2 %vm346_vm3, %v1394_v4 }
 0x39d   :  { %5688 = vmatmul.msk.f32.gmra.mxu0 %vm346_vm3, %v1349_v3 }
 0x39f   :  { %5640 = vmatmul.msk.f32.gmra.mxu2 %vm346_vm3, %v1394_v4 }
 0x3a5   :  { %5689 = vmatmul.msk.f32.gmra.mxu0 %vm346_vm3, %v1349_v3 }
 0x3a7   :  { %5641 = vmatmul.msk.f32.gmra.mxu2 %vm346_vm3, %v1394_v4 }
 0x3af   :  { %5690 = vmatmul.msk.f32.vlgmr.msra.gmra.mxu2 %vm346_vm3, %v6683_v13 }
 0x3b2   :  { %v1471_v46 = vpop.f32.mrf.mxu2 }
 0x3b3   :  { %v1585_v15 = vadd.f32 %v1584_v6, %v1471_v46 }
 0x3b5   :  { %v1634_v7 = vadd.f32 %v6897_v11, %v1585_v15 }
 0x3b7   :  { %v1650_v17 = vmax.f32 %v1634_v7, 0.0  ;;  %5691 = vmatmul.msk.f32.gmra.mxu2 %vm346_vm3, %v6688_v20 }
 0x3b9   :  { %5658 = vmatmul.msk.f32.vlgmr.msrb.gmra.mxu3 %vm346_vm3, %v1650_v17 }
 0x3ba   :  { %v1474_v19 = vpop.f32.mrf.mxu2 }
 0x3bb   :  { %v1588_v37 = vadd.f32 %v1587_v27, %v1474_v19 }
 0x3bd   :  { %v1635_v13 = vadd.f32 %v6897_v11, %v1588_v37  ;;  %v2112_v37 = vld [vmem:[%s8608_s2 + $0x238] sm:$0xff] }
 0x3be   :  { %2306 = vmatpush.msra.mxu3 %v2112_v37 }
 0x3bf   :  { %v1651_v45 = vmax.f32 %v1635_v13, 0.0  ;;  %5692 = vmatmul.msk.f32.gmra.mxu2 %vm346_vm3, %v6693_v26  ;;  %v1602_v26 = vpop.f32.mrf.mxu1  ;;  %v1858_v13 = vpop.f32.mrf.mxu0 }
 0x3c1   :  { %5659 = vmatmul.msk.f32.gmra.mxu3 %vm346_vm3, %v1651_v45 }
 0x3c2   :  { %v1477_v24 = vpop.f32.mrf.mxu2 }
 0x3c3   :  { %v1591_v25 = vadd.f32 %v1590_v10, %v1477_v24 }
 0x3c5   :  { %v1636_v29 = vadd.f32 %v6897_v11, %v1591_v25  ;;  %v2109_v25 = vld [vmem:[%s8608_s2 + $0x220] sm:$0xff] }
 0x3c7   :  { %v1652_v33 = vmax.f32 %v1636_v29, 0.0  ;;  %5693 = vmatmul.msk.f32.gmra.mxu2 %vm346_vm3, %v6701_v31  ;;  %v1605_v31 = vpop.f32.mrf.mxu1 }
 0x3c9   :  { %5660 = vmatmul.msk.f32.gmra.mxu3 %vm346_vm3, %v1652_v33 }
 0x3ca   :  { %v1480_v20 = vpop.f32.mrf.mxu2 }
 0x3cb   :  { %v1594_v35 = vadd.f32 %v1593_v12, %v1480_v20 }
 0x3cd   :  { %v1637_v36 = vadd.f32 %v6897_v11, %v1594_v35 }
 0x3cf   :  { %v1653_v63 = vmax.f32 %v1637_v36, 0.0  ;;  %5694 = vmatmul.msk.f32.gmra.mxu2 %vm346_vm3, %v6706_v44  ;;  %v1608_v38 = vpop.f32.mrf.mxu1 }
 0x3d1   :  { %5661 = vmatmul.msk.f32.gmra.mxu3 %vm346_vm3, %v1653_v63 }
 0x3d2   :  { %v1483_v39 = vpop.f32.mrf.mxu2 }
 0x3d3   :  { %v1597_v40 = vadd.f32 %v1596_v23, %v1483_v39  ;;  %v2111_v23 = vld [vmem:[%s8608_s2 + $0x230] sm:$0xff] }
 0x3d4   :  { %2307 = vmatpush.msra.mxu3 %v2111_v23 }
 0x3d5   :  { %v1638_v14 = vadd.f32 %v6897_v11, %v1597_v40  ;;  %v2132_v40 = vld [vmem:[%s8608_s2 + $0x258] sm:$0xff] }
 0x3d6   :  { %2193 = vmatpush.msra.mxu1 %v2132_v40 }
 0x3d7   :  { %v1654_v16 = vmax.f32 %v1638_v14, 0.0  ;;  %5695 = vmatmul.msk.f32.gmra.mxu2 %vm346_vm3, %v6717_v42  ;;  %v1611_v59 = vpop.f32.mrf.mxu1 }
 0x3d9   :  { %5662 = vmatmul.msk.f32.gmra.mxu3 %vm346_vm3, %v1654_v16 }
 0x3da   :  { %v1486_v41 = vpop.f32.mrf.mxu2 }
 0x3db   :  { %v1600_v43 = vadd.f32 %v1599_v54, %v1486_v41 }
 0x3dd   :  { %v1639_v28 = vadd.f32 %v6897_v11, %v1600_v43 }
 0x3df   :  { %v1655_v49 = vmax.f32 %v1639_v28, 0.0  ;;  %5696 = vmatmul.msk.f32.gmra.mxu2 %vm346_vm3, %v6734_v2 }
 0x3e1   :  { %5663 = vmatmul.msk.f32.gmra.mxu3 %vm346_vm3, %v1655_v49 }
 0x3e2   :  { %v1489_v44 = vpop.f32.mrf.mxu2 }
 0x3e3   :  { %v1603_v50 = vadd.f32 %v1602_v26, %v1489_v44 }
 0x3e5   :  { %v1640_v52 = vadd.f32 %v6897_v11, %v1603_v50 }
 0x3e7   :  { %v1656_v56 = vmax.f32 %v1640_v52, 0.0  ;;  %5697 = vmatmul.msk.f32.gmra.mxu2 %vm346_vm3, %v6747_v61  ;;  %v1614_v61 = vpop.f32.mrf.mxu1 }
 0x3e9   :  { %5664 = vmatmul.msk.f32.gmra.mxu3 %vm346_vm3, %v1656_v56 }
 0x3ea   :  { %v1492_v42 = vpop.f32.mrf.mxu2 }
 0x3eb   :  { %v1606_v57 = vadd.f32 %v1605_v31, %v1492_v42 }
 0x3ed   :  { %v1641_v58 = vadd.f32 %v6897_v11, %v1606_v57 }
 0x3ef   :  { %v1657_v60 = vmax.f32 %v1641_v58, 0.0  ;;  %5698 = vmatmul.msk.f32.gmra.mxu2 %vm346_vm3, %v6760_v30  ;;  %v1617_v30 = vpop.f32.mrf.mxu1 }
 0x3f1   :  { %5665 = vmatmul.msk.f32.gmra.mxu3 %vm346_vm3, %v1657_v60 }
 0x3f2   :  { %v1495_v2 = vpop.f32.mrf.mxu2 }
 0x3f3   :  { %v1609_v62 = vadd.f32 %v1608_v38, %v1495_v2 }
 0x3f5   :  { %v1642_v0 = vadd.f32 %v6897_v11, %v1609_v62 }
 0x3f7   :  { %v1658_v18 = vmax.f32 %v1642_v0, 0.0  ;;  %5699 = vmatmul.msk.f32.gmra.mxu2 %vm346_vm3, %v6765_v47  ;;  %v1620_v27 = vpop.f32.mrf.mxu1 }
 0x3f9   :  { %5666 = vmatmul.msk.f32.gmra.mxu3 %vm346_vm3, %v1658_v18 }
 0x3fa   :  { %v1498_v3 = vpop.f32.mrf.mxu2 }
 0x3fb   :  { %v1612_v4 = vadd.f32 %v1611_v59, %v1498_v3 }
 0x3fd   :  { %v1643_v22 = vadd.f32 %v6897_v11, %v1612_v4  ;;  %v2131_v4 = vld [vmem:[%s8608_s2 + $0x250] sm:$0xff] }
 0x3fe   :  { %2194 = vmatpush.msra.mxu1 %v2131_v4 }
 0x3ff   :  { %v1659_v51 = vmax.f32 %v1643_v22, 0.0  ;;  %5700 = vmatmul.msk.f32.gmra.mxu2 %vm346_vm3, %v6779_v48  ;;  %v1623_v7 = vpop.f32.mrf.mxu1 }
 0x401   :  { %5667 = vmatmul.msk.f32.gmra.mxu3 %vm346_vm3, %v1659_v51 }
 0x402   :  { %v1501_v55 = vpop.f32.mrf.mxu2 }
 0x403   :  { %v1615_v5 = vadd.f32 %v1614_v61, %v1501_v55 }
 0x405   :  { %v1644_v6 = vadd.f32 %v6897_v11, %v1615_v5 }
 0x407   :  { %v1660_v8 = vmax.f32 %v1644_v6, 0.0  ;;  %5701 = vmatmul.msk.f32.gmra.mxu2 %vm346_vm3, %v6788_v1  ;;  %v1626_v24 = vpop.f32.mrf.mxu1 }
 0x409   :  { %5668 = vmatmul.msk.f32.gmra.mxu3 %vm346_vm3, %v1660_v8 }
 0x40a   :  { %v1504_v47 = vpop.f32.mrf.mxu2 }
 0x40b   :  { %v1618_v9 = vadd.f32 %v1617_v30, %v1504_v47 }
 0x40d   :  { %v1645_v10 = vadd.f32 %v6897_v11, %v1618_v9 }
 0x40f   :  { %v1661_v12 = vmax.f32 %v1645_v10, 0.0  ;;  %5702 = vmatmul.msk.f32.gmra.mxu2 %vm346_vm3, %v6797_v53  ;;  %v1629_v35 = vpop.f32.mrf.mxu1 }
 0x411   :  { %5669 = vmatmul.msk.f32.gmra.mxu3 %vm346_vm3, %v1661_v12 }
 0x412   :  { %v1507_v48 = vpop.f32.mrf.mxu2 }
 0x413   :  { %v1621_v46 = vadd.f32 %v1620_v27, %v1507_v48 }
 0x415   :  { %v1646_v15 = vadd.f32 %v6897_v11, %v1621_v46 }
 0x417   :  { %v1662_v17 = vmax.f32 %v1646_v15, 0.0  ;;  %5703 = vmatmul.msk.f32.gmra.mxu2 %vm346_vm3, %v6806_v32  ;;  %v2110_v32 = vld [vmem:[%s8608_s2 + $0x228] sm:$0xff] }
 0x418   :  { %2308 = vmatpush.msra.mxu3 %v2110_v32  ;;  %v2516_v32 = vld [vmem:[%s8608_s2 + $0x2b0] sm:$0xff] }
 0x419   :  { %5670 = vmatmul.msk.f32.gmra.mxu3 %vm346_vm3, %v1662_v17 }
 0x41a   :  { %v1510_v1 = vpop.f32.mrf.mxu2  ;;  %2309 = vmatpush.msra.mxu3 %v2109_v25  ;;  %v2129_v25 = vld [vmem:[%s8608_s2 + $0x240] sm:$0xff] }
 0x41b   :  { %v1624_v19 = vadd.f32 %v1623_v7, %v1510_v1  ;;  %v2519_v7 = vld [vmem:[%s8608_s2 + $0x2c8] sm:$0xff] }
 0x41c   :  { %2580 = vmatpush.msrb.mxu2 %v2519_v7 }
 0x41d   :  { %v1647_v53 = vadd.f32 %v6897_v11, %v1624_v19  ;;  %v2518_v19 = vld [vmem:[%s8608_s2 + $0x2c0] sm:$0xff] }
 0x41e   :  { %2581 = vmatpush.msrb.mxu2 %v2518_v19 }
 0x41f   :  { %v1663_v45 = vmax.f32 %v1647_v53, 0.0  ;;  %5704 = vmatmul.msk.f32.gmra.mxu2 %vm346_vm3, %v6815_v21  ;;  %v1861_v21 = vpop.f32.mrf.mxu0  ;;  %v2517_v53 = vld [vmem:[%s8608_s2 + $0x2b8] sm:$0xff] }
 0x420   :  { %2582 = vmatpush.msrb.mxu2 %v2517_v53 }
 0x421   :  { %5671 = vmatmul.msk.f32.gmra.mxu3 %vm346_vm3, %v1663_v45  ;;  %v2130_v45 = vld [vmem:[%s8608_s2 + $0x248] sm:$0xff] }
 0x422   :  { %v1513_v29 = vpop.f32.mrf.mxu2  ;;  %2195 = vmatpush.msra.mxu1 %v2130_v45  ;;  %2583 = vmatpush.msrb.mxu2 %v2516_v32 }
 0x423   :  { %v1627_v54 = vadd.f32 %v1626_v24, %v1513_v29 }
 0x424   :  { %2196 = vmatpush.msra.mxu1 %v2129_v25 }
 0x425   :  { %v1648_v33 = vadd.f32 %v6897_v11, %v1627_v54 }
 0x427   :  { %v1664_v20 = vmax.f32 %v1648_v33, 0.0  ;;  %5705 = vmatmul.msk.f32.gmra.mxu2 %vm346_vm3, %v6832_v34  ;;  %v1864_v14 = vpop.f32.mrf.mxu0  ;;  %v6979_v34 = vld [vmem:[%s8608_s2 + $0x1d8] ss:$0 sm:$0xff] }
 0x429   :  { %5672 = vmatmul.msk.f32.gmra.mxu3 %vm346_vm3, %v1664_v20 }
 0x42a   :  { %v1516_v36 = vpop.f32.mrf.mxu2 }
 0x42b   :  { %v1630_v63 = vadd.f32 %v1629_v35, %v1516_v36 }
 0x42d   :  { %v1649_v26 = vadd.f32 %v6897_v11, %v1630_v63 }
 0x42f   :  { %v1665_v39 = vmax.f32 %v1649_v26, 0.0  ;;  %v1867_v41 = vpop.f32.mrf.mxu0 }
 0x431   :  { %5673 = vmatmul.msk.f32.gmra.mxu3 %vm346_vm3, %v1665_v39 }
 0x432   :  { %v1971_v16 = vpop.f32.mrf.mxu2 }
 0x433   :  { %v1972_v28 = vadd.f32 %v1971_v16, %v1858_v13 }
 0x437   :  { %v1870_v42 = vpop.f32.mrf.mxu0 }
 0x43a   :  { %v1974_v31 = vpop.f32.mrf.mxu2 }
 0x43b   :  { %v1975_v52 = vadd.f32 %v1974_v31, %v1861_v21 }
 0x43c   :  { %v1737_v43 = vpop.f32.mrf.mxu3 }
 0x43d   :  { %v1738_v11 = vadd.f32 %v6979_v34, %v1737_v43 }
 0x43f   :  { %v6982_v49 = vadd.f32 %v1972_v28, %v1738_v11  ;;  %v1873_v18 = vpop.f32.mrf.mxu0 }
 0x441   :  { %v2093_v44 = vmax.f32 %v6982_v49, 0.0  ;;  %v2035_v43 = vsel %vm346_vm3, %v6982_v49, -inf }
 0x442   :  { %v1977_v50 = vpop.f32.mrf.mxu2 }
 0x443   :  { %5722 = vmatmul.msk.f32.vlgmr.msra.gmra.mxu3 %vm346_vm3, %v2093_v44  ;;  %v1978_v2 = vadd.f32 %v1977_v50, %v1864_v14 }
 0x444   :  { %v1740_v38 = vpop.f32.mrf.mxu3 }
 0x445   :  { %v1741_v56 = vadd.f32 %v6979_v34, %v1740_v38 }
 0x447   :  { %v6987_v57 = vadd.f32 %v1975_v52, %v1741_v56  ;;  %v1876_v6 = vpop.f32.mrf.mxu0 }
 0x449   :  { %v2094_v58 = vmax.f32 %v6987_v57, 0.0  ;;  %v2036_v40 = vsel %vm346_vm3, %v6987_v57, -inf }
 0x44a   :  { %v1980_v59 = vpop.f32.mrf.mxu2 }
 0x44b   :  { %5723 = vmatmul.msk.f32.gmra.mxu3 %vm346_vm3, %v2094_v58  ;;  %v1981_v51 = vadd.f32 %v1980_v59, %v1867_v41 }
 0x44c   :  { %v1743_v60 = vpop.f32.mrf.mxu3 }
 0x44d   :  { %v1744_v62 = vadd.f32 %v6979_v34, %v1743_v60 }
 0x44f   :  { %v6992_v0 = vadd.f32 %v1978_v2, %v1744_v62  ;;  %v1879_v46 = vpop.f32.mrf.mxu0 }
 0x451   :  { %v2095_v61 = vmax.f32 %v6992_v0, 0.0  ;;  %v2037_v11 = vsel %vm346_vm3, %v6992_v0, -inf }
 0x452   :  { %v1983_v3 = vpop.f32.mrf.mxu2 }
 0x453   :  { %5724 = vmatmul.msk.f32.gmra.mxu3 %vm346_vm3, %v2095_v61  ;;  %v1984_v9 = vadd.f32 %v1983_v3, %v1870_v42 }
 0x454   :  { %v1746_v22 = vpop.f32.mrf.mxu3 }
 0x455   :  { %v1747_v30 = vadd.f32 %v6979_v34, %v1746_v22 }
 0x457   :  { %v7000_v55 = vadd.f32 %v1981_v51, %v1747_v30  ;;  %v1882_v33 = vpop.f32.mrf.mxu0 }
 0x459   :  { %v2096_v5 = vmax.f32 %v7000_v55, 0.0  ;;  %v2038_v44 = vsel %vm346_vm3, %v7000_v55, -inf }
 0x45a   :  { %v1986_v8 = vpop.f32.mrf.mxu2 }
 0x45b   :  { %5725 = vmatmul.msk.f32.gmra.mxu3 %vm346_vm3, %v2096_v5  ;;  %v1987_v17 = vadd.f32 %v1986_v8, %v1873_v18 }
 0x45c   :  { %v1749_v47 = vpop.f32.mrf.mxu3 }
 0x45d   :  { %v1750_v27 = vadd.f32 %v6979_v34, %v1749_v47 }
 0x45f   :  { %v7005_v10 = vadd.f32 %v1984_v9, %v1750_v27  ;;  %v1885_v41 = vpop.f32.mrf.mxu0 }
 0x461   :  { %v2097_v12 = vmax.f32 %v7005_v10, 0.0  ;;  %v2039_v14 = vsel %vm346_vm3, %v7005_v10, -inf }
 0x462   :  { %v1989_v48 = vpop.f32.mrf.mxu2  ;;  %v2040_v52 = vmax.f32 %v2035_v43, %v2039_v14 }
 0x463   :  { %5726 = vmatmul.msk.f32.gmra.mxu3 %vm346_vm3, %v2097_v12  ;;  %v1990_v29 = vadd.f32 %v1989_v48, %v1876_v6 }
 0x464   :  { %v1752_v15 = vpop.f32.mrf.mxu3 }
 0x465   :  { %v1753_v1 = vadd.f32 %v6979_v34, %v1752_v15 }
 0x467   :  { %v7016_v37 = vadd.f32 %v1987_v17, %v1753_v1  ;;  %v1888_v51 = vpop.f32.mrf.mxu0 }
 0x469   :  { %v2098_v23 = vmax.f32 %v7016_v37, 0.0  ;;  %v2041_v63 = vsel %vm346_vm3, %v7016_v37, -inf }
 0x46a   :  { %v1992_v13 = vpop.f32.mrf.mxu2  ;;  %v2042_v28 = vmax.f32 %v2036_v40, %v2041_v63 }
 0x46b   :  { %5727 = vmatmul.msk.f32.gmra.mxu3 %vm346_vm3, %v2098_v23  ;;  %v1993_v26 = vadd.f32 %v1992_v13, %v1879_v46 }
 0x46c   :  { %v1755_v24 = vpop.f32.mrf.mxu3  ;;  %v2047_v59 = vmax.f32 %v2040_v52, %v2042_v28 }
 0x46d   :  { %v1756_v54 = vadd.f32 %v6979_v34, %v1755_v24 }
 0x46f   :  { %v7033_v20 = vadd.f32 %v1990_v29, %v1756_v54  ;;  %v1891_v17 = vpop.f32.mrf.mxu0 }
 0x471   :  { %v2099_v21 = vmax.f32 %v7033_v20, 0.0  ;;  %v2043_v16 = vsel %vm346_vm3, %v7033_v20, -inf }
 0x472   :  { %v1995_v35 = vpop.f32.mrf.mxu2  ;;  %v2044_v56 = vmax.f32 %v2037_v11, %v2043_v16 }
 0x473   :  { %5728 = vmatmul.msk.f32.gmra.mxu3 %vm346_vm3, %v2099_v21  ;;  %v1996_v62 = vadd.f32 %v1995_v35, %v1882_v33 }
 0x474   :  { %v1758_v36 = vpop.f32.mrf.mxu3 }
 0x475   :  { %v1759_v39 = vadd.f32 %v6979_v34, %v1758_v36 }
 0x477   :  { %v7046_v31 = vadd.f32 %v1993_v26, %v1759_v39  ;;  %v1894_v54 = vpop.f32.mrf.mxu0 }
 0x479   :  { %v2045_v50 = vsel %vm346_vm3, %v7046_v31, -inf  ;;  %v2100_v38 = vmax.f32 %v7046_v31, 0.0 }
 0x47a   :  { %v2046_v42 = vmax.f32 %v2038_v44, %v2045_v50  ;;  %v1998_v58 = vpop.f32.mrf.mxu2 }
 0x47b   :  { %5729 = vmatmul.msk.f32.gmra.mxu3 %vm346_vm3, %v2100_v38  ;;  %v1999_v47 = vadd.f32 %v1998_v58, %v1885_v41  ;;  %v2515_v58 = vld [vmem:[%s8608_s2 + $0x2a8] sm:$0xff] }
 0x47c   :  { %v2048_v60 = vmax.f32 %v2044_v56, %v2046_v42  ;;  %v1761_v2 = vpop.f32.mrf.mxu3  ;;  %v2396_v42 = vld [vmem:[%s8608_s2 + $0x280] sm:$0xff]  ;;  %2693 = vmatpush.msrb.mxu1 %v2515_v58 }
 0x47d   :  { %v1762_v18 = vadd.f32 %v6979_v34, %v1761_v2  ;;  %2459 = vmatpush.msra.mxu0 %v2396_v42 }
 0x47e   :  { %v2049_v61 = vmax.f32 %v2047_v59, %v2048_v60 }
 0x47f   :  { %v7059_v3 = vadd.f32 %v1996_v62, %v1762_v18  ;;  %v1897_v40 = vpop.f32.mrf.mxu0 }
 0x480   :  { %v2050_v4 = vrot.slane %v2049_v61, 4 }
 0x481   :  { %v2101_v22 = vmax.f32 %v7059_v3, 0.0 }
 0x482   :  { %v2051_v30 = vmax.f32 %v2049_v61, %v2050_v4  ;;  %v2001_v5 = vpop.f32.mrf.mxu2 }
 0x483   :  { %5730 = vmatmul.msk.f32.gmra.mxu3 %vm346_vm3, %v2101_v22  ;;  %v2002_v53 = vadd.f32 %v2001_v5, %v1888_v51 }
 0x484   :  { %v2052_v6 = vrot.slane %v2051_v30, 2  ;;  %v1764_v8 = vpop.f32.mrf.mxu3 }
 0x485   :  { %v1765_v9 = vadd.f32 %v6979_v34, %v1764_v8  ;;  %v2056_v8 = vsel %vm346_vm3, %v7059_v3, -inf }
 0x486   :  { %v2053_v27 = vmax.f32 %v2051_v30, %v2052_v6 }
 0x487   :  { %v7064_v12 = vadd.f32 %v1999_v47, %v1765_v9  ;;  %v1900_v50 = vpop.f32.mrf.mxu0 }
 0x488   :  { %v2054_v48 = vrot.slane %v2053_v27, 1 }
 0x489   :  { %v2102_v46 = vmax.f32 %v7064_v12, 0.0  ;;  %v2057_v51 = vsel %vm346_vm3, %v7064_v12, -inf }
 0x48a   :  { %v7067_v15 = vmax.f32 %v2053_v27, %v2054_v48  ;;  %v2004_v7 = vpop.f32.mrf.mxu2 }
 0x48b   :  { %5731 = vmatmul.msk.f32.gmra.mxu3 %vm346_vm3, %v2102_v46  ;;  %v2005_v25 = vadd.f32 %v2004_v7, %v1891_v17 }
 0x48c   :  { %v1767_v1 = vpop.f32.mrf.mxu3  ;;  %5754 = vmatmul.msk.f32.vlgmr.msrb.gmra.mxu2 %vm346_vm3, %v7067_v15  ;;  %v7073_v19 = vmax.f32 %v7067_v15, 0.0 }
 0x48d   :  { %v1768_v23 = vadd.f32 %v6979_v34, %v1767_v1 }
 0x48e   :  { %5706 = vmatmul.msk.f32.vlgmr.msra.gmra.mxu1 %vm346_vm3, %v7073_v19 }
 0x48f   :  { %v7078_v13 = vadd.f32 %v2002_v53, %v1768_v23  ;;  %v1903_v62 = vpop.f32.mrf.mxu0 }
 0x491   :  { %v2103_v45 = vmax.f32 %v7078_v13, 0.0 }
 0x492   :  { %v2007_v32 = vpop.f32.mrf.mxu2 }
 0x493   :  { %5732 = vmatmul.msk.f32.gmra.mxu3 %vm346_vm3, %v2103_v45  ;;  %v2008_v36 = vadd.f32 %v2007_v32, %v1894_v54 }
 0x494   :  { %v1770_v24 = vpop.f32.mrf.mxu3  ;;  %5755 = vmatmul.msk.f32.gmra.mxu2 %vm346_vm3, %v7067_v15 }
 0x495   :  { %v1771_v29 = vadd.f32 %v6979_v34, %v1770_v24 }
 0x496   :  { %5707 = vmatmul.msk.f32.gmra.mxu1 %vm346_vm3, %v7073_v19 }
 0x497   :  { %v7087_v33 = vadd.f32 %v2005_v25, %v1771_v29 }
 0x499   :  { %v2104_v21 = vmax.f32 %v7087_v33, 0.0  ;;  %v2059_v9 = vsel %vm346_vm3, %v7087_v33, -inf }
 0x49a   :  { %v2010_v26 = vpop.f32.mrf.mxu2 }
 0x49b   :  { %5733 = vmatmul.msk.f32.gmra.mxu3 %vm346_vm3, %v2104_v21  ;;  %v2011_v41 = vadd.f32 %v2010_v26, %v1897_v40  ;;  %v2394_v26 = vld [vmem:[%s8608_s2 + $0x270] sm:$0xff]  ;;  %v2393_v40 = vld [vmem:[%s8608_s2 + $0x268] sm:$0xff] }
 0x49c   :  { %v1773_v35 = vpop.f32.mrf.mxu3  ;;  %5756 = vmatmul.msk.f32.gmra.mxu2 %vm346_vm3, %v7067_v15 }
 0x49d   :  { %v1774_v63 = vadd.f32 %v6979_v34, %v1773_v35  ;;  %v2395_v35 = vld [vmem:[%s8608_s2 + $0x278] sm:$0xff] }
 0x49e   :  { %5708 = vmatmul.msk.f32.gmra.mxu1 %vm346_vm3, %v7073_v19  ;;  %2460 = vmatpush.msra.mxu0 %v2395_v35 }
 0x49f   :  { %v7096_v39 = vadd.f32 %v2008_v36, %v1774_v63  ;;  %v2514_v36 = vld [vmem:[%s8608_s2 + $0x2a0] sm:$0xff] }
 0x4a0   :  { %2694 = vmatpush.msrb.mxu1 %v2514_v36  ;;  %2461 = vmatpush.msra.mxu0 %v2394_v26 }
 0x4a1   :  { %v2105_v14 = vmax.f32 %v7096_v39, 0.0  ;;  %v2060_v30 = vsel %vm346_vm3, %v7096_v39, -inf }
 0x4a2   :  { %v2013_v11 = vpop.f32.mrf.mxu2  ;;  %v2061_v46 = vmax.f32 %v2056_v8, %v2060_v30  ;;  %2462 = vmatpush.msra.mxu0 %v2393_v40 }
 0x4a3   :  { %5734 = vmatmul.msk.f32.gmra.mxu3 %vm346_vm3, %v2105_v14  ;;  %v2014_v52 = vadd.f32 %v2013_v11, %v1900_v50 }
 0x4a4   :  { %v1776_v16 = vpop.f32.mrf.mxu3  ;;  %5757 = vmatmul.msk.f32.gmra.mxu2 %vm346_vm3, %v7067_v15 }
 0x4a5   :  { %v1777_v43 = vadd.f32 %v6979_v34, %v1776_v16 }
 0x4a6   :  { %5709 = vmatmul.msk.f32.gmra.mxu1 %vm346_vm3, %v7073_v19 }
 0x4a7   :  { %v7105_v28 = vadd.f32 %v2011_v41, %v1777_v43  ;;  %v7194_v41 = vld [vmem:[%s8608_s2 + $0x260] ss:$0 sm:$0xff] }
 0x4a9   :  { %v2106_v44 = vmax.f32 %v7105_v28, 0.0  ;;  %v2062_v61 = vsel %vm346_vm3, %v7105_v28, -inf }
 0x4aa   :  { %v2016_v2 = vpop.f32.mrf.mxu2  ;;  %v2063_v47 = vmax.f32 %v2057_v51, %v2062_v61 }
 0x4ab   :  { %5735 = vmatmul.msk.f32.gmra.mxu3 %vm346_vm3, %v2106_v44  ;;  %v2017_v4 = vadd.f32 %v2016_v2, %v1903_v62 }
 0x4ac   :  { %v1779_v38 = vpop.f32.mrf.mxu3  ;;  %5758 = vmatmul.msk.f32.gmra.mxu2 %vm346_vm3, %v7067_v15  ;;  %v2068_v1 = vmax.f32 %v2061_v46, %v2063_v47 }
 0x4ad   :  { %v1780_v56 = vadd.f32 %v6979_v34, %v1779_v38 }
 0x4ae   :  { %5710 = vmatmul.msk.f32.gmra.mxu1 %vm346_vm3, %v7073_v19 }
 0x4af   :  { %v7120_v59 = vadd.f32 %v2014_v52, %v1780_v56 }
 0x4b1   :  { %v2107_v60 = vmax.f32 %v7120_v59, 0.0  ;;  %v2064_v5 = vsel %vm346_vm3, %v7120_v59, -inf }
 0x4b3   :  { %5736 = vmatmul.msk.f32.gmra.mxu3 %vm346_vm3, %v2107_v60 }
 0x4b4   :  { %v1782_v18 = vpop.f32.mrf.mxu3  ;;  %5759 = vmatmul.msk.f32.gmra.mxu2 %vm346_vm3, %v7067_v15 }
 0x4b5   :  { %v1783_v22 = vadd.f32 %v6979_v34, %v1782_v18  ;;  %v2058_v34 = vsel %vm346_vm3, %v7078_v13, -inf }
 0x4b6   :  { %5711 = vmatmul.msk.f32.gmra.mxu1 %vm346_vm3, %v7073_v19  ;;  %v2065_v7 = vmax.f32 %v2058_v34, %v2064_v5 }
 0x4b7   :  { %v7137_v6 = vadd.f32 %v2017_v4, %v1783_v22 }
 0x4b9   :  { %v2066_v27 = vsel %vm346_vm3, %v7137_v6, -inf  ;;  %v2108_v48 = vmax.f32 %v7137_v6, 0.0 }
 0x4ba   :  { %v2067_v17 = vmax.f32 %v2059_v9, %v2066_v27 }
 0x4bb   :  { %5737 = vmatmul.msk.f32.gmra.mxu3 %vm346_vm3, %v2108_v48 }
 0x4bc   :  { %v2069_v53 = vmax.f32 %v2065_v7, %v2067_v17  ;;  %5760 = vmatmul.msk.f32.gmra.mxu2 %vm346_vm3, %v7067_v15 }
 0x4be   :  { %v2070_v23 = vmax.f32 %v2068_v1, %v2069_v53  ;;  %5712 = vmatmul.msk.f32.gmra.mxu1 %vm346_vm3, %v7073_v19 }
 0x4c0   :  { %v2071_v45 = vrot.slane %v2070_v23, 4 }
 0x4c2   :  { %v2072_v32 = vmax.f32 %v2070_v23, %v2071_v45 }
 0x4c4   :  { %v2073_v24 = vrot.slane %v2072_v32, 2  ;;  %5761 = vmatmul.msk.f32.gmra.mxu2 %vm346_vm3, %v7067_v15  ;;  %v2513_v15 = vld [vmem:[%s8608_s2 + $0x298] sm:$0xff] }
 0x4c5   :  { %2695 = vmatpush.msrb.mxu1 %v2513_v15 }
 0x4c6   :  { %v2074_v25 = vmax.f32 %v2072_v32, %v2073_v24  ;;  %5713 = vmatmul.msk.f32.gmra.mxu1 %vm346_vm3, %v7073_v19  ;;  %v2512_v19 = vld [vmem:[%s8608_s2 + $0x290] sm:$0xff]  ;;  %v2311_v63 = vpop.f32.mrf.mxu3 }
 0x4c7   :  { %2696 = vmatpush.msrb.mxu1 %v2512_v19 }
 0x4c8   :  { %v2075_v29 = vrot.slane %v2074_v25, 1 }
 0x4ca   :  { %v2076_v54 = vmax.f32 %v2074_v25, %v2075_v29 }
 0x4cc   :  { %5762 = vmatmul.msk.f32.gmra.mxu2 %vm346_vm3, %v2076_v54  ;;  %v2121_v21 = vmax.f32 %v2076_v54, 0.0 }
 0x4ce   :  { %5714 = vmatmul.msk.f32.gmra.mxu1 %vm346_vm3, %v2121_v21  ;;  %v2314_v14 = vpop.f32.mrf.mxu3 }
 0x4d4   :  { %5763 = vmatmul.msk.f32.gmra.mxu2 %vm346_vm3, %v2076_v54 }
 0x4d6   :  { %5715 = vmatmul.msk.f32.gmra.mxu1 %vm346_vm3, %v2121_v21  ;;  %v2317_v16 = vpop.f32.mrf.mxu3 }
 0x4dc   :  { %5764 = vmatmul.msk.f32.gmra.mxu2 %vm346_vm3, %v2076_v54 }
 0x4de   :  { %5716 = vmatmul.msk.f32.gmra.mxu1 %vm346_vm3, %v2121_v21  ;;  %v2320_v43 = vpop.f32.mrf.mxu3 }
 0x4e4   :  { %5765 = vmatmul.msk.f32.gmra.mxu2 %vm346_vm3, %v2076_v54 }
 0x4e6   :  { %5717 = vmatmul.msk.f32.gmra.mxu1 %vm346_vm3, %v2121_v21  ;;  %v2323_v42 = vpop.f32.mrf.mxu3 }
 0x4ec   :  { %5766 = vmatmul.msk.f32.gmra.mxu2 %vm346_vm3, %v2076_v54 }
 0x4ee   :  { %5718 = vmatmul.msk.f32.gmra.mxu1 %vm346_vm3, %v2121_v21 }
 0x4f4   :  { %5767 = vmatmul.msk.f32.gmra.mxu2 %vm346_vm3, %v2076_v54 }
 0x4f6   :  { %5719 = vmatmul.msk.f32.gmra.mxu1 %vm346_vm3, %v2121_v21 }
 0x4fc   :  { %5768 = vmatmul.msk.f32.gmra.mxu2 %vm346_vm3, %v2076_v54 }
 0x4fe   :  { %5720 = vmatmul.msk.f32.gmra.mxu1 %vm346_vm3, %v2121_v21 }
 0x504   :  { %5769 = vmatmul.msk.f32.gmra.mxu2 %vm346_vm3, %v2076_v54 }
 0x506   :  { %5721 = vmatmul.msk.f32.gmra.mxu1 %vm346_vm3, %v2121_v21 }
 0x50b   :  { %v2198_v11 = vpop.f32.mrf.mxu1 }
 0x50c   :  { %v2312_v44 = vadd.f32 %v2311_v63, %v2198_v11 }
 0x50e   :  { %v2361_v50 = vadd.f32 %v7194_v41, %v2312_v44  ;;  %5770 = vmatmul.msk.f32.vlgmr.msrb.gmra.mxu1 %vm346_vm3, %v6982_v49  ;;  %v2326_v49 = vpop.f32.mrf.mxu3 }
 0x510   :  { %v2377_v38 = vmax.f32 %v2361_v50, 0.0 }
 0x512   :  { %5738 = vmatmul.msk.f32.vlgmr.msra.gmra.mxu0 %vm346_vm3, %v2377_v38 }
 0x513   :  { %v2201_v52 = vpop.f32.mrf.mxu1 }
 0x514   :  { %v2315_v56 = vadd.f32 %v2314_v14, %v2201_v52 }
 0x516   :  { %v2362_v58 = vadd.f32 %v7194_v41, %v2315_v56  ;;  %5771 = vmatmul.msk.f32.gmra.mxu1 %vm346_vm3, %v6987_v57  ;;  %v2329_v30 = vpop.f32.mrf.mxu3  ;;  %v2585_v56 = vpop.f32.mrf.mxu2 }
 0x518   :  { %v2378_v60 = vmax.f32 %v2362_v58, 0.0 }
 0x51a   :  { %5739 = vmatmul.msk.f32.gmra.mxu0 %vm346_vm3, %v2378_v60  ;;  %v2836_v60 = vld [vmem:[%s8608_s2 + $0x2d0] sm:$0xff] }
 0x51b   :  { %v2204_v2 = vpop.f32.mrf.mxu1 }
 0x51c   :  { %v2318_v62 = vadd.f32 %v2317_v16, %v2204_v2 }
 0x51e   :  { %v2363_v18 = vadd.f32 %v7194_v41, %v2318_v62  ;;  %5772 = vmatmul.msk.f32.gmra.mxu1 %vm346_vm3, %v6992_v0  ;;  %v2332_v34 = vpop.f32.mrf.mxu3 }
 0x520   :  { %v2379_v61 = vmax.f32 %v2363_v18, 0.0 }
 0x522   :  { %5740 = vmatmul.msk.f32.gmra.mxu0 %vm346_vm3, %v2379_v61 }
 0x523   :  { %v2207_v4 = vpop.f32.mrf.mxu1 }
 0x524   :  { %v2321_v22 = vadd.f32 %v2320_v43, %v2207_v4 }
 0x526   :  { %v2364_v51 = vadd.f32 %v7194_v41, %v2321_v22  ;;  %5773 = vmatmul.msk.f32.gmra.mxu1 %vm346_vm3, %v7000_v55  ;;  %v2335_v17 = vpop.f32.mrf.mxu3 }
 0x528   :  { %v2380_v57 = vmax.f32 %v2364_v51, 0.0 }
 0x52a   :  { %5741 = vmatmul.msk.f32.gmra.mxu0 %vm346_vm3, %v2380_v57 }
 0x52b   :  { %v2210_v5 = vpop.f32.mrf.mxu1 }
 0x52c   :  { %v2324_v8 = vadd.f32 %v2323_v42, %v2210_v5  ;;  %v2837_v42 = vld [vmem:[%s8608_s2 + $0x2d8] sm:$0xff] }
 0x52e   :  { %v2365_v47 = vadd.f32 %v7194_v41, %v2324_v8  ;;  %5774 = vmatmul.msk.f32.gmra.mxu1 %vm346_vm3, %v7005_v10 }
 0x530   :  { %v2381_v0 = vmax.f32 %v2365_v47, 0.0 }
 0x532   :  { %5742 = vmatmul.msk.f32.gmra.mxu0 %vm346_vm3, %v2381_v0 }
 0x533   :  { %v2213_v9 = vpop.f32.mrf.mxu1 }
 0x534   :  { %v2327_v27 = vadd.f32 %v2326_v49, %v2213_v9  ;;  %v2588_v49 = vpop.f32.mrf.mxu2 }
 0x536   :  { %v2366_v48 = vadd.f32 %v7194_v41, %v2327_v27  ;;  %5775 = vmatmul.msk.f32.gmra.mxu1 %vm346_vm3, %v7016_v37  ;;  %v2338_v37 = vpop.f32.mrf.mxu3 }
 0x538   :  { %v2382_v55 = vmax.f32 %v2366_v48, 0.0 }
 0x53a   :  { %5743 = vmatmul.msk.f32.gmra.mxu0 %vm346_vm3, %v2382_v55 }
 0x53b   :  { %v2216_v46 = vpop.f32.mrf.mxu1 }
 0x53c   :  { %v2330_v7 = vadd.f32 %v2329_v30, %v2216_v46  ;;  %v2591_v8 = vpop.f32.mrf.mxu2 }
 0x53e   :  { %v2367_v1 = vadd.f32 %v7194_v41, %v2330_v7  ;;  %5776 = vmatmul.msk.f32.gmra.mxu1 %vm346_vm3, %v7033_v20  ;;  %v2341_v54 = vpop.f32.mrf.mxu3 }
 0x540   :  { %v2383_v10 = vmax.f32 %v2367_v1, 0.0 }
 0x542   :  { %5744 = vmatmul.msk.f32.gmra.mxu0 %vm346_vm3, %v2383_v10 }
 0x543   :  { %v2219_v53 = vpop.f32.mrf.mxu1 }
 0x544   :  { %v2333_v23 = vadd.f32 %v2332_v34, %v2219_v53  ;;  %v7278_v34 = vld [vmem:[%s8608_s2 + $0x288] ss:$0 sm:$0xff]  ;;  %v2594_v9 = vpop.f32.mrf.mxu2 }
 0x546   :  { %v2368_v45 = vadd.f32 %v7194_v41, %v2333_v23  ;;  %5777 = vmatmul.msk.f32.gmra.mxu1 %vm346_vm3, %v7046_v31  ;;  %v2344_v15 = vpop.f32.mrf.mxu3 }
 0x548   :  { %v2384_v32 = vmax.f32 %v2368_v45, 0.0 }
 0x54a   :  { %5745 = vmatmul.msk.f32.gmra.mxu0 %vm346_vm3, %v2384_v32 }
 0x54b   :  { %v2222_v24 = vpop.f32.mrf.mxu1 }
 0x54c   :  { %v2336_v25 = vadd.f32 %v2335_v17, %v2222_v24  ;;  %v2597_v10 = vpop.f32.mrf.mxu2 }
 0x54e   :  { %v2369_v29 = vadd.f32 %v7194_v41, %v2336_v25  ;;  %5778 = vmatmul.msk.f32.gmra.mxu1 %vm346_vm3, %v7059_v3  ;;  %v2347_v16 = vpop.f32.mrf.mxu3 }
 0x550   :  { %v2385_v20 = vmax.f32 %v2369_v29, 0.0 }
 0x552   :  { %5746 = vmatmul.msk.f32.gmra.mxu0 %vm346_vm3, %v2385_v20 }
 0x553   :  { %v2225_v21 = vpop.f32.mrf.mxu1 }
 0x554   :  { %v2339_v35 = vadd.f32 %v2338_v37, %v2225_v21  ;;  %v2600_v29 = vpop.f32.mrf.mxu2  ;;  %v2858_v21 = vld [vmem:[%s8608_s2 + $0x300] sm:$0xff] }
 0x556   :  { %v2370_v36 = vadd.f32 %v7194_v41, %v2339_v35  ;;  %5779 = vmatmul.msk.f32.gmra.mxu1 %vm346_vm3, %v7064_v12  ;;  %v2350_v38 = vpop.f32.mrf.mxu3 }
 0x558   :  { %v2386_v31 = vmax.f32 %v2370_v36, 0.0 }
 0x55a   :  { %5747 = vmatmul.msk.f32.gmra.mxu0 %vm346_vm3, %v2386_v31 }
 0x55b   :  { %v2228_v19 = vpop.f32.mrf.mxu1 }
 0x55c   :  { %v2342_v63 = vadd.f32 %v2341_v54, %v2228_v19 }
 0x55e   :  { %v2371_v26 = vadd.f32 %v7194_v41, %v2342_v63  ;;  %5780 = vmatmul.msk.f32.gmra.mxu1 %vm346_vm3, %v7078_v13  ;;  %v2839_v13 = vld [vmem:[%s8608_s2 + $0x2e8] sm:$0xff]  ;;  %v2353_v18 = vpop.f32.mrf.mxu3 }
 0x55f   :  { %3033 = vmatpush.msrb.mxu0 %v2839_v13 }
 0x560   :  { %v2387_v3 = vmax.f32 %v2371_v26, 0.0  ;;  %v2603_v26 = vpop.f32.mrf.mxu2 }
 0x562   :  { %5748 = vmatmul.msk.f32.gmra.mxu0 %vm346_vm3, %v2387_v3 }
 0x563   :  { %v2231_v40 = vpop.f32.mrf.mxu1 }
 0x564   :  { %v2345_v14 = vadd.f32 %v2344_v15, %v2231_v40 }
 0x566   :  { %v2372_v43 = vadd.f32 %v7194_v41, %v2345_v14  ;;  %5781 = vmatmul.msk.f32.gmra.mxu1 %vm346_vm3, %v7087_v33  ;;  %v2838_v33 = vld [vmem:[%s8608_s2 + $0x2e0] sm:$0xff]  ;;  %v2356_v57 = vpop.f32.mrf.mxu3 }
 0x567   :  { %3034 = vmatpush.msrb.mxu0 %v2838_v33 }
 0x568   :  { %v2388_v12 = vmax.f32 %v2372_v43, 0.0 }
 0x569   :  { %3035 = vmatpush.msrb.mxu0 %v2837_v42  ;;  %v3244_v42 = vld [vmem:[%s8608_s2 + $0x368] sm:$0xff] }
 0x56a   :  { %5749 = vmatmul.msk.f32.gmra.mxu0 %vm346_vm3, %v2388_v12 }
 0x56b   :  { %v2234_v11 = vpop.f32.mrf.mxu1  ;;  %3036 = vmatpush.msrb.mxu0 %v2836_v60  ;;  %v3243_v60 = vld [vmem:[%s8608_s2 + $0x360] sm:$0xff] }
 0x56c   :  { %v2348_v44 = vadd.f32 %v2347_v16, %v2234_v11  ;;  %v2606_v11 = vpop.f32.mrf.mxu2 }
 0x56e   :  { %v2373_v50 = vadd.f32 %v7194_v41, %v2348_v44  ;;  %5782 = vmatmul.msk.f32.gmra.mxu1 %vm346_vm3, %v7096_v39 }
 0x570   :  { %v2389_v52 = vmax.f32 %v2373_v50, 0.0  ;;  %v3246_v50 = vld [vmem:[%s8608_s2 + $0x378] sm:$0xff] }
 0x571   :  { %3307 = vmatpush.msra.mxu1 %v3246_v50 }
 0x572   :  { %5750 = vmatmul.msk.f32.gmra.mxu0 %vm346_vm3, %v2389_v52  ;;  %v3245_v52 = vld [vmem:[%s8608_s2 + $0x370] sm:$0xff] }
 0x573   :  { %v2237_v39 = vpop.f32.mrf.mxu1  ;;  %3308 = vmatpush.msra.mxu1 %v3245_v52 }
 0x574   :  { %v2351_v58 = vadd.f32 %v2350_v38, %v2237_v39 }
 0x575   :  { %3309 = vmatpush.msra.mxu1 %v3244_v42 }
 0x576   :  { %v2374_v2 = vadd.f32 %v7194_v41, %v2351_v58  ;;  %5783 = vmatmul.msk.f32.gmra.mxu1 %vm346_vm3, %v7105_v28  ;;  %v2859_v28 = vld [vmem:[%s8608_s2 + $0x308] sm:$0xff]  ;;  %v2857_v58 = vld [vmem:[%s8608_s2 + $0x2f8] sm:$0xff] }
 0x577   :  { %2920 = vmatpush.msrb.mxu3 %v2859_v28  ;;  %3310 = vmatpush.msra.mxu1 %v3243_v60 }
 0x578   :  { %v2390_v62 = vmax.f32 %v2374_v2, 0.0 }
 0x579   :  { %2921 = vmatpush.msrb.mxu3 %v2858_v21 }
 0x57a   :  { %5751 = vmatmul.msk.f32.gmra.mxu0 %vm346_vm3, %v2390_v62  ;;  %v2856_v62 = vld [vmem:[%s8608_s2 + $0x2f0] sm:$0xff] }
 0x57b   :  { %v2240_v61 = vpop.f32.mrf.mxu1  ;;  %2922 = vmatpush.msrb.mxu3 %v2857_v58 }
 0x57c   :  { %v2354_v4 = vadd.f32 %v2353_v18, %v2240_v61  ;;  %v2609_v61 = vpop.f32.mrf.mxu2 }
 0x57d   :  { %2923 = vmatpush.msrb.mxu3 %v2856_v62 }
 0x57e   :  { %v2375_v22 = vadd.f32 %v7194_v41, %v2354_v4  ;;  %5784 = vmatmul.msk.f32.gmra.mxu1 %vm346_vm3, %v7120_v59 }
 0x580   :  { %v2391_v51 = vmax.f32 %v2375_v22, 0.0 }
 0x582   :  { %5752 = vmatmul.msk.f32.gmra.mxu0 %vm346_vm3, %v2391_v51 }
 0x583   :  { %v2243_v30 = vpop.f32.mrf.mxu1 }
 0x584   :  { %v2357_v5 = vadd.f32 %v2356_v57, %v2243_v30 }
 0x586   :  { %v2376_v47 = vadd.f32 %v7194_v41, %v2357_v5  ;;  %5785 = vmatmul.msk.f32.gmra.mxu1 %vm346_vm3, %v7137_v6 }
 0x588   :  { %v2392_v0 = vmax.f32 %v2376_v47, 0.0 }
 0x58a   :  { %5753 = vmatmul.msk.f32.gmra.mxu0 %vm346_vm3, %v2392_v0 }
 0x58b   :  { %v2698_v59 = vpop.f32.mrf.mxu1 }
 0x58c   :  { %v2699_v48 = vadd.f32 %v2698_v59, %v2585_v56 }
 0x58f   :  { %v2464_v27 = vpop.f32.mrf.mxu0 }
 0x590   :  { %v2465_v55 = vadd.f32 %v7278_v34, %v2464_v27 }
 0x592   :  { %v7281_v46 = vadd.f32 %v2699_v48, %v2465_v55 }
 0x593   :  { %v2701_v41 = vpop.f32.mrf.mxu1 }
 0x594   :  { %v2820_v7 = vmax.f32 %v7281_v46, 0.0  ;;  %v2702_v17 = vadd.f32 %v2701_v41, %v2588_v49  ;;  %v2762_v27 = vsel %vm346_vm3, %v7281_v46, -inf }
 0x596   :  { %5802 = vmatmul.msk.f32.vlgmr.msrb.gmra.mxu0 %vm346_vm3, %v2820_v7 }
 0x597   :  { %v2467_v6 = vpop.f32.mrf.mxu0 }
 0x598   :  { %v2468_v1 = vadd.f32 %v7278_v34, %v2467_v6 }
 0x59a   :  { %v7286_v53 = vadd.f32 %v2702_v17, %v2468_v1 }
 0x59b   :  { %v2704_v23 = vpop.f32.mrf.mxu1 }
 0x59c   :  { %v2821_v45 = vmax.f32 %v7286_v53, 0.0  ;;  %v2705_v32 = vadd.f32 %v2704_v23, %v2591_v8  ;;  %v2763_v8 = vsel %vm346_vm3, %v7286_v53, -inf }
 0x59e   :  { %5803 = vmatmul.msk.f32.gmra.mxu0 %vm346_vm3, %v2821_v45 }
 0x59f   :  { %v2470_v37 = vpop.f32.mrf.mxu0 }
 0x5a0   :  { %v2471_v24 = vadd.f32 %v7278_v34, %v2470_v37 }
 0x5a2   :  { %v7291_v25 = vadd.f32 %v2705_v32, %v2471_v24 }
 0x5a3   :  { %v2707_v20 = vpop.f32.mrf.mxu1 }
 0x5a4   :  { %v2822_v54 = vmax.f32 %v7291_v25, 0.0  ;;  %v2708_v36 = vadd.f32 %v2707_v20, %v2594_v9  ;;  %v2612_v9 = vpop.f32.mrf.mxu2  ;;  %v2764_v41 = vsel %vm346_vm3, %v7291_v25, -inf }
 0x5a6   :  { %5804 = vmatmul.msk.f32.gmra.mxu0 %vm346_vm3, %v2822_v54 }
 0x5a7   :  { %v2473_v35 = vpop.f32.mrf.mxu0 }
 0x5a8   :  { %v2474_v31 = vadd.f32 %v7278_v34, %v2473_v35 }
 0x5aa   :  { %v7299_v15 = vadd.f32 %v2708_v36, %v2474_v31 }
 0x5ab   :  { %v2710_v19 = vpop.f32.mrf.mxu1 }
 0x5ac   :  { %v2823_v63 = vmax.f32 %v7299_v15, 0.0  ;;  %v2711_v40 = vadd.f32 %v2710_v19, %v2597_v10  ;;  %v2765_v7 = vsel %vm346_vm3, %v7299_v15, -inf  ;;  %v2615_v31 = vpop.f32.mrf.mxu2 }
 0x5ae   :  { %5805 = vmatmul.msk.f32.gmra.mxu0 %vm346_vm3, %v2823_v63 }
 0x5af   :  { %v2476_v3 = vpop.f32.mrf.mxu0 }
 0x5b0   :  { %v2477_v14 = vadd.f32 %v7278_v34, %v2476_v3 }
 0x5b2   :  { %v7304_v16 = vadd.f32 %v2711_v40, %v2477_v14 }
 0x5b3   :  { %v2713_v43 = vpop.f32.mrf.mxu1 }
 0x5b4   :  { %v2824_v12 = vmax.f32 %v7304_v16, 0.0  ;;  %v2714_v13 = vadd.f32 %v2713_v43, %v2600_v29  ;;  %v2766_v47 = vsel %vm346_vm3, %v7304_v16, -inf }
 0x5b5   :  { %v2767_v1 = vmax.f32 %v2762_v27, %v2766_v47 }
 0x5b6   :  { %5806 = vmatmul.msk.f32.gmra.mxu0 %vm346_vm3, %v2824_v12 }
 0x5b7   :  { %v2479_v44 = vpop.f32.mrf.mxu0 }
 0x5b8   :  { %v2480_v38 = vadd.f32 %v7278_v34, %v2479_v44 }
 0x5ba   :  { %v7315_v33 = vadd.f32 %v2714_v13, %v2480_v38  ;;  %v2618_v13 = vpop.f32.mrf.mxu2 }
 0x5bb   :  { %v2716_v56 = vpop.f32.mrf.mxu1 }
 0x5bc   :  { %v2825_v39 = vmax.f32 %v7315_v33, 0.0  ;;  %v2717_v18 = vadd.f32 %v2716_v56, %v2603_v26  ;;  %v2768_v30 = vsel %vm346_vm3, %v7315_v33, -inf }
 0x5bd   :  { %v2769_v48 = vmax.f32 %v2763_v8, %v2768_v30 }
 0x5be   :  { %5807 = vmatmul.msk.f32.gmra.mxu0 %vm346_vm3, %v2825_v39 }
 0x5bf   :  { %v2482_v2 = vpop.f32.mrf.mxu0  ;;  %v2774_v45 = vmax.f32 %v2767_v1, %v2769_v48 }
 0x5c0   :  { %v2483_v49 = vadd.f32 %v7278_v34, %v2482_v2 }
 0x5c2   :  { %v7332_v4 = vadd.f32 %v2717_v18, %v2483_v49  ;;  %v2621_v49 = vpop.f32.mrf.mxu2 }
 0x5c3   :  { %v2719_v22 = vpop.f32.mrf.mxu1 }
 0x5c4   :  { %v2826_v51 = vmax.f32 %v7332_v4, 0.0  ;;  %v2720_v5 = vadd.f32 %v2719_v22, %v2606_v11  ;;  %v2770_v0 = vsel %vm346_vm3, %v7332_v4, -inf }
 0x5c5   :  { %v2771_v10 = vmax.f32 %v2764_v41, %v2770_v0 }
 0x5c6   :  { %5808 = vmatmul.msk.f32.gmra.mxu0 %vm346_vm3, %v2826_v51 }
 0x5c7   :  { %v2485_v57 = vpop.f32.mrf.mxu0 }
 0x5c8   :  { %v2486_v28 = vadd.f32 %v7278_v34, %v2485_v57 }
 0x5ca   :  { %v7345_v59 = vadd.f32 %v2720_v5, %v2486_v28  ;;  %v2624_v8 = vpop.f32.mrf.mxu2 }
 0x5cb   :  { %v2722_v55 = vpop.f32.mrf.mxu1 }
 0x5cc   :  { %v2772_v6 = vsel %vm346_vm3, %v7345_v59, -inf  ;;  %v2827_v17 = vmax.f32 %v7345_v59, 0.0  ;;  %v2723_v24 = vadd.f32 %v2722_v55, %v2609_v61 }
 0x5cd   :  { %v2773_v23 = vmax.f32 %v2765_v7, %v2772_v6 }
 0x5ce   :  { %5809 = vmatmul.msk.f32.gmra.mxu0 %vm346_vm3, %v2827_v17 }
 0x5cf   :  { %v2775_v37 = vmax.f32 %v2771_v10, %v2773_v23  ;;  %v2488_v32 = vpop.f32.mrf.mxu0 }
 0x5d0   :  { %v2489_v29 = vadd.f32 %v7278_v34, %v2488_v32 }
 0x5d1   :  { %v2776_v20 = vmax.f32 %v2774_v45, %v2775_v37 }
 0x5d2   :  { %v7358_v54 = vadd.f32 %v2723_v24, %v2489_v29  ;;  %v2627_v6 = vpop.f32.mrf.mxu2 }
 0x5d3   :  { %v2777_v21 = vrot.slane %v2776_v20, 4  ;;  %v2725_v35 = vpop.f32.mrf.mxu1 }
 0x5d4   :  { %v2828_v36 = vmax.f32 %v7358_v54, 0.0  ;;  %v2726_v3 = vadd.f32 %v2725_v35, %v2612_v9 }
 0x5d5   :  { %v2778_v19 = vmax.f32 %v2776_v20, %v2777_v21 }
 0x5d6   :  { %5810 = vmatmul.msk.f32.gmra.mxu0 %vm346_vm3, %v2828_v36 }
 0x5d7   :  { %v2779_v63 = vrot.slane %v2778_v19, 2  ;;  %v2491_v26 = vpop.f32.mrf.mxu0 }
 0x5d8   :  { %v2492_v40 = vadd.f32 %v7278_v34, %v2491_v26 }
 0x5d9   :  { %v2780_v14 = vmax.f32 %v2778_v19, %v2779_v63  ;;  %v2783_v63 = vsel %vm346_vm3, %v7358_v54, -inf }
 0x5da   :  { %v7363_v43 = vadd.f32 %v2726_v3, %v2492_v40  ;;  %v2630_v32 = vpop.f32.mrf.mxu2  ;;  %v3242_v3 = vld [vmem:[%s8608_s2 + $0x358] sm:$0xff] }
 0x5db   :  { %v2781_v12 = vrot.slane %v2780_v14, 1  ;;  %v2728_v11 = vpop.f32.mrf.mxu1  ;;  %3420 = vmatpush.msra.mxu3 %v3242_v3 }
 0x5dc   :  { %v2829_v44 = vmax.f32 %v7363_v43, 0.0  ;;  %v2729_v56 = vadd.f32 %v2728_v11, %v2615_v31  ;;  %v2784_v35 = vsel %vm346_vm3, %v7363_v43, -inf }
 0x5dd   :  { %v7366_v50 = vmax.f32 %v2780_v14, %v2781_v12 }
 0x5de   :  { %5811 = vmatmul.msk.f32.gmra.mxu0 %vm346_vm3, %v2829_v44 }
 0x5df   :  { %v2494_v38 = vpop.f32.mrf.mxu0  ;;  %5834 = vmatmul.msk.f32.vlgmr.msra.gmra.mxu1 %vm346_vm3, %v7366_v50  ;;  %v7372_v52 = vmax.f32 %v7366_v50, 0.0 }
 0x5e0   :  { %v2495_v42 = vadd.f32 %v7278_v34, %v2494_v38 }
 0x5e1   :  { %5786 = vmatmul.msk.f32.vlgmr.msrb.gmra.mxu3 %vm346_vm3, %v7372_v52 }
 0x5e2   :  { %v7377_v39 = vadd.f32 %v2729_v56, %v2495_v42 }
 0x5e3   :  { %v2731_v58 = vpop.f32.mrf.mxu1 }
 0x5e4   :  { %v2830_v60 = vmax.f32 %v7377_v39, 0.0  ;;  %v2732_v62 = vadd.f32 %v2731_v58, %v2618_v13  ;;  %v2785_v40 = vsel %vm346_vm3, %v7377_v39, -inf }
 0x5e6   :  { %5812 = vmatmul.msk.f32.gmra.mxu0 %vm346_vm3, %v2830_v60 }
 0x5e7   :  { %v2497_v2 = vpop.f32.mrf.mxu0  ;;  %5835 = vmatmul.msk.f32.gmra.mxu1 %vm346_vm3, %v7366_v50 }
 0x5e8   :  { %v2498_v18 = vadd.f32 %v7278_v34, %v2497_v2 }
 0x5e9   :  { %5787 = vmatmul.msk.f32.gmra.mxu3 %vm346_vm3, %v7372_v52 }
 0x5ea   :  { %v7386_v61 = vadd.f32 %v2732_v62, %v2498_v18 }
 0x5eb   :  { %v2734_v22 = vpop.f32.mrf.mxu1 }
 0x5ec   :  { %v2831_v51 = vmax.f32 %v7386_v61, 0.0  ;;  %v2735_v30 = vadd.f32 %v2734_v22, %v2621_v49  ;;  %v2786_v14 = vsel %vm346_vm3, %v7386_v61, -inf }
 0x5ee   :  { %5813 = vmatmul.msk.f32.gmra.mxu0 %vm346_vm3, %v2831_v51 }
 0x5ef   :  { %v2500_v57 = vpop.f32.mrf.mxu0  ;;  %5836 = vmatmul.msk.f32.gmra.mxu1 %vm346_vm3, %v7366_v50 }
 0x5f0   :  { %v2501_v5 = vadd.f32 %v7278_v34, %v2500_v57  ;;  %v3122_v57 = vld [vmem:[%s8608_s2 + $0x328] sm:$0xff] }
 0x5f1   :  { %5788 = vmatmul.msk.f32.gmra.mxu3 %vm346_vm3, %v7372_v52 }
 0x5f2   :  { %v7395_v28 = vadd.f32 %v2735_v30, %v2501_v5  ;;  %v3239_v30 = vld [vmem:[%s8608_s2 + $0x340] sm:$0xff] }
 0x5f3   :  { %v2737_v47 = vpop.f32.mrf.mxu1 }
 0x5f4   :  { %v2832_v0 = vmax.f32 %v7395_v28, 0.0  ;;  %v2738_v27 = vadd.f32 %v2737_v47, %v2624_v8  ;;  %v2787_v36 = vsel %vm346_vm3, %v7395_v28, -inf  ;;  %v3121_v8 = vld [vmem:[%s8608_s2 + $0x320] sm:$0xff]  ;;  %v3120_v47 = vld [vmem:[%s8608_s2 + $0x318] sm:$0xff] }
 0x5f5   :  { %v2788_v44 = vmax.f32 %v2783_v63, %v2787_v36 }
 0x5f6   :  { %5814 = vmatmul.msk.f32.gmra.mxu0 %vm346_vm3, %v2832_v0 }
 0x5f7   :  { %v2503_v9 = vpop.f32.mrf.mxu0  ;;  %5837 = vmatmul.msk.f32.gmra.mxu1 %vm346_vm3, %v7366_v50 }
 0x5f8   :  { %v2504_v48 = vadd.f32 %v7278_v34, %v2503_v9 }
 0x5f9   :  { %5789 = vmatmul.msk.f32.gmra.mxu3 %vm346_vm3, %v7372_v52 }
 0x5fa   :  { %v7404_v55 = vadd.f32 %v2738_v27, %v2504_v48  ;;  %v7495_v27 = vld [vmem:[%s8608_s2 + $0x310] ss:$0 sm:$0xff] }
 0x5fb   :  { %v2740_v41 = vpop.f32.mrf.mxu1 }
 0x5fc   :  { %v2833_v7 = vmax.f32 %v7404_v55, 0.0  ;;  %v2741_v1 = vadd.f32 %v2740_v41, %v2627_v6  ;;  %v2789_v29 = vsel %vm346_vm3, %v7404_v55, -inf }
 0x5fd   :  { %v2790_v26 = vmax.f32 %v2784_v35, %v2789_v29 }
 0x5fe   :  { %5815 = vmatmul.msk.f32.gmra.mxu0 %vm346_vm3, %v2833_v7 }
 0x5ff   :  { %v2506_v17 = vpop.f32.mrf.mxu0  ;;  %5838 = vmatmul.msk.f32.gmra.mxu1 %vm346_vm3, %v7366_v50  ;;  %v2795_v56 = vmax.f32 %v2788_v44, %v2790_v26 }
 0x600   :  { %v2507_v10 = vadd.f32 %v7278_v34, %v2506_v17 }
 0x601   :  { %5790 = vmatmul.msk.f32.gmra.mxu3 %vm346_vm3, %v7372_v52 }
 0x602   :  { %v7413_v23 = vadd.f32 %v2741_v1, %v2507_v10 }
 0x603   :  { %v2743_v37 = vpop.f32.mrf.mxu1 }
 0x604   :  { %v2834_v45 = vmax.f32 %v7413_v23, 0.0  ;;  %v2744_v20 = vadd.f32 %v2743_v37, %v2630_v32  ;;  %v2791_v31 = vsel %vm346_vm3, %v7413_v23, -inf }
 0x605   :  { %v2792_v13 = vmax.f32 %v2785_v40, %v2791_v31 }
 0x606   :  { %5816 = vmatmul.msk.f32.gmra.mxu0 %vm346_vm3, %v2834_v45 }
 0x607   :  { %v2509_v24 = vpop.f32.mrf.mxu0  ;;  %5839 = vmatmul.msk.f32.gmra.mxu1 %vm346_vm3, %v7366_v50 }
 0x608   :  { %v2510_v21 = vadd.f32 %v7278_v34, %v2509_v24  ;;  %v3123_v34 = vld [vmem:[%s8608_s2 + $0x330] sm:$0xff] }
 0x609   :  { %5791 = vmatmul.msk.f32.gmra.mxu3 %vm346_vm3, %v7372_v52  ;;  %3186 = vmatpush.msra.mxu2 %v3123_v34 }
 0x60a   :  { %v7430_v19 = vadd.f32 %v2744_v20, %v2510_v21 }
 0x60b   :  { %3187 = vmatpush.msra.mxu2 %v3122_v57 }
 0x60c   :  { %v2793_v12 = vsel %vm346_vm3, %v7430_v19, -inf  ;;  %v2835_v11 = vmax.f32 %v7430_v19, 0.0 }
 0x60d   :  { %v2794_v38 = vmax.f32 %v2786_v14, %v2793_v12  ;;  %3188 = vmatpush.msra.mxu2 %v3121_v8 }
 0x60e   :  { %5817 = vmatmul.msk.f32.gmra.mxu0 %vm346_vm3, %v2835_v11 }
 0x60f   :  { %v2796_v42 = vmax.f32 %v2792_v13, %v2794_v38  ;;  %5840 = vmatmul.msk.f32.gmra.mxu1 %vm346_vm3, %v7366_v50  ;;  %3189 = vmatpush.msra.mxu2 %v3120_v47 }
 0x611   :  { %v2797_v58 = vmax.f32 %v2795_v56, %v2796_v42  ;;  %5792 = vmatmul.msk.f32.gmra.mxu3 %vm346_vm3, %v7372_v52 }
 0x613   :  { %v2798_v60 = vrot.slane %v2797_v58, 4  ;;  %v3038_v5 = vpop.f32.mrf.mxu0 }
 0x615   :  { %v2799_v2 = vmax.f32 %v2797_v58, %v2798_v60 }
 0x617   :  { %v2800_v62 = vrot.slane %v2799_v2, 2  ;;  %5841 = vmatmul.msk.f32.gmra.mxu1 %vm346_vm3, %v7366_v50  ;;  %v3241_v50 = vld [vmem:[%s8608_s2 + $0x350] sm:$0xff] }
 0x618   :  { %3421 = vmatpush.msra.mxu3 %v3241_v50 }
 0x619   :  { %v2801_v18 = vmax.f32 %v2799_v2, %v2800_v62  ;;  %5793 = vmatmul.msk.f32.gmra.mxu3 %vm346_vm3, %v7372_v52  ;;  %v3240_v52 = vld [vmem:[%s8608_s2 + $0x348] sm:$0xff] }
 0x61a   :  { %3422 = vmatpush.msra.mxu3 %v3240_v52 }
 0x61b   :  { %v2802_v49 = vrot.slane %v2801_v18, 1  ;;  %v3041_v0 = vpop.f32.mrf.mxu0 }
 0x61c   :  { %3423 = vmatpush.msra.mxu3 %v3239_v30 }
 0x61d   :  { %v2803_v22 = vmax.f32 %v2801_v18, %v2802_v49 }
 0x61f   :  { %5842 = vmatmul.msk.f32.gmra.mxu1 %vm346_vm3, %v2803_v22  ;;  %v2848_v51 = vmax.f32 %v2803_v22, 0.0 }
 0x621   :  { %5794 = vmatmul.msk.f32.gmra.mxu3 %vm346_vm3, %v2848_v51 }
 0x623   :  { %v3044_v9 = vpop.f32.mrf.mxu0 }
 0x627   :  { %5843 = vmatmul.msk.f32.gmra.mxu1 %vm346_vm3, %v2803_v22 }
 0x629   :  { %5795 = vmatmul.msk.f32.gmra.mxu3 %vm346_vm3, %v2848_v51 }
 0x62b   :  { %v3047_v48 = vpop.f32.mrf.mxu0 }
 0x62f   :  { %5844 = vmatmul.msk.f32.gmra.mxu1 %vm346_vm3, %v2803_v22 }
 0x631   :  { %5796 = vmatmul.msk.f32.gmra.mxu3 %vm346_vm3, %v2848_v51 }
 0x633   :  { %v3050_v45 = vpop.f32.mrf.mxu0 }
 0x637   :  { %5845 = vmatmul.msk.f32.gmra.mxu1 %vm346_vm3, %v2803_v22 }
 0x639   :  { %5797 = vmatmul.msk.f32.gmra.mxu3 %vm346_vm3, %v2848_v51 }
 0x63b   :  { %v3053_v20 = vpop.f32.mrf.mxu0 }
 0x63f   :  { %5846 = vmatmul.msk.f32.gmra.mxu1 %vm346_vm3, %v2803_v22 }
 0x641   :  { %5798 = vmatmul.msk.f32.gmra.mxu3 %vm346_vm3, %v2848_v51 }
 0x647   :  { %5847 = vmatmul.msk.f32.gmra.mxu1 %vm346_vm3, %v2803_v22 }
 0x649   :  { %5799 = vmatmul.msk.f32.gmra.mxu3 %vm346_vm3, %v2848_v51 }
 0x64f   :  { %5848 = vmatmul.msk.f32.gmra.mxu1 %vm346_vm3, %v2803_v22 }
 0x651   :  { %5800 = vmatmul.msk.f32.gmra.mxu3 %vm346_vm3, %v2848_v51 }
 0x657   :  { %5849 = vmatmul.msk.f32.gmra.mxu1 %vm346_vm3, %v2803_v22 }
 0x659   :  { %5801 = vmatmul.msk.f32.gmra.mxu3 %vm346_vm3, %v2848_v51 }
 0x661   :  { %5850 = vmatmul.msk.f32.vlgmr.msra.gmra.mxu3 %vm346_vm3, %v7281_v46 }
 0x664   :  { %v2925_v41 = vpop.f32.mrf.mxu3 }
 0x665   :  { %v3039_v7 = vadd.f32 %v3038_v5, %v2925_v41 }
 0x667   :  { %v3088_v6 = vadd.f32 %v7495_v27, %v3039_v7 }
 0x669   :  { %v3104_v17 = vmax.f32 %v3088_v6, 0.0  ;;  %5851 = vmatmul.msk.f32.gmra.mxu3 %vm346_vm3, %v7286_v53 }
 0x66b   :  { %5818 = vmatmul.msk.f32.vlgmr.msra.gmra.mxu2 %vm346_vm3, %v3104_v17 }
 0x66c   :  { %v2928_v1 = vpop.f32.mrf.mxu3 }
 0x66d   :  { %v3042_v10 = vadd.f32 %v3041_v0, %v2928_v1 }
 0x66f   :  { %v3089_v46 = vadd.f32 %v7495_v27, %v3042_v10 }
 0x671   :  { %v3105_v37 = vmax.f32 %v3089_v46, 0.0  ;;  %5852 = vmatmul.msk.f32.gmra.mxu3 %vm346_vm3, %v7291_v25  ;;  %v3056_v25 = vpop.f32.mrf.mxu0 }
 0x673   :  { %5819 = vmatmul.msk.f32.gmra.mxu2 %vm346_vm3, %v3105_v37 }
 0x674   :  { %v2931_v32 = vpop.f32.mrf.mxu3 }
 0x675   :  { %v3045_v24 = vadd.f32 %v3044_v9, %v2931_v32 }
 0x677   :  { %v3090_v29 = vadd.f32 %v7495_v27, %v3045_v24 }
 0x679   :  { %v3106_v21 = vmax.f32 %v3090_v29, 0.0  ;;  %5853 = vmatmul.msk.f32.gmra.mxu3 %vm346_vm3, %v7299_v15  ;;  %v3059_v15 = vpop.f32.mrf.mxu0 }
 0x67b   :  { %5820 = vmatmul.msk.f32.gmra.mxu2 %vm346_vm3, %v3106_v21 }
 0x67c   :  { %v2934_v53 = vpop.f32.mrf.mxu3 }
 0x67d   :  { %v3048_v35 = vadd.f32 %v3047_v48, %v2934_v53 }
 0x67f   :  { %v3091_v36 = vadd.f32 %v7495_v27, %v3048_v35 }
 0x681   :  { %v3107_v31 = vmax.f32 %v3091_v36, 0.0  ;;  %5854 = vmatmul.msk.f32.gmra.mxu3 %vm346_vm3, %v7304_v16  ;;  %v3062_v13 = vpop.f32.mrf.mxu0  ;;  %v3566_v36 = vld [vmem:[%s8608_s2 + $0x398] sm:$0xff] }
 0x682   :  { %3629 = vmatpush.msra.mxu0 %v3566_v36 }
 0x683   :  { %5821 = vmatmul.msk.f32.gmra.mxu2 %vm346_vm3, %v3107_v31 }
 0x684   :  { %v2937_v63 = vpop.f32.mrf.mxu3 }
 0x685   :  { %v3051_v26 = vadd.f32 %v3050_v45, %v2937_v63  ;;  %v3312_v45 = vpop.f32.mrf.mxu1 }
 0x687   :  { %v3092_v34 = vadd.f32 %v7495_v27, %v3051_v26 }
 0x689   :  { %v3108_v3 = vmax.f32 %v3092_v34, 0.0  ;;  %5855 = vmatmul.msk.f32.gmra.mxu3 %vm346_vm3, %v7315_v33  ;;  %v3065_v60 = vpop.f32.mrf.mxu0 }
 0x68b   :  { %5822 = vmatmul.msk.f32.gmra.mxu2 %vm346_vm3, %v3108_v3 }
 0x68c   :  { %v2940_v40 = vpop.f32.mrf.mxu3 }
 0x68d   :  { %v3054_v14 = vadd.f32 %v3053_v20, %v2940_v40 }
 0x68f   :  { %v3093_v12 = vadd.f32 %v7495_v27, %v3054_v14 }
 0x691   :  { %v3109_v11 = vmax.f32 %v3093_v12, 0.0  ;;  %5856 = vmatmul.msk.f32.gmra.mxu3 %vm346_vm3, %v7332_v4 }
 0x693   :  { %5823 = vmatmul.msk.f32.gmra.mxu2 %vm346_vm3, %v3109_v11  ;;  %v3565_v11 = vld [vmem:[%s8608_s2 + $0x390] sm:$0xff] }
 0x694   :  { %v2943_v16 = vpop.f32.mrf.mxu3  ;;  %3630 = vmatpush.msra.mxu0 %v3565_v11 }
 0x695   :  { %v3057_v44 = vadd.f32 %v3056_v25, %v2943_v16 }
 0x697   :  { %v3094_v38 = vadd.f32 %v7495_v27, %v3057_v44 }
 0x699   :  { %v3110_v56 = vmax.f32 %v3094_v38, 0.0  ;;  %5857 = vmatmul.msk.f32.gmra.mxu3 %vm346_vm3, %v7345_v59  ;;  %v3068_v59 = vpop.f32.mrf.mxu0 }
 0x69b   :  { %5824 = vmatmul.msk.f32.gmra.mxu2 %vm346_vm3, %v3110_v56 }
 0x69c   :  { %v2946_v33 = vpop.f32.mrf.mxu3 }
 0x69d   :  { %v3060_v42 = vadd.f32 %v3059_v15, %v2946_v33 }
 0x69f   :  { %v3095_v58 = vadd.f32 %v7495_v27, %v3060_v42 }
 0x6a1   :  { %v3111_v2 = vmax.f32 %v3095_v58, 0.0  ;;  %5858 = vmatmul.msk.f32.gmra.mxu3 %vm346_vm3, %v7358_v54  ;;  %v3071_v54 = vpop.f32.mrf.mxu0 }
 0x6a3   :  { %5825 = vmatmul.msk.f32.gmra.mxu2 %vm346_vm3, %v3111_v2  ;;  %v7571_v2 = vld [vmem:[%s8608_s2 + $0x338] ss:$0 sm:$0xff] }
 0x6a4   :  { %v2949_v4 = vpop.f32.mrf.mxu3 }
 0x6a5   :  { %v3063_v62 = vadd.f32 %v3062_v13, %v2949_v4 }
 0x6a7   :  { %v3096_v18 = vadd.f32 %v7495_v27, %v3063_v62  ;;  %v3563_v62 = vld [vmem:[%s8608_s2 + $0x380] sm:$0xff] }
 0x6a9   :  { %v3112_v49 = vmax.f32 %v3096_v18, 0.0  ;;  %5859 = vmatmul.msk.f32.gmra.mxu3 %vm346_vm3, %v7363_v43  ;;  %v3074_v0 = vpop.f32.mrf.mxu0 }
 0x6ab   :  { %5826 = vmatmul.msk.f32.gmra.mxu2 %vm346_vm3, %v3112_v49 }
 0x6ac   :  { %v2952_v22 = vpop.f32.mrf.mxu3 }
 0x6ad   :  { %v3066_v51 = vadd.f32 %v3065_v60, %v2952_v22  ;;  %v3564_v60 = vld [vmem:[%s8608_s2 + $0x388] sm:$0xff] }
 0x6ae   :  { %3631 = vmatpush.msra.mxu0 %v3564_v60 }
 0x6af   :  { %v3097_v57 = vadd.f32 %v7495_v27, %v3066_v51 }
 0x6b0   :  { %3632 = vmatpush.msra.mxu0 %v3563_v62 }
 0x6b1   :  { %v3113_v50 = vmax.f32 %v3097_v57, 0.0  ;;  %5860 = vmatmul.msk.f32.gmra.mxu3 %vm346_vm3, %v7377_v39  ;;  %v3077_v6 = vpop.f32.mrf.mxu0 }
 0x6b3   :  { %5827 = vmatmul.msk.f32.gmra.mxu2 %vm346_vm3, %v3113_v50 }
 0x6b4   :  { %v2955_v52 = vpop.f32.mrf.mxu3 }
 0x6b5   :  { %v3069_v30 = vadd.f32 %v3068_v59, %v2955_v52 }
 0x6b7   :  { %v3098_v5 = vadd.f32 %v7495_v27, %v3069_v30 }
 0x6b9   :  { %v3114_v8 = vmax.f32 %v3098_v5, 0.0  ;;  %5861 = vmatmul.msk.f32.gmra.mxu3 %vm346_vm3, %v7386_v61 }
 0x6bb   :  { %5828 = vmatmul.msk.f32.gmra.mxu2 %vm346_vm3, %v3114_v8 }
 0x6bc   :  { %v2958_v43 = vpop.f32.mrf.mxu3 }
 0x6bd   :  { %v3072_v47 = vadd.f32 %v3071_v54, %v2958_v43 }
 0x6bf   :  { %v3099_v9 = vadd.f32 %v7495_v27, %v3072_v47 }
 0x6c1   :  { %v3115_v48 = vmax.f32 %v3099_v9, 0.0  ;;  %5862 = vmatmul.msk.f32.gmra.mxu3 %vm346_vm3, %v7395_v28  ;;  %v3080_v28 = vpop.f32.mrf.mxu0 }
 0x6c3   :  { %5829 = vmatmul.msk.f32.gmra.mxu2 %vm346_vm3, %v3115_v48 }
 0x6c4   :  { %v2961_v39 = vpop.f32.mrf.mxu3 }
 0x6c5   :  { %v3075_v41 = vadd.f32 %v3074_v0, %v2961_v39 }
 0x6c7   :  { %v3100_v7 = vadd.f32 %v7495_v27, %v3075_v41 }
 0x6c9   :  { %v3116_v17 = vmax.f32 %v3100_v7, 0.0  ;;  %5863 = vmatmul.msk.f32.gmra.mxu3 %vm346_vm3, %v7404_v55  ;;  %v3315_v55 = vpop.f32.mrf.mxu1  ;;  %v3083_v20 = vpop.f32.mrf.mxu0 }
 0x6cb   :  { %5830 = vmatmul.msk.f32.gmra.mxu2 %vm346_vm3, %v3116_v17 }
 0x6cc   :  { %v2964_v61 = vpop.f32.mrf.mxu3 }
 0x6cd   :  { %v3078_v1 = vadd.f32 %v3077_v6, %v2964_v61 }
 0x6cf   :  { %v3101_v10 = vadd.f32 %v7495_v27, %v3078_v1 }
 0x6d1   :  { %v3117_v46 = vmax.f32 %v3101_v10, 0.0  ;;  %5864 = vmatmul.msk.f32.gmra.mxu3 %vm346_vm3, %v7413_v23  ;;  %v3318_v31 = vpop.f32.mrf.mxu1 }
 0x6d3   :  { %5831 = vmatmul.msk.f32.gmra.mxu2 %vm346_vm3, %v3117_v46 }
 0x6d4   :  { %v2967_v37 = vpop.f32.mrf.mxu3 }
 0x6d5   :  { %v3081_v32 = vadd.f32 %v3080_v28, %v2967_v37 }
 0x6d7   :  { %v3102_v24 = vadd.f32 %v7495_v27, %v3081_v32 }
 0x6d9   :  { %v3118_v29 = vmax.f32 %v3102_v24, 0.0  ;;  %5865 = vmatmul.msk.f32.gmra.mxu3 %vm346_vm3, %v7430_v19  ;;  %v3321_v19 = vpop.f32.mrf.mxu1 }
 0x6db   :  { %5832 = vmatmul.msk.f32.gmra.mxu2 %vm346_vm3, %v3118_v29 }
 0x6dc   :  { %v2970_v21 = vpop.f32.mrf.mxu3 }
 0x6dd   :  { %v3084_v53 = vadd.f32 %v3083_v20, %v2970_v21 }
 0x6df   :  { %v3103_v35 = vadd.f32 %v7495_v27, %v3084_v53 }
 0x6e1   :  { %v3119_v23 = vmax.f32 %v3103_v35, 0.0  ;;  %v3324_v15 = vpop.f32.mrf.mxu1 }
 0x6e3   :  { %5833 = vmatmul.msk.f32.gmra.mxu2 %vm346_vm3, %v3119_v23 }
 0x6e4   :  { %v3425_v25 = vpop.f32.mrf.mxu3 }
 0x6e5   :  { %v3426_v47 = vadd.f32 %v3425_v25, %v3312_v45 }
 0x6e9   :  { %v3327_v12 = vpop.f32.mrf.mxu1 }
 0x6ec   :  { %v3428_v63 = vpop.f32.mrf.mxu3 }
 0x6ed   :  { %v3429_v50 = vadd.f32 %v3428_v63, %v3315_v55 }
 0x6ee   :  { %v3191_v26 = vpop.f32.mrf.mxu2 }
 0x6ef   :  { %v3192_v54 = vadd.f32 %v7571_v2, %v3191_v26 }
 0x6f1   :  { %v3330_v44 = vpop.f32.mrf.mxu1  ;;  %v3473_v6 = vadd.f32 %v3426_v47, %v3192_v54 }
 0x6f3   :  { %v3489_v20 = vsel %vm346_vm3, %v3473_v6, -inf }
 0x6f4   :  { %v3431_v34 = vpop.f32.mrf.mxu3 }
 0x6f5   :  { %v3432_v0 = vadd.f32 %v3431_v34, %v3318_v31 }
 0x6f6   :  { %v3194_v3 = vpop.f32.mrf.mxu2 }
 0x6f7   :  { %v3195_v59 = vadd.f32 %v7571_v2, %v3194_v3 }
 0x6f9   :  { %v3333_v33 = vpop.f32.mrf.mxu1  ;;  %v3474_v48 = vadd.f32 %v3429_v50, %v3195_v59 }
 0x6fb   :  { %v3490_v37 = vsel %vm346_vm3, %v3474_v48, -inf }
 0x6fc   :  { %v3434_v40 = vpop.f32.mrf.mxu3 }
 0x6fd   :  { %v3435_v39 = vadd.f32 %v3434_v40, %v3321_v19 }
 0x6fe   :  { %v3197_v14 = vpop.f32.mrf.mxu2 }
 0x6ff   :  { %v3198_v52 = vadd.f32 %v7571_v2, %v3197_v14 }
 0x701   :  { %v7577_v49 = vpop.f32.mrf.mxu1  ;;  %v3475_v17 = vadd.f32 %v3432_v0, %v3198_v52  ;;  %v3685_v52 = vld [vmem:[%s8608_s2 + $0x3d0] sm:$0xff] }
 0x702   :  { %3748 = vmatpush.msrb.mxu2 %v3685_v52 }
 0x703   :  { %v3491_v21 = vsel %vm346_vm3, %v3475_v17, -inf }
 0x704   :  { %v3437_v27 = vpop.f32.mrf.mxu3 }
 0x705   :  { %v3438_v30 = vadd.f32 %v3437_v27, %v3324_v15 }
 0x706   :  { %v3200_v16 = vpop.f32.mrf.mxu2 }
 0x707   :  { %v3201_v5 = vadd.f32 %v7571_v2, %v3200_v16 }
 0x709   :  { %v3476_v1 = vadd.f32 %v3435_v39, %v3201_v5  ;;  %v3339_v29 = vpop.f32.mrf.mxu1 }
 0x70b   :  { %v3492_v53 = vsel %vm346_vm3, %v3476_v1, -inf }
 0x70c   :  { %v3440_v13 = vpop.f32.mrf.mxu3 }
 0x70d   :  { %v3441_v22 = vadd.f32 %v3440_v13, %v3327_v12 }
 0x70e   :  { %v3203_v38 = vpop.f32.mrf.mxu2 }
 0x70f   :  { %v3204_v51 = vadd.f32 %v7571_v2, %v3203_v38 }
 0x711   :  { %v3477_v41 = vadd.f32 %v3438_v30, %v3204_v51  ;;  %v3342_v15 = vpop.f32.mrf.mxu1  ;;  %v3817_v30 = vld [vmem:[%s8608_s2 + $0x3a8] sm:$0x7] }
 0x712   :  { %5898 = vmatpush.msk.msrb.mxu1 %vm115_vm0, %v3817_v30 }
 0x713   :  { %v3493_v45 = vsel %vm346_vm3, %v3477_v41, -inf }
 0x714   :  { %v3443_v56 = vpop.f32.mrf.mxu3  ;;  %v3494_v23 = vmax.f32 %v3489_v20, %v3493_v45 }
 0x715   :  { %v3444_v8 = vadd.f32 %v3443_v56, %v3330_v44 }
 0x716   :  { %v3206_v42 = vpop.f32.mrf.mxu2 }
 0x717   :  { %v3207_v18 = vadd.f32 %v7571_v2, %v3206_v42 }
 0x719   :  { %v3478_v43 = vadd.f32 %v3441_v22, %v3207_v18  ;;  %v3345_v38 = vpop.f32.mrf.mxu1 }
 0x71b   :  { %v3495_v10 = vsel %vm346_vm3, %v3478_v43, -inf }
 0x71c   :  { %v3446_v58 = vpop.f32.mrf.mxu3  ;;  %v3496_v55 = vmax.f32 %v3490_v37, %v3495_v10 }
 0x71d   :  { %v3447_v46 = vadd.f32 %v3446_v58, %v3333_v33 }
 0x71e   :  { %v3209_v4 = vpop.f32.mrf.mxu2  ;;  %v3501_v63 = vmax.f32 %v3494_v23, %v3496_v55 }
 0x71f   :  { %v3210_v57 = vadd.f32 %v7571_v2, %v3209_v4 }
 0x721   :  { %v3479_v7 = vadd.f32 %v3444_v8, %v3210_v57  ;;  %v3348_v60 = vpop.f32.mrf.mxu1 }
 0x723   :  { %v3497_v32 = vsel %vm346_vm3, %v3479_v7, -inf }
 0x724   :  { %v7585_v9 = vpop.f32.mrf.mxu3  ;;  %v3498_v36 = vmax.f32 %v3491_v21, %v3497_v32 }
 0x725   :  { %v3450_v17 = vadd.f32 %v7585_v9, %v7577_v49 }
 0x726   :  { %v3212_v61 = vpop.f32.mrf.mxu2 }
 0x727   :  { %v3213_v28 = vadd.f32 %v7571_v2, %v3212_v61 }
 0x729   :  { %v3480_v24 = vadd.f32 %v3447_v46, %v3213_v28  ;;  %v3351_v18 = vpop.f32.mrf.mxu1 }
 0x72b   :  { %v3499_v35 = vsel %vm346_vm3, %v3480_v24, -inf }
 0x72c   :  { %v3500_v31 = vmax.f32 %v3492_v53, %v3499_v35  ;;  %v3452_v25 = vpop.f32.mrf.mxu3 }
 0x72d   :  { %v3453_v47 = vadd.f32 %v3452_v25, %v3339_v29 }
 0x72e   :  { %v3502_v19 = vmax.f32 %v3498_v36, %v3500_v31  ;;  %v3215_v26 = vpop.f32.mrf.mxu2 }
 0x72f   :  { %v3216_v0 = vadd.f32 %v7571_v2, %v3215_v26 }
 0x730   :  { %v3503_v34 = vmax.f32 %v3501_v63, %v3502_v19 }
 0x731   :  { %v3354_v51 = vpop.f32.mrf.mxu1  ;;  %v3481_v32 = vadd.f32 %v3450_v17, %v3216_v0  ;;  %v3810_v17 = vld [vmem:[%s8610_s1 + $0x48] sm:$0xff] }
 0x732   :  { %v3504_v3 = vrot.slane %v3503_v34, 4 }
 0x733   :  { %v3510_v31 = vsel %vm346_vm3, %v3481_v32, -inf }
 0x734   :  { %v3505_v40 = vmax.f32 %v3503_v34, %v3504_v3  ;;  %v3455_v14 = vpop.f32.mrf.mxu3 }
 0x735   :  { %v3456_v61 = vadd.f32 %v3455_v14, %v3342_v15 }
 0x736   :  { %v3506_v12 = vrot.slane %v3505_v40, 2  ;;  %v3218_v27 = vpop.f32.mrf.mxu2 }
 0x737   :  { %v3219_v54 = vadd.f32 %v7571_v2, %v3218_v27 }
 0x738   :  { %v3507_v11 = vmax.f32 %v3505_v40, %v3506_v12 }
 0x739   :  { %v3482_v10 = vadd.f32 %v3453_v47, %v3219_v54  ;;  %v3357_v45 = vpop.f32.mrf.mxu1  ;;  %v3806_v54 = vld [vmem:[%s8610_s1 + $0x28] sm:$0xff]  ;;  %v3808_v47 = vld [vmem:[%s8610_s1 + $0x38] sm:$0xff] }
 0x73a   :  { %v3508_v16 = vrot.slane %v3507_v11, 1 }
 0x73b   :  { %v3511_v49 = vsel %vm346_vm3, %v3482_v10, -inf  ;;  %v3811_v10 = vld [vmem:[%s8610_s1 + $0x50] sm:$0xff] }
 0x73c   :  { %v3509_v44 = vmax.f32 %v3507_v11, %v3508_v16  ;;  %v3458_v13 = vpop.f32.mrf.mxu3 }
 0x73d   :  { %v3459_v46 = vadd.f32 %v3458_v13, %v3345_v38  ;;  %v3684_v38 = vld [vmem:[%s8608_s2 + $0x3c8] sm:$0xff] }
 0x73e   :  { %v7596_v56 = vmax.f32 %v3509_v44, 0.0  ;;  %v3221_v33 = vpop.f32.mrf.mxu2  ;;  %3749 = vmatpush.msrb.mxu2 %v3684_v38 }
 0x73f   :  { %v3222_v48 = vadd.f32 %v7571_v2, %v3221_v33  ;;  %v3682_v33 = vld [vmem:[%s8608_s2 + $0x3b8] sm:$0xff] }
 0x740   :  { %5866 = vmatmul.msk.f32.vlgmr.msra.gmra.mxu0 %vm346_vm3, %v7596_v56 }
 0x741   :  { %v3483_v24 = vadd.f32 %v3456_v61, %v3222_v48 }
 0x743   :  { %v3512_v25 = vsel %vm346_vm3, %v3483_v24, -inf  ;;  %v3813_v24 = vld [vmem:[%s8610_s1 + $0x60] sm:$0xff] }
 0x744   :  { %v3461_v42 = vpop.f32.mrf.mxu3 }
 0x745   :  { %v3462_v39 = vadd.f32 %v3461_v42, %v3348_v60  ;;  %v3801_v42 = vld [vmem:[%s8610_s1] sm:$0xff]  ;;  %v3803_v60 = vld [vmem:[%s8610_s1 + $0x10] sm:$0xff] }
 0x746   :  { %v3224_v58 = vpop.f32.mrf.mxu2  ;;  %5899 = vmatmul.msk.f32.vlgmr.msrb.gmra.mxu1 %vm66_vm1, %v3801_v42 }
 0x747   :  { %v3225_v41 = vadd.f32 %v7571_v2, %v3224_v58  ;;  %v3802_v58 = vld [vmem:[%s8610_s1 + $0x8] sm:$0xff] }
 0x748   :  { %5867 = vmatmul.msk.f32.gmra.mxu0 %vm346_vm3, %v7596_v56 }
 0x749   :  { %v3484_v55 = vadd.f32 %v3459_v46, %v3225_v41 }
 0x74b   :  { %v3513_v63 = vsel %vm346_vm3, %v3484_v55, -inf  ;;  %v3970_v55 = vld [vmem:[%s8608_s2 + $0x3f0] sm:$0xff] }
 0x74c   :  { %v3464_v62 = vpop.f32.mrf.mxu3 }
 0x74d   :  { %v3465_v5 = vadd.f32 %v3464_v62, %v3351_v18  ;;  %v3804_v18 = vld [vmem:[%s8610_s1 + $0x18] sm:$0xff] }
 0x74e   :  { %v3227_v4 = vpop.f32.mrf.mxu2  ;;  %5900 = vmatmul.msk.f32.gmra.mxu1 %vm66_vm1, %v3802_v58 }
 0x74f   :  { %v3228_v8 = vadd.f32 %v7571_v2, %v3227_v4  ;;  %v7671_v4 = vld [vmem:[%s8608_s2 + $0x3a0] ss:$0 sm:$0xff] }
 0x750   :  { %5868 = vmatmul.msk.f32.gmra.mxu0 %vm346_vm3, %v7596_v56 }
 0x751   :  { %v3485_v28 = vadd.f32 %v3462_v39, %v3228_v8  ;;  %v3809_v39 = vld [vmem:[%s8610_s1 + $0x40] sm:$0xff] }
 0x753   :  { %v3514_v9 = vsel %vm346_vm3, %v3485_v28, -inf }
 0x754   :  { %v3467_v22 = vpop.f32.mrf.mxu3 }
 0x755   :  { %v3468_v7 = vadd.f32 %v3467_v22, %v3354_v51  ;;  %v3805_v51 = vld [vmem:[%s8610_s1 + $0x20] sm:$0xff] }
 0x756   :  { %v3230_v59 = vpop.f32.mrf.mxu2  ;;  %5901 = vmatmul.msk.f32.gmra.mxu1 %vm66_vm1, %v3803_v60 }
 0x757   :  { %v3231_v50 = vadd.f32 %v7571_v2, %v3230_v59 }
 0x758   :  { %5869 = vmatmul.msk.f32.gmra.mxu0 %vm346_vm3, %v7596_v56 }
 0x759   :  { %v3486_v6 = vadd.f32 %v3465_v5, %v3231_v50  ;;  %v3807_v5 = vld [vmem:[%s8610_s1 + $0x30] sm:$0xff] }
 0x75b   :  { %v3516_v20 = vsel %vm346_vm3, %v3486_v6, -inf }
 0x75c   :  { %v3470_v1 = vpop.f32.mrf.mxu3  ;;  %v3517_v36 = vmax.f32 %v3511_v49, %v3516_v20 }
 0x75d   :  { %v3471_v21 = vadd.f32 %v3470_v1, %v3357_v45 }
 0x75e   :  { %v3233_v57 = vpop.f32.mrf.mxu2  ;;  %5902 = vmatmul.msk.f32.gmra.mxu1 %vm66_vm1, %v3804_v18 }
 0x75f   :  { %v3234_v43 = vadd.f32 %v7571_v2, %v3233_v57 }
 0x760   :  { %5870 = vmatmul.msk.f32.gmra.mxu0 %vm346_vm3, %v7596_v56 }
 0x761   :  { %v3487_v37 = vadd.f32 %v3468_v7, %v3234_v43  ;;  %v3971_v7 = vld [vmem:[%s8608_s2 + $0x3f8] sm:$0xff] }
 0x762   :  { %4034 = vmatpush.msrb.mxu3 %v3971_v7 }
 0x763   :  { %v3518_v35 = vsel %vm346_vm3, %v3487_v37, -inf  ;;  %v3812_v37 = vld [vmem:[%s8610_s1 + $0x58] sm:$0xff] }
 0x764   :  { %v3519_v26 = vmax.f32 %v3512_v25, %v3518_v35  ;;  %4035 = vmatpush.msrb.mxu3 %v3970_v55  ;;  %v4106_v55 = vld [vmem:[%s8608_s2 + $0x420] sm:$0xff] }
 0x765   :  { %4169 = vmatpush.msrb.mxu0 %v4106_v55 }
 0x766   :  { %v3236_v29 = vpop.f32.mrf.mxu2  ;;  %5903 = vmatmul.msk.f32.gmra.mxu1 %vm66_vm1, %v3805_v51 }
 0x767   :  { %v3237_v53 = vadd.f32 %v7571_v2, %v3236_v29  ;;  %v3515_v2 = vmax.f32 %v3510_v31, %v3514_v9  ;;  %v3815_v9 = vld [vmem:[%s8610_s1 + $0x70] sm:$0xff] }
 0x768   :  { %5871 = vmatmul.msk.f32.gmra.mxu0 %vm346_vm3, %v7596_v56 }
 0x769   :  { %v3488_v23 = vadd.f32 %v3471_v21, %v3237_v53  ;;  %v3522_v3 = vmax.f32 %v3515_v2, %v3517_v36  ;;  %v3814_v21 = vld [vmem:[%s8610_s1 + $0x68] sm:$0xff] }
 0x76a   :  { %v3969_v2 = vld [vmem:[%s8608_s2 + $0x3e8] sm:$0xff] }
 0x76b   :  { %v3520_v19 = vsel %vm346_vm3, %v3488_v23, -inf  ;;  %v3816_v23 = vld [vmem:[%s8610_s1 + $0x78] sm:$0xff]  ;;  %4036 = vmatpush.msrb.mxu3 %v3969_v2 }
 0x76c   :  { %v3521_v34 = vmax.f32 %v3513_v63, %v3520_v19 }
 0x76e   :  { %v3523_v15 = vmax.f32 %v3519_v26, %v3521_v34  ;;  %5904 = vmatmul.msk.f32.gmra.mxu1 %vm66_vm1, %v3806_v54  ;;  %v3968_v26 = vld [vmem:[%s8608_s2 + $0x3e0] sm:$0xff] }
 0x76f   :  { %4037 = vmatpush.msrb.mxu3 %v3968_v26 }
 0x770   :  { %v3524_v40 = vmax.f32 %v3522_v3, %v3523_v15  ;;  %5872 = vmatmul.msk.f32.gmra.mxu0 %vm346_vm3, %v7596_v56 }
 0x772   :  { %v3525_v14 = vrot.slane %v3524_v40, 4 }
 0x774   :  { %v3526_v12 = vmax.f32 %v3524_v40, %v3525_v14 }
 0x776   :  { %v3527_v27 = vrot.slane %v3526_v12, 2  ;;  %5905 = vmatmul.msk.f32.gmra.mxu1 %vm66_vm1, %v3807_v5 }
 0x778   :  { %v3528_v11 = vmax.f32 %v3526_v12, %v3527_v27  ;;  %5873 = vmatmul.msk.f32.gmra.mxu0 %vm346_vm3, %v7596_v56  ;;  %v3683_v56 = vld [vmem:[%s8608_s2 + $0x3c0] sm:$0xff]  ;;  %v7772_v27 = vld [vmem:[%s8608_s2 + $0x3b0] ss:$0 sm:$0xff] }
 0x779   :  { %3750 = vmatpush.msrb.mxu2 %v3683_v56 }
 0x77a   :  { %v3529_v16 = vrot.slane %v3528_v11, 1 }
 0x77b   :  { %3751 = vmatpush.msrb.mxu2 %v3682_v33 }
 0x77c   :  { %v3530_v44 = vmax.f32 %v3528_v11, %v3529_v16  ;;  %v7777_v16 = vld [vmem:[%s8608_s2 + $0x3d8] ss:$0 sm:$0xff] }
 0x77e   :  { %v3555_v13 = vmax.f32 %v3530_v44, 0.0  ;;  %5906 = vmatmul.msk.f32.gmra.mxu1 %vm66_vm1, %v3808_v47 }
 0x780   :  { %5874 = vmatmul.msk.f32.gmra.mxu0 %vm346_vm3, %v3555_v13 }
 0x786   :  { %5907 = vmatmul.msk.f32.gmra.mxu1 %vm66_vm1, %v3809_v39 }
 0x788   :  { %5875 = vmatmul.msk.f32.gmra.mxu0 %vm346_vm3, %v3555_v13 }
 0x78e   :  { %5908 = vmatmul.msk.f32.gmra.mxu1 %vm66_vm1, %v3810_v17 }
 0x790   :  { %5876 = vmatmul.msk.f32.gmra.mxu0 %vm346_vm3, %v3555_v13 }
 0x796   :  { %5909 = vmatmul.msk.f32.gmra.mxu1 %vm66_vm1, %v3811_v10 }
 0x798   :  { %5877 = vmatmul.msk.f32.gmra.mxu0 %vm346_vm3, %v3555_v13 }
 0x79e   :  { %5910 = vmatmul.msk.f32.gmra.mxu1 %vm66_vm1, %v3812_v37 }
 0x7a0   :  { %5878 = vmatmul.msk.f32.gmra.mxu0 %vm346_vm3, %v3555_v13 }
 0x7a6   :  { %5911 = vmatmul.msk.f32.gmra.mxu1 %vm66_vm1, %v3813_v24 }
 0x7a8   :  { %5879 = vmatmul.msk.f32.gmra.mxu0 %vm346_vm3, %v3555_v13 }
 0x7ae   :  { %5912 = vmatmul.msk.f32.gmra.mxu1 %vm66_vm1, %v3814_v21 }
 0x7b0   :  { %5880 = vmatmul.msk.f32.gmra.mxu0 %vm346_vm3, %v3555_v13 }
 0x7b6   :  { %5913 = vmatmul.msk.f32.gmra.mxu1 %vm66_vm1, %v3815_v9 }
 0x7b8   :  { %5881 = vmatmul.msk.f32.gmra.mxu0 %vm346_vm3, %v3555_v13 }
 0x7bd   :  { %v3634_v62 = vpop.f32.mrf.mxu0 }
 0x7be   :  { %v3635_v59 = vadd.f32 %v7671_v4, %v3634_v62  ;;  %5914 = vmatmul.msk.f32.gmra.mxu1 %vm66_vm1, %v3816_v23 }
 0x7c0   :  { %5882 = vmatmul.msk.f32.vlgmr.msrb.gmra.mxu2 %vm346_vm3, %v3635_v59 }
 0x7c3   :  { %v3888_v25 = vpop.f32.mrf.mxu1 }
 0x7c4   :  { %v3889_v44 = vadd.f32 %v7772_v27, %v3888_v25 }
 0x7c5   :  { %v3637_v22 = vpop.f32.mrf.mxu0 }
 0x7c6   :  { %v3638_v57 = vadd.f32 %v7671_v4, %v3637_v22 }
 0x7c8   :  { %5883 = vmatmul.msk.f32.gmra.mxu2 %vm346_vm3, %v3638_v57 }
 0x7cb   :  { %v3891_v34 = vpop.f32.mrf.mxu1 }
 0x7cc   :  { %v3892_v58 = vadd.f32 %v7772_v27, %v3891_v34 }
 0x7cd   :  { %v3640_v50 = vpop.f32.mrf.mxu0 }
 0x7ce   :  { %v3641_v52 = vadd.f32 %v7671_v4, %v3640_v50 }
 0x7d0   :  { %5884 = vmatmul.msk.f32.gmra.mxu2 %vm346_vm3, %v3641_v52 }
 0x7d3   :  { %v3894_v14 = vpop.f32.mrf.mxu1 }
 0x7d4   :  { %v3895_v59 = vadd.f32 %v7772_v27, %v3894_v14 }
 0x7d5   :  { %v3643_v30 = vpop.f32.mrf.mxu0 }
 0x7d6   :  { %v3644_v8 = vadd.f32 %v7671_v4, %v3643_v30 }
 0x7d8   :  { %5885 = vmatmul.msk.f32.gmra.mxu2 %vm346_vm3, %v3644_v8 }
 0x7db   :  { %v3897_v11 = vpop.f32.mrf.mxu1 }
 0x7dc   :  { %v3898_v52 = vadd.f32 %v7772_v27, %v3897_v11 }
 0x7dd   :  { %v3646_v43 = vpop.f32.mrf.mxu0 }
 0x7de   :  { %v3647_v0 = vadd.f32 %v7671_v4, %v3646_v43 }
 0x7e0   :  { %5886 = vmatmul.msk.f32.gmra.mxu2 %vm346_vm3, %v3647_v0 }
 0x7e3   :  { %v3900_v42 = vpop.f32.mrf.mxu1 }
 0x7e4   :  { %v3901_v0 = vadd.f32 %v7772_v27, %v3900_v42 }
 0x7e5   :  { %v3649_v48 = vpop.f32.mrf.mxu0 }
 0x7e6   :  { %v3650_v41 = vadd.f32 %v7671_v4, %v3649_v48 }
 0x7e8   :  { %5887 = vmatmul.msk.f32.gmra.mxu2 %vm346_vm3, %v3650_v41 }
 0x7eb   :  { %v3903_v51 = vpop.f32.mrf.mxu1 }
 0x7ec   :  { %v3904_v17 = vadd.f32 %v7772_v27, %v3903_v51 }
 0x7ed   :  { %v3652_v6 = vpop.f32.mrf.mxu0 }
 0x7ee   :  { %v3653_v61 = vadd.f32 %v7671_v4, %v3652_v6 }
 0x7f0   :  { %5888 = vmatmul.msk.f32.gmra.mxu2 %vm346_vm3, %v3653_v61 }
 0x7f3   :  { %v3906_v8 = vpop.f32.mrf.mxu1 }
 0x7f4   :  { %v3907_v37 = vadd.f32 %v7772_v27, %v3906_v8 }
 0x7f5   :  { %v3655_v1 = vpop.f32.mrf.mxu0 }
 0x7f6   :  { %v3656_v46 = vadd.f32 %v7671_v4, %v3655_v1 }
 0x7f8   :  { %5889 = vmatmul.msk.f32.gmra.mxu2 %vm346_vm3, %v3656_v46 }
 0x7fb   :  { %v3909_v7 = vpop.f32.mrf.mxu1 }
 0x7fd   :  { %v3658_v28 = vpop.f32.mrf.mxu0 }
 0x7fe   :  { %v3659_v45 = vadd.f32 %v7671_v4, %v3658_v28 }
 0x800   :  { %5890 = vmatmul.msk.f32.gmra.mxu2 %vm346_vm3, %v3659_v45 }
 0x803   :  { %v3912_v28 = vpop.f32.mrf.mxu1 }
 0x804   :  { %v3913_v23 = vadd.f32 %v7772_v27, %v3912_v28 }
 0x805   :  { %v3661_v32 = vpop.f32.mrf.mxu0 }
 0x806   :  { %v3662_v29 = vadd.f32 %v7671_v4, %v3661_v32 }
 0x808   :  { %5891 = vmatmul.msk.f32.gmra.mxu2 %vm346_vm3, %v3662_v29 }
 0x80d   :  { %v3664_v20 = vpop.f32.mrf.mxu0 }
 0x80e   :  { %v3665_v53 = vadd.f32 %v7671_v4, %v3664_v20  ;;  %v3910_v20 = vadd.f32 %v7772_v27, %v3909_v7  ;;  %v4103_v7 = vld [vmem:[%s8608_s2 + $0x408] sm:$0xff] }
 0x810   :  { %5892 = vmatmul.msk.f32.gmra.mxu2 %vm346_vm3, %v3665_v53  ;;  %v3915_v53 = vpop.f32.mrf.mxu1 }
 0x811   :  { %v3916_v2 = vadd.f32 %v7772_v27, %v3915_v53 }
 0x815   :  { %v3667_v49 = vpop.f32.mrf.mxu0 }
 0x816   :  { %v3668_v35 = vadd.f32 %v7671_v4, %v3667_v49 }
 0x818   :  { %5893 = vmatmul.msk.f32.gmra.mxu2 %vm346_vm3, %v3668_v35  ;;  %v3918_v25 = vpop.f32.mrf.mxu1 }
 0x819   :  { %v3919_v14 = vadd.f32 %v7772_v27, %v3918_v25 }
 0x81d   :  { %v3670_v36 = vpop.f32.mrf.mxu0 }
 0x81e   :  { %v3671_v31 = vadd.f32 %v7671_v4, %v3670_v36 }
 0x820   :  { %5894 = vmatmul.msk.f32.gmra.mxu2 %vm346_vm3, %v3671_v31 }
 0x825   :  { %v3673_v63 = vpop.f32.mrf.mxu0 }
 0x826   :  { %v3674_v19 = vadd.f32 %v7671_v4, %v3673_v63 }
 0x828   :  { %5895 = vmatmul.msk.f32.gmra.mxu2 %vm346_vm3, %v3674_v19 }
 0x82d   :  { %v3676_v3 = vpop.f32.mrf.mxu0 }
 0x82e   :  { %v3677_v15 = vadd.f32 %v7671_v4, %v3676_v3 }
 0x830   :  { %5896 = vmatmul.msk.f32.gmra.mxu2 %vm346_vm3, %v3677_v15  ;;  %v3921_v15 = vpop.f32.mrf.mxu1 }
 0x831   :  { %v3922_v42 = vadd.f32 %v7772_v27, %v3921_v15 }
 0x835   :  { %v3679_v40 = vpop.f32.mrf.mxu0 }
 0x836   :  { %v3680_v12 = vadd.f32 %v7671_v4, %v3679_v40 }
 0x838   :  { %5897 = vmatmul.msk.f32.gmra.mxu2 %vm346_vm3, %v3680_v12 }
 0x843   :  { %v3753_v13 = vpop.f32.mrf.mxu2 }
 0x844   :  { %v3754_v38 = vadd.f32 %v7777_v16, %v3753_v13 }
 0x846   :  { %v7781_v56 = vadd.f32 %v3889_v44, %v3754_v38  ;;  %v4105_v38 = vld [vmem:[%s8608_s2 + $0x418] sm:$0xff] }
 0x847   :  { %4170 = vmatpush.msrb.mxu0 %v4105_v38 }
 0x848   :  { %v3952_v33 = vmax.f32 %v7781_v56, 0.0 }
 0x84a   :  { %5915 = vmatmul.msk.f32.vlgmr.msrb.gmra.mxu3 %vm346_vm3, %v3952_v33  ;;  %v3924_v33 = vpop.f32.mrf.mxu1 }
 0x84b   :  { %v3756_v60 = vpop.f32.mrf.mxu2 }
 0x84c   :  { %v3757_v4 = vadd.f32 %v7777_v16, %v3756_v60 }
 0x84e   :  { %v7787_v62 = vadd.f32 %v3892_v58, %v3757_v4 }
 0x850   :  { %v3953_v18 = vmax.f32 %v7787_v62, 0.0 }
 0x852   :  { %5916 = vmatmul.msk.f32.gmra.mxu3 %vm346_vm3, %v3953_v18  ;;  %v3927_v51 = vpop.f32.mrf.mxu1 }
 0x853   :  { %v3759_v22 = vpop.f32.mrf.mxu2 }
 0x854   :  { %v3760_v57 = vadd.f32 %v7777_v16, %v3759_v22 }
 0x856   :  { %v7793_v50 = vadd.f32 %v3895_v59, %v3760_v57  ;;  %v3925_v59 = vadd.f32 %v7772_v27, %v3924_v33 }
 0x858   :  { %v3954_v54 = vmax.f32 %v7793_v50, 0.0 }
 0x85a   :  { %5917 = vmatmul.msk.f32.gmra.mxu3 %vm346_vm3, %v3954_v54 }
 0x85b   :  { %v3762_v30 = vpop.f32.mrf.mxu2 }
 0x85c   :  { %v3763_v5 = vadd.f32 %v7777_v16, %v3762_v30  ;;  %v3928_v30 = vadd.f32 %v7772_v27, %v3927_v51 }
 0x85e   :  { %v7799_v43 = vadd.f32 %v3898_v52, %v3763_v5 }
 0x860   :  { %v3955_v47 = vmax.f32 %v7799_v43, 0.0 }
 0x862   :  { %5918 = vmatmul.msk.f32.gmra.mxu3 %vm346_vm3, %v3955_v47  ;;  %v3930_v47 = vpop.f32.mrf.mxu1 }
 0x863   :  { %v3765_v48 = vpop.f32.mrf.mxu2 }
 0x864   :  { %v3766_v39 = vadd.f32 %v7777_v16, %v3765_v48  ;;  %v4104_v48 = vld [vmem:[%s8608_s2 + $0x410] sm:$0xff] }
 0x865   :  { %4171 = vmatpush.msrb.mxu0 %v4104_v48 }
 0x866   :  { %v7805_v41 = vadd.f32 %v3901_v0, %v3766_v39 }
 0x867   :  { %4172 = vmatpush.msrb.mxu0 %v4103_v7 }
 0x868   :  { %v3956_v6 = vmax.f32 %v7805_v41, 0.0 }
 0x86a   :  { %5919 = vmatmul.msk.f32.gmra.mxu3 %vm346_vm3, %v3956_v6  ;;  %v3931_v6 = vadd.f32 %v7772_v27, %v3930_v47 }
 0x86b   :  { %v3768_v61 = vpop.f32.mrf.mxu2 }
 0x86c   :  { %v3769_v1 = vadd.f32 %v7777_v16, %v3768_v61 }
 0x86e   :  { %v7811_v10 = vadd.f32 %v3904_v17, %v3769_v1 }
 0x870   :  { %v3957_v46 = vmax.f32 %v7811_v10, 0.0 }
 0x872   :  { %5920 = vmatmul.msk.f32.gmra.mxu3 %vm346_vm3, %v3957_v46  ;;  %v3933_v46 = vpop.f32.mrf.mxu1 }
 0x873   :  { %v3771_v45 = vpop.f32.mrf.mxu2 }
 0x874   :  { %v3772_v32 = vadd.f32 %v7777_v16, %v3771_v45 }
 0x876   :  { %v7817_v24 = vadd.f32 %v3907_v37, %v3772_v32  ;;  %v3934_v37 = vadd.f32 %v7772_v27, %v3933_v46  ;;  %v4255_v46 = vld [vmem:[%s8608_s2 + $0x438] sm:$0xff] }
 0x878   :  { %v3958_v29 = vmax.f32 %v7817_v24, 0.0 }
 0x87a   :  { %5921 = vmatmul.msk.f32.gmra.mxu3 %vm346_vm3, %v3958_v29 }
 0x87b   :  { %v3774_v21 = vpop.f32.mrf.mxu2 }
 0x87c   :  { %v3775_v49 = vadd.f32 %v7777_v16, %v3774_v21 }
 0x87e   :  { %v7826_v9 = vadd.f32 %v3910_v20, %v3775_v49  ;;  %v7890_v20 = vld [vmem:[%s8608_s2 + $0x400] ss:$0 sm:$0xff] }
 0x880   :  { %v3959_v35 = vmax.f32 %v7826_v9, 0.0 }
 0x882   :  { %5922 = vmatmul.msk.f32.gmra.mxu3 %vm346_vm3, %v3959_v35 }
 0x883   :  { %v3777_v36 = vpop.f32.mrf.mxu2 }
 0x884   :  { %v3778_v31 = vadd.f32 %v7777_v16, %v3777_v36 }
 0x886   :  { %v7832_v63 = vadd.f32 %v3913_v23, %v3778_v31 }
 0x888   :  { %v3960_v19 = vmax.f32 %v7832_v63, 0.0 }
 0x88a   :  { %5923 = vmatmul.msk.f32.gmra.mxu3 %vm346_vm3, %v3960_v19 }
 0x88b   :  { %v3780_v26 = vpop.f32.mrf.mxu2 }
 0x88c   :  { %v3781_v34 = vadd.f32 %v7777_v16, %v3780_v26 }
 0x88e   :  { %v7838_v3 = vadd.f32 %v3916_v2, %v3781_v34 }
 0x890   :  { %v3961_v40 = vmax.f32 %v7838_v3, 0.0 }
 0x892   :  { %5924 = vmatmul.msk.f32.gmra.mxu3 %vm346_vm3, %v3961_v40 }
 0x893   :  { %v3783_v12 = vpop.f32.mrf.mxu2 }
 0x894   :  { %v3784_v11 = vadd.f32 %v7777_v16, %v3783_v12 }
 0x896   :  { %v7844_v44 = vadd.f32 %v3919_v14, %v3784_v11  ;;  %v4257_v11 = vld [vmem:[%s8608_s2 + $0x448] sm:$0xff] }
 0x897   :  { %4320 = vmatpush.msra.mxu2 %v4257_v11 }
 0x898   :  { %v3962_v13 = vmax.f32 %v7844_v44, 0.0 }
 0x89a   :  { %5925 = vmatmul.msk.f32.gmra.mxu3 %vm346_vm3, %v3962_v13 }
 0x89b   :  { %v3786_v58 = vpop.f32.mrf.mxu2 }
 0x89c   :  { %v3787_v60 = vadd.f32 %v7777_v16, %v3786_v58 }
 0x89e   :  { %v7853_v4 = vadd.f32 %v3922_v42, %v3787_v60 }
 0x8a0   :  { %v3963_v18 = vmax.f32 %v7853_v4, 0.0 }
 0x8a2   :  { %5926 = vmatmul.msk.f32.gmra.mxu3 %vm346_vm3, %v3963_v18 }
 0x8a3   :  { %v3789_v22 = vpop.f32.mrf.mxu2 }
 0x8a4   :  { %v3790_v57 = vadd.f32 %v7777_v16, %v3789_v22 }
 0x8a6   :  { %v7859_v54 = vadd.f32 %v3925_v59, %v3790_v57 }
 0x8a8   :  { %v3964_v52 = vmax.f32 %v7859_v54, 0.0 }
 0x8aa   :  { %5927 = vmatmul.msk.f32.gmra.mxu3 %vm346_vm3, %v3964_v52 }
 0x8ab   :  { %v3792_v5 = vpop.f32.mrf.mxu2 }
 0x8ac   :  { %v3793_v8 = vadd.f32 %v7777_v16, %v3792_v5 }
 0x8ae   :  { %v7865_v0 = vadd.f32 %v3928_v30, %v3793_v8  ;;  %v4256_v30 = vld [vmem:[%s8608_s2 + $0x440] sm:$0xff] }
 0x8af   :  { %4321 = vmatpush.msra.mxu2 %v4256_v30 }
 0x8b0   :  { %v3965_v39 = vmax.f32 %v7865_v0, 0.0 }
 0x8b1   :  { %4322 = vmatpush.msra.mxu2 %v4255_v46  ;;  %v4391_v46 = vld [vmem:[%s8608_s2 + $0x468] sm:$0xff] }
 0x8b2   :  { %5928 = vmatmul.msk.f32.gmra.mxu3 %vm346_vm3, %v3965_v39 }
 0x8b3   :  { %v3795_v17 = vpop.f32.mrf.mxu2 }
 0x8b4   :  { %v3796_v61 = vadd.f32 %v7777_v16, %v3795_v17 }
 0x8b6   :  { %v7877_v1 = vadd.f32 %v3931_v6, %v3796_v61 }
 0x8b8   :  { %v3966_v28 = vmax.f32 %v7877_v1, 0.0 }
 0x8ba   :  { %5929 = vmatmul.msk.f32.gmra.mxu3 %vm346_vm3, %v3966_v28  ;;  %v4254_v28 = vld [vmem:[%s8608_s2 + $0x430] sm:$0xff] }
 0x8bb   :  { %v3798_v45 = vpop.f32.mrf.mxu2  ;;  %4323 = vmatpush.msra.mxu2 %v4254_v28 }
 0x8bc   :  { %v3799_v32 = vadd.f32 %v7777_v16, %v3798_v45 }
 0x8be   :  { %v7883_v29 = vadd.f32 %v3934_v37, %v3799_v32 }
 0x8c0   :  { %v3967_v55 = vmax.f32 %v7883_v29, 0.0 }
 0x8c2   :  { %5930 = vmatmul.msk.f32.gmra.mxu3 %vm346_vm3, %v3967_v55 }
 0x8cd   :  { %v4039_v21 = vpop.f32.mrf.mxu3 }
 0x8ce   :  { %v4040_v53 = vadd.f32 %v7890_v20, %v4039_v21 }
 0x8d0   :  { %v4087_v49 = vmax.f32 %v4040_v53, 0.0 }
 0x8d2   :  { %5931 = vmatmul.msk.f32.vlgmr.msrb.gmra.mxu0 %vm346_vm3, %v4087_v49 }
 0x8d5   :  { %v4042_v27 = vpop.f32.mrf.mxu3 }
 0x8d6   :  { %v4043_v16 = vadd.f32 %v7890_v20, %v4042_v27 }
 0x8d8   :  { %v4088_v35 = vmax.f32 %v4043_v16, 0.0 }
 0x8da   :  { %5932 = vmatmul.msk.f32.gmra.mxu0 %vm346_vm3, %v4088_v35  ;;  %v7939_v35 = vld [vmem:[%s8608_s2 + $0x428] ss:$0 sm:$0xff] }
 0x8dd   :  { %v4045_v23 = vpop.f32.mrf.mxu3 }
 0x8de   :  { %v4046_v36 = vadd.f32 %v7890_v20, %v4045_v23 }
 0x8e0   :  { %v4089_v31 = vmax.f32 %v4046_v36, 0.0 }
 0x8e2   :  { %5933 = vmatmul.msk.f32.gmra.mxu0 %vm346_vm3, %v4089_v31 }
 0x8e5   :  { %v4048_v25 = vpop.f32.mrf.mxu3 }
 0x8e6   :  { %v4049_v19 = vadd.f32 %v7890_v20, %v4048_v25 }
 0x8e8   :  { %v4090_v2 = vmax.f32 %v4049_v19, 0.0 }
 0x8ea   :  { %5934 = vmatmul.msk.f32.gmra.mxu0 %vm346_vm3, %v4090_v2 }
 0x8ed   :  { %v4051_v26 = vpop.f32.mrf.mxu3 }
 0x8ee   :  { %v4052_v34 = vadd.f32 %v7890_v20, %v4051_v26 }
 0x8f0   :  { %v4091_v15 = vmax.f32 %v4052_v34, 0.0 }
 0x8f2   :  { %5935 = vmatmul.msk.f32.gmra.mxu0 %vm346_vm3, %v4091_v15 }
 0x8f5   :  { %v4054_v40 = vpop.f32.mrf.mxu3 }
 0x8f6   :  { %v4055_v14 = vadd.f32 %v7890_v20, %v4054_v40 }
 0x8f8   :  { %v4092_v12 = vmax.f32 %v4055_v14, 0.0 }
 0x8fa   :  { %5936 = vmatmul.msk.f32.gmra.mxu0 %vm346_vm3, %v4092_v12 }
 0x8fd   :  { %v4057_v13 = vpop.f32.mrf.mxu3 }
 0x8fe   :  { %v4058_v38 = vadd.f32 %v7890_v20, %v4057_v13 }
 0x900   :  { %v4093_v33 = vmax.f32 %v4058_v38, 0.0 }
 0x902   :  { %5937 = vmatmul.msk.f32.gmra.mxu0 %vm346_vm3, %v4093_v33 }
 0x905   :  { %v4060_v42 = vpop.f32.mrf.mxu3 }
 0x906   :  { %v4061_v58 = vadd.f32 %v7890_v20, %v4060_v42 }
 0x908   :  { %v4094_v60 = vmax.f32 %v4061_v58, 0.0 }
 0x90a   :  { %5938 = vmatmul.msk.f32.gmra.mxu0 %vm346_vm3, %v4094_v60 }
 0x90d   :  { %v4063_v18 = vpop.f32.mrf.mxu3 }
 0x90e   :  { %v4064_v59 = vadd.f32 %v7890_v20, %v4063_v18 }
 0x910   :  { %v4095_v22 = vmax.f32 %v4064_v59, 0.0 }
 0x912   :  { %5939 = vmatmul.msk.f32.gmra.mxu0 %vm346_vm3, %v4095_v22 }
 0x915   :  { %v4066_v51 = vpop.f32.mrf.mxu3 }
 0x916   :  { %v4067_v57 = vadd.f32 %v7890_v20, %v4066_v51  ;;  %v4392_v51 = vld [vmem:[%s8608_s2 + $0x470] sm:$0xff] }
 0x917   :  { %4455 = vmatpush.msra.mxu1 %v4392_v51 }
 0x918   :  { %v4096_v52 = vmax.f32 %v4067_v57, 0.0 }
 0x919   :  { %4456 = vmatpush.msra.mxu1 %v4391_v46 }
 0x91a   :  { %5940 = vmatmul.msk.f32.gmra.mxu0 %vm346_vm3, %v4096_v52 }
 0x91d   :  { %v4069_v5 = vpop.f32.mrf.mxu3 }
 0x91e   :  { %v4070_v8 = vadd.f32 %v7890_v20, %v4069_v5 }
 0x920   :  { %v4097_v47 = vmax.f32 %v4070_v8, 0.0 }
 0x922   :  { %5941 = vmatmul.msk.f32.gmra.mxu0 %vm346_vm3, %v4097_v47 }
 0x925   :  { %v4072_v48 = vpop.f32.mrf.mxu3 }
 0x926   :  { %v4073_v39 = vadd.f32 %v7890_v20, %v4072_v48 }
 0x928   :  { %v4098_v7 = vmax.f32 %v4073_v39, 0.0 }
 0x92a   :  { %5942 = vmatmul.msk.f32.gmra.mxu0 %vm346_vm3, %v4098_v7 }
 0x92d   :  { %v4075_v6 = vpop.f32.mrf.mxu3 }
 0x92e   :  { %v4076_v17 = vadd.f32 %v7890_v20, %v4075_v6 }
 0x930   :  { %v4099_v61 = vmax.f32 %v4076_v17, 0.0 }
 0x932   :  { %5943 = vmatmul.msk.f32.gmra.mxu0 %vm346_vm3, %v4099_v61 }
 0x935   :  { %v4078_v37 = vpop.f32.mrf.mxu3 }
 0x936   :  { %v4079_v45 = vadd.f32 %v7890_v20, %v4078_v37 }
 0x938   :  { %v4100_v32 = vmax.f32 %v4079_v45, 0.0 }
 0x93a   :  { %5944 = vmatmul.msk.f32.gmra.mxu0 %vm346_vm3, %v4100_v32 }
 0x93d   :  { %v4081_v55 = vpop.f32.mrf.mxu3 }
 0x93e   :  { %v4082_v21 = vadd.f32 %v7890_v20, %v4081_v55 }
 0x940   :  { %v4101_v53 = vmax.f32 %v4082_v21, 0.0 }
 0x942   :  { %5945 = vmatmul.msk.f32.gmra.mxu0 %vm346_vm3, %v4101_v53 }
 0x945   :  { %v4084_v49 = vpop.f32.mrf.mxu3 }
 0x946   :  { %v4085_v27 = vadd.f32 %v7890_v20, %v4084_v49 }
 0x948   :  { %v4102_v16 = vmax.f32 %v4085_v27, 0.0  ;;  %v4390_v27 = vld [vmem:[%s8608_s2 + $0x460] sm:$0xff] }
 0x949   :  { %4457 = vmatpush.msra.mxu1 %v4390_v27 }
 0x94a   :  { %5946 = vmatmul.msk.f32.gmra.mxu0 %vm346_vm3, %v4102_v16 }
 0x94f   :  { %v4174_v23 = vpop.f32.mrf.mxu0 }
 0x950   :  { %v4175_v36 = vadd.f32 %v7939_v35, %v4174_v23 }
 0x952   :  { %v7943_v31 = vadd.f32 %v4175_v36, %v7781_v56 }
 0x954   :  { %v4238_v25 = vmax.f32 %v7943_v31, 0.0 }
 0x956   :  { %5947 = vmatmul.msk.f32.vlgmr.msra.gmra.mxu2 %vm346_vm3, %v4238_v25 }
 0x957   :  { %v4177_v19 = vpop.f32.mrf.mxu0 }
 0x958   :  { %v4178_v20 = vadd.f32 %v7939_v35, %v4177_v19 }
 0x95a   :  { %v7949_v2 = vadd.f32 %v4178_v20, %v7787_v62 }
 0x95c   :  { %v4239_v26 = vmax.f32 %v7949_v2, 0.0 }
 0x95e   :  { %5948 = vmatmul.msk.f32.gmra.mxu2 %vm346_vm3, %v4239_v26 }
 0x95f   :  { %v4180_v34 = vpop.f32.mrf.mxu0 }
 0x960   :  { %v4181_v15 = vadd.f32 %v7939_v35, %v4180_v34 }
 0x962   :  { %v7955_v56 = vadd.f32 %v4181_v15, %v7793_v50  ;;  %v8052_v15 = vld [vmem:[%s8608_s2 + $0x450] ss:$0 sm:$0xff] }
 0x964   :  { %v4240_v40 = vmax.f32 %v7955_v56, 0.0 }
 0x966   :  { %5949 = vmatmul.msk.f32.gmra.mxu2 %vm346_vm3, %v4240_v40 }
 0x967   :  { %v4183_v14 = vpop.f32.mrf.mxu0 }
 0x968   :  { %v4184_v12 = vadd.f32 %v7939_v35, %v4183_v14 }
 0x96a   :  { %v7961_v62 = vadd.f32 %v4184_v12, %v7799_v43 }
 0x96c   :  { %v4241_v11 = vmax.f32 %v7961_v62, 0.0 }
 0x96e   :  { %5950 = vmatmul.msk.f32.gmra.mxu2 %vm346_vm3, %v4241_v11 }
 0x96f   :  { %v4186_v13 = vpop.f32.mrf.mxu0 }
 0x970   :  { %v4187_v38 = vadd.f32 %v7939_v35, %v4186_v13 }
 0x972   :  { %v7967_v50 = vadd.f32 %v4187_v38, %v7805_v41 }
 0x974   :  { %v4242_v33 = vmax.f32 %v7967_v50, 0.0 }
 0x976   :  { %5951 = vmatmul.msk.f32.gmra.mxu2 %vm346_vm3, %v4242_v33 }
 0x977   :  { %v4189_v42 = vpop.f32.mrf.mxu0 }
 0x978   :  { %v4190_v58 = vadd.f32 %v7939_v35, %v4189_v42 }
 0x97a   :  { %v7973_v43 = vadd.f32 %v4190_v58, %v7811_v10 }
 0x97c   :  { %v4243_v60 = vmax.f32 %v7973_v43, 0.0 }
 0x97e   :  { %5952 = vmatmul.msk.f32.gmra.mxu2 %vm346_vm3, %v4243_v60 }
 0x97f   :  { %v4192_v18 = vpop.f32.mrf.mxu0 }
 0x980   :  { %v4193_v59 = vadd.f32 %v7939_v35, %v4192_v18 }
 0x982   :  { %v7979_v41 = vadd.f32 %v4193_v59, %v7817_v24 }
 0x984   :  { %v4244_v22 = vmax.f32 %v7979_v41, 0.0 }
 0x986   :  { %5953 = vmatmul.msk.f32.gmra.mxu2 %vm346_vm3, %v4244_v22 }
 0x987   :  { %v4195_v10 = vpop.f32.mrf.mxu0 }
 0x988   :  { %v4196_v57 = vadd.f32 %v7939_v35, %v4195_v10 }
 0x98a   :  { %v7988_v52 = vadd.f32 %v4196_v57, %v7826_v9  ;;  %v4543_v57 = vld [vmem:[%s8608_s2 + $0x498] sm:$0xff] }
 0x98b   :  { %4606 = vmatpush.msra.mxu3 %v4543_v57 }
 0x98c   :  { %v4245_v30 = vmax.f32 %v7988_v52, 0.0 }
 0x98e   :  { %5954 = vmatmul.msk.f32.gmra.mxu2 %vm346_vm3, %v4245_v30 }
 0x98f   :  { %v4198_v24 = vpop.f32.mrf.mxu0 }
 0x990   :  { %v4199_v5 = vadd.f32 %v7939_v35, %v4198_v24 }
 0x992   :  { %v7994_v8 = vadd.f32 %v4199_v5, %v7832_v63 }
 0x994   :  { %v4246_v47 = vmax.f32 %v7994_v8, 0.0 }
 0x996   :  { %5955 = vmatmul.msk.f32.gmra.mxu2 %vm346_vm3, %v4246_v47 }
 0x997   :  { %v4201_v48 = vpop.f32.mrf.mxu0 }
 0x998   :  { %v4202_v39 = vadd.f32 %v7939_v35, %v4201_v48 }
 0x99a   :  { %v8000_v9 = vadd.f32 %v4202_v39, %v7838_v3 }
 0x99c   :  { %v4247_v7 = vmax.f32 %v8000_v9, 0.0 }
 0x99e   :  { %5956 = vmatmul.msk.f32.gmra.mxu2 %vm346_vm3, %v4247_v7 }
 0x99f   :  { %v4204_v6 = vpop.f32.mrf.mxu0 }
 0x9a0   :  { %v4205_v17 = vadd.f32 %v7939_v35, %v4204_v6 }
 0x9a2   :  { %v8006_v63 = vadd.f32 %v4205_v17, %v7844_v44 }
 0x9a4   :  { %v4248_v61 = vmax.f32 %v8006_v63, 0.0 }
 0x9a6   :  { %5957 = vmatmul.msk.f32.gmra.mxu2 %vm346_vm3, %v4248_v61 }
 0x9a7   :  { %v4207_v3 = vpop.f32.mrf.mxu0 }
 0x9a8   :  { %v4208_v28 = vadd.f32 %v7939_v35, %v4207_v3 }
 0x9aa   :  { %v8015_v37 = vadd.f32 %v4208_v28, %v7853_v4  ;;  %v4542_v28 = vld [vmem:[%s8608_s2 + $0x490] sm:$0xff] }
 0x9ab   :  { %4607 = vmatpush.msra.mxu3 %v4542_v28 }
 0x9ac   :  { %v4249_v45 = vmax.f32 %v8015_v37, 0.0 }
 0x9ae   :  { %5958 = vmatmul.msk.f32.gmra.mxu2 %vm346_vm3, %v4249_v45 }
 0x9af   :  { %v4210_v44 = vpop.f32.mrf.mxu0 }
 0x9b0   :  { %v4211_v32 = vadd.f32 %v7939_v35, %v4210_v44 }
 0x9b2   :  { %v8021_v55 = vadd.f32 %v4211_v32, %v7859_v54  ;;  %v4389_v54 = vld [vmem:[%s8608_s2 + $0x458] sm:$0xff] }
 0x9b3   :  { %4458 = vmatpush.msra.mxu1 %v4389_v54 }
 0x9b4   :  { %v4250_v21 = vmax.f32 %v8021_v55, 0.0 }
 0x9b6   :  { %5959 = vmatmul.msk.f32.gmra.mxu2 %vm346_vm3, %v4250_v21 }
 0x9b7   :  { %v4213_v53 = vpop.f32.mrf.mxu0 }
 0x9b8   :  { %v4214_v49 = vadd.f32 %v7939_v35, %v4213_v53 }
 0x9ba   :  { %v8027_v4 = vadd.f32 %v4214_v49, %v7865_v0 }
 0x9bc   :  { %v4251_v16 = vmax.f32 %v8027_v4, 0.0 }
 0x9be   :  { %5960 = vmatmul.msk.f32.gmra.mxu2 %vm346_vm3, %v4251_v16 }
 0x9bf   :  { %v4216_v23 = vpop.f32.mrf.mxu0 }
 0x9c0   :  { %v4217_v36 = vadd.f32 %v7939_v35, %v4216_v23  ;;  %v4541_v23 = vld [vmem:[%s8608_s2 + $0x488] sm:$0xff] }
 0x9c1   :  { %4608 = vmatpush.msra.mxu3 %v4541_v23  ;;  %v4677_v23 = vld [vmem:[%s8608_s2 + $0x4b8] sm:$0xff] }
 0x9c2   :  { %v8039_v0 = vadd.f32 %v4217_v36, %v7877_v1  ;;  %v4540_v36 = vld [vmem:[%s8608_s2 + $0x480] sm:$0xff] }
 0x9c3   :  { %4609 = vmatpush.msra.mxu3 %v4540_v36 }
 0x9c4   :  { %v4252_v25 = vmax.f32 %v8039_v0, 0.0 }
 0x9c6   :  { %5961 = vmatmul.msk.f32.gmra.mxu2 %vm346_vm3, %v4252_v25 }
 0x9c7   :  { %v4219_v19 = vpop.f32.mrf.mxu0 }
 0x9c8   :  { %v4220_v20 = vadd.f32 %v7939_v35, %v4219_v19 }
 0x9ca   :  { %v8045_v26 = vadd.f32 %v4220_v20, %v7883_v29 }
 0x9cc   :  { %v4253_v34 = vmax.f32 %v8045_v26, 0.0 }
 0x9ce   :  { %5962 = vmatmul.msk.f32.gmra.mxu2 %vm346_vm3, %v4253_v34 }
 0x9d9   :  { %v4325_v1 = vpop.f32.mrf.mxu2 }
 0x9da   :  { %v4326_v40 = vadd.f32 %v8052_v15, %v4325_v1 }
 0x9dc   :  { %v4373_v14 = vmax.f32 %v4326_v40, 0.0 }
 0x9de   :  { %5963 = vmatmul.msk.f32.vlgmr.msra.gmra.mxu1 %vm346_vm3, %v4373_v14 }
 0x9e1   :  { %v4328_v12 = vpop.f32.mrf.mxu2 }
 0x9e2   :  { %v4329_v35 = vadd.f32 %v8052_v15, %v4328_v12 }
 0x9e4   :  { %v4374_v29 = vmax.f32 %v4329_v35, 0.0 }
 0x9e6   :  { %5964 = vmatmul.msk.f32.gmra.mxu1 %vm346_vm3, %v4374_v29  ;;  %v8101_v29 = vld [vmem:[%s8608_s2 + $0x478] ss:$0 sm:$0xff] }
 0x9e9   :  { %v4331_v11 = vpop.f32.mrf.mxu2 }
 0x9ea   :  { %v4332_v13 = vadd.f32 %v8052_v15, %v4331_v11 }
 0x9ec   :  { %v4375_v38 = vmax.f32 %v4332_v13, 0.0 }
 0x9ee   :  { %5965 = vmatmul.msk.f32.gmra.mxu1 %vm346_vm3, %v4375_v38 }
 0x9f1   :  { %v4334_v33 = vpop.f32.mrf.mxu2 }
 0x9f2   :  { %v4335_v42 = vadd.f32 %v8052_v15, %v4334_v33 }
 0x9f4   :  { %v4376_v58 = vmax.f32 %v4335_v42, 0.0 }
 0x9f6   :  { %5966 = vmatmul.msk.f32.gmra.mxu1 %vm346_vm3, %v4376_v58 }
 0x9f9   :  { %v4337_v60 = vpop.f32.mrf.mxu2 }
 0x9fa   :  { %v4338_v18 = vadd.f32 %v8052_v15, %v4337_v60 }
 0x9fc   :  { %v4377_v59 = vmax.f32 %v4338_v18, 0.0 }
 0x9fe   :  { %5967 = vmatmul.msk.f32.gmra.mxu1 %vm346_vm3, %v4377_v59 }
 0xa01   :  { %v4340_v22 = vpop.f32.mrf.mxu2 }
 0xa02   :  { %v4341_v51 = vadd.f32 %v8052_v15, %v4340_v22 }
 0xa04   :  { %v4378_v10 = vmax.f32 %v4341_v51, 0.0 }
 0xa06   :  { %5968 = vmatmul.msk.f32.gmra.mxu1 %vm346_vm3, %v4378_v10 }
 0xa09   :  { %v4343_v30 = vpop.f32.mrf.mxu2 }
 0xa0a   :  { %v4344_v24 = vadd.f32 %v8052_v15, %v4343_v30 }
 0xa0c   :  { %v4379_v5 = vmax.f32 %v4344_v24, 0.0 }
 0xa0e   :  { %5969 = vmatmul.msk.f32.gmra.mxu1 %vm346_vm3, %v4379_v5 }
 0xa11   :  { %v4346_v47 = vpop.f32.mrf.mxu2 }
 0xa12   :  { %v4347_v48 = vadd.f32 %v8052_v15, %v4346_v47 }
 0xa14   :  { %v4380_v39 = vmax.f32 %v4347_v48, 0.0 }
 0xa16   :  { %5970 = vmatmul.msk.f32.gmra.mxu1 %vm346_vm3, %v4380_v39 }
 0xa19   :  { %v4349_v7 = vpop.f32.mrf.mxu2 }
 0xa1a   :  { %v4350_v6 = vadd.f32 %v8052_v15, %v4349_v7 }
 0xa1c   :  { %v4381_v17 = vmax.f32 %v4350_v6, 0.0 }
 0xa1e   :  { %5971 = vmatmul.msk.f32.gmra.mxu1 %vm346_vm3, %v4381_v17 }
 0xa21   :  { %v4352_v61 = vpop.f32.mrf.mxu2 }
 0xa22   :  { %v4353_v46 = vadd.f32 %v8052_v15, %v4352_v61  ;;  %v4678_v61 = vld [vmem:[%s8608_s2 + $0x4c0] sm:$0xff] }
 0xa23   :  { %4741 = vmatpush.msra.mxu0 %v4678_v61 }
 0xa24   :  { %v4382_v3 = vmax.f32 %v4353_v46, 0.0 }
 0xa25   :  { %4742 = vmatpush.msra.mxu0 %v4677_v23 }
 0xa26   :  { %5972 = vmatmul.msk.f32.gmra.mxu1 %vm346_vm3, %v4382_v3 }
 0xa29   :  { %v4355_v45 = vpop.f32.mrf.mxu2 }
 0xa2a   :  { %v4356_v44 = vadd.f32 %v8052_v15, %v4355_v45 }
 0xa2c   :  { %v4383_v32 = vmax.f32 %v4356_v44, 0.0 }
 0xa2e   :  { %5973 = vmatmul.msk.f32.gmra.mxu1 %vm346_vm3, %v4383_v32 }
 0xa31   :  { %v4358_v21 = vpop.f32.mrf.mxu2 }
 0xa32   :  { %v4359_v53 = vadd.f32 %v8052_v15, %v4358_v21 }
 0xa34   :  { %v4384_v49 = vmax.f32 %v4359_v53, 0.0 }
 0xa36   :  { %5974 = vmatmul.msk.f32.gmra.mxu1 %vm346_vm3, %v4384_v49 }
 0xa39   :  { %v4361_v27 = vpop.f32.mrf.mxu2 }
 0xa3a   :  { %v4362_v16 = vadd.f32 %v8052_v15, %v4361_v27 }
 0xa3c   :  { %v4385_v54 = vmax.f32 %v4362_v16, 0.0 }
 0xa3e   :  { %5975 = vmatmul.msk.f32.gmra.mxu1 %vm346_vm3, %v4385_v54 }
 0xa41   :  { %v4364_v25 = vpop.f32.mrf.mxu2 }
 0xa42   :  { %v4365_v19 = vadd.f32 %v8052_v15, %v4364_v25 }
 0xa44   :  { %v4386_v20 = vmax.f32 %v4365_v19, 0.0 }
 0xa46   :  { %5976 = vmatmul.msk.f32.gmra.mxu1 %vm346_vm3, %v4386_v20 }
 0xa49   :  { %v4367_v34 = vpop.f32.mrf.mxu2 }
 0xa4a   :  { %v4368_v1 = vadd.f32 %v8052_v15, %v4367_v34 }
 0xa4c   :  { %v4387_v40 = vmax.f32 %v4368_v1, 0.0 }
 0xa4e   :  { %5977 = vmatmul.msk.f32.gmra.mxu1 %vm346_vm3, %v4387_v40 }
 0xa51   :  { %v4370_v14 = vpop.f32.mrf.mxu2 }
 0xa52   :  { %v4371_v12 = vadd.f32 %v8052_v15, %v4370_v14 }
 0xa54   :  { %v4388_v35 = vmax.f32 %v4371_v12, 0.0  ;;  %v4676_v12 = vld [vmem:[%s8608_s2 + $0x4b0] sm:$0xff] }
 0xa55   :  { %4743 = vmatpush.msra.mxu0 %v4676_v12 }
 0xa56   :  { %5978 = vmatmul.msk.f32.gmra.mxu1 %vm346_vm3, %v4388_v35 }
 0xa5b   :  { %v4460_v11 = vpop.f32.mrf.mxu1 }
 0xa5c   :  { %v4461_v13 = vadd.f32 %v8101_v29, %v4460_v11 }
 0xa5e   :  { %v8105_v38 = vadd.f32 %v4461_v13, %v7943_v31 }
 0xa60   :  { %v4524_v33 = vmax.f32 %v8105_v38, 0.0 }
 0xa62   :  { %5979 = vmatmul.msk.f32.vlgmr.msra.gmra.mxu3 %vm346_vm3, %v4524_v33 }
 0xa63   :  { %v4463_v42 = vpop.f32.mrf.mxu1 }
 0xa64   :  { %v4464_v15 = vadd.f32 %v8101_v29, %v4463_v42 }
 0xa66   :  { %v8111_v58 = vadd.f32 %v4464_v15, %v7949_v2 }
 0xa68   :  { %v4525_v60 = vmax.f32 %v8111_v58, 0.0 }
 0xa6a   :  { %5980 = vmatmul.msk.f32.gmra.mxu3 %vm346_vm3, %v4525_v60 }
 0xa6b   :  { %v4466_v18 = vpop.f32.mrf.mxu1 }
 0xa6c   :  { %v4467_v59 = vadd.f32 %v8101_v29, %v4466_v18 }
 0xa6e   :  { %v8117_v31 = vadd.f32 %v4467_v59, %v7955_v56  ;;  %v8214_v59 = vld [vmem:[%s8608_s2 + $0x4a0] ss:$0 sm:$0xff] }
 0xa70   :  { %v4526_v22 = vmax.f32 %v8117_v31, 0.0 }
 0xa72   :  { %5981 = vmatmul.msk.f32.gmra.mxu3 %vm346_vm3, %v4526_v22 }
 0xa73   :  { %v4469_v51 = vpop.f32.mrf.mxu1 }
 0xa74   :  { %v4470_v10 = vadd.f32 %v8101_v29, %v4469_v51 }
 0xa76   :  { %v8123_v2 = vadd.f32 %v4470_v10, %v7961_v62 }
 0xa78   :  { %v4527_v57 = vmax.f32 %v8123_v2, 0.0 }
 0xa7a   :  { %5982 = vmatmul.msk.f32.gmra.mxu3 %vm346_vm3, %v4527_v57 }
 0xa7b   :  { %v4472_v30 = vpop.f32.mrf.mxu1 }
 0xa7c   :  { %v4473_v24 = vadd.f32 %v8101_v29, %v4472_v30 }
 0xa7e   :  { %v8129_v56 = vadd.f32 %v4473_v24, %v7967_v50 }
 0xa80   :  { %v4528_v5 = vmax.f32 %v8129_v56, 0.0 }
 0xa82   :  { %5983 = vmatmul.msk.f32.gmra.mxu3 %vm346_vm3, %v4528_v5 }
 0xa83   :  { %v4475_v47 = vpop.f32.mrf.mxu1 }
 0xa84   :  { %v4476_v48 = vadd.f32 %v8101_v29, %v4475_v47 }
 0xa86   :  { %v8135_v62 = vadd.f32 %v4476_v48, %v7973_v43 }
 0xa88   :  { %v4529_v39 = vmax.f32 %v8135_v62, 0.0 }
 0xa8a   :  { %5984 = vmatmul.msk.f32.gmra.mxu3 %vm346_vm3, %v4529_v39 }
 0xa8b   :  { %v4478_v7 = vpop.f32.mrf.mxu1 }
 0xa8c   :  { %v4479_v6 = vadd.f32 %v8101_v29, %v4478_v7 }
 0xa8e   :  { %v8141_v50 = vadd.f32 %v4479_v6, %v7979_v41 }
 0xa90   :  { %v4530_v17 = vmax.f32 %v8141_v50, 0.0 }
 0xa92   :  { %5985 = vmatmul.msk.f32.gmra.mxu3 %vm346_vm3, %v4530_v17 }
 0xa93   :  { %v4481_v43 = vpop.f32.mrf.mxu1 }
 0xa94   :  { %v4482_v46 = vadd.f32 %v8101_v29, %v4481_v43 }
 0xa96   :  { %v8150_v3 = vadd.f32 %v4482_v46, %v7988_v52  ;;  %v4829_v46 = vld [vmem:[%s8608_s2 + $0x4e8] sm:$0xff] }
 0xa97   :  { %4892 = vmatpush.msrb.mxu2 %v4829_v46 }
 0xa98   :  { %v4531_v28 = vmax.f32 %v8150_v3, 0.0 }
 0xa9a   :  { %5986 = vmatmul.msk.f32.gmra.mxu3 %vm346_vm3, %v4531_v28 }
 0xa9b   :  { %v4484_v41 = vpop.f32.mrf.mxu1 }
 0xa9c   :  { %v4485_v45 = vadd.f32 %v8101_v29, %v4484_v41 }
 0xa9e   :  { %v8156_v44 = vadd.f32 %v4485_v45, %v7994_v8 }
 0xaa0   :  { %v4532_v32 = vmax.f32 %v8156_v44, 0.0 }
 0xaa2   :  { %5987 = vmatmul.msk.f32.gmra.mxu3 %vm346_vm3, %v4532_v32 }
 0xaa3   :  { %v4487_v21 = vpop.f32.mrf.mxu1 }
 0xaa4   :  { %v4488_v53 = vadd.f32 %v8101_v29, %v4487_v21 }
 0xaa6   :  { %v8162_v52 = vadd.f32 %v4488_v53, %v8000_v9 }
 0xaa8   :  { %v4533_v49 = vmax.f32 %v8162_v52, 0.0 }
 0xaaa   :  { %5988 = vmatmul.msk.f32.gmra.mxu3 %vm346_vm3, %v4533_v49 }
 0xaab   :  { %v4490_v27 = vpop.f32.mrf.mxu1 }
 0xaac   :  { %v4491_v16 = vadd.f32 %v8101_v29, %v4490_v27 }
 0xaae   :  { %v8168_v8 = vadd.f32 %v4491_v16, %v8006_v63 }
 0xab0   :  { %v4534_v54 = vmax.f32 %v8168_v8, 0.0 }
 0xab2   :  { %5989 = vmatmul.msk.f32.gmra.mxu3 %vm346_vm3, %v4534_v54 }
 0xab3   :  { %v4493_v9 = vpop.f32.mrf.mxu1 }
 0xab4   :  { %v4494_v36 = vadd.f32 %v8101_v29, %v4493_v9 }
 0xab6   :  { %v8177_v25 = vadd.f32 %v4494_v36, %v8015_v37  ;;  %v4828_v36 = vld [vmem:[%s8608_s2 + $0x4e0] sm:$0xff] }
 0xab7   :  { %4893 = vmatpush.msrb.mxu2 %v4828_v36 }
 0xab8   :  { %v4535_v19 = vmax.f32 %v8177_v25, 0.0 }
 0xaba   :  { %5990 = vmatmul.msk.f32.gmra.mxu3 %vm346_vm3, %v4535_v19 }
 0xabb   :  { %v4496_v63 = vpop.f32.mrf.mxu1 }
 0xabc   :  { %v4497_v20 = vadd.f32 %v8101_v29, %v4496_v63 }
 0xabe   :  { %v8183_v34 = vadd.f32 %v4497_v20, %v8021_v55  ;;  %v4675_v55 = vld [vmem:[%s8608_s2 + $0x4a8] sm:$0xff] }
 0xabf   :  { %4744 = vmatpush.msra.mxu0 %v4675_v55 }
 0xac0   :  { %v4536_v1 = vmax.f32 %v8183_v34, 0.0 }
 0xac2   :  { %5991 = vmatmul.msk.f32.gmra.mxu3 %vm346_vm3, %v4536_v1 }
 0xac3   :  { %v4499_v40 = vpop.f32.mrf.mxu1 }
 0xac4   :  { %v4500_v14 = vadd.f32 %v8101_v29, %v4499_v40 }
 0xac6   :  { %v8189_v37 = vadd.f32 %v4500_v14, %v8027_v4 }
 0xac8   :  { %v4537_v35 = vmax.f32 %v8189_v37, 0.0 }
 0xaca   :  { %5992 = vmatmul.msk.f32.gmra.mxu3 %vm346_vm3, %v4537_v35 }
 0xacb   :  { %v4502_v11 = vpop.f32.mrf.mxu1 }
 0xacc   :  { %v4503_v13 = vadd.f32 %v8101_v29, %v4502_v11  ;;  %v4827_v11 = vld [vmem:[%s8608_s2 + $0x4d8] sm:$0xff] }
 0xacd   :  { %4894 = vmatpush.msrb.mxu2 %v4827_v11  ;;  %v4963_v11 = vld [vmem:[%s8608_s2 + $0x508] sm:$0xff] }
 0xace   :  { %v8201_v4 = vadd.f32 %v4503_v13, %v8039_v0  ;;  %v4826_v13 = vld [vmem:[%s8608_s2 + $0x4d0] sm:$0xff] }
 0xacf   :  { %4895 = vmatpush.msrb.mxu2 %v4826_v13 }
 0xad0   :  { %v4538_v33 = vmax.f32 %v8201_v4, 0.0 }
 0xad2   :  { %5993 = vmatmul.msk.f32.gmra.mxu3 %vm346_vm3, %v4538_v33 }
 0xad3   :  { %v4505_v42 = vpop.f32.mrf.mxu1 }
 0xad4   :  { %v4506_v15 = vadd.f32 %v8101_v29, %v4505_v42 }
 0xad6   :  { %v8207_v60 = vadd.f32 %v4506_v15, %v8045_v26 }
 0xad8   :  { %v4539_v18 = vmax.f32 %v8207_v60, 0.0 }
 0xada   :  { %5994 = vmatmul.msk.f32.gmra.mxu3 %vm346_vm3, %v4539_v18 }
 0xae5   :  { %v4611_v0 = vpop.f32.mrf.mxu3 }
 0xae6   :  { %v4612_v22 = vadd.f32 %v8214_v59, %v4611_v0 }
 0xae8   :  { %v4659_v51 = vmax.f32 %v4612_v22, 0.0 }
 0xaea   :  { %5995 = vmatmul.msk.f32.vlgmr.msra.gmra.mxu0 %vm346_vm3, %v4659_v51 }
 0xaed   :  { %v4614_v10 = vpop.f32.mrf.mxu3 }
 0xaee   :  { %v4615_v29 = vadd.f32 %v8214_v59, %v4614_v10 }
 0xaf0   :  { %v4660_v26 = vmax.f32 %v4615_v29, 0.0 }
 0xaf2   :  { %5996 = vmatmul.msk.f32.gmra.mxu0 %vm346_vm3, %v4660_v26  ;;  %v8263_v26 = vld [vmem:[%s8608_s2 + $0x4c8] ss:$0 sm:$0xff] }
 0xaf5   :  { %v4617_v57 = vpop.f32.mrf.mxu3 }
 0xaf6   :  { %v4618_v30 = vadd.f32 %v8214_v59, %v4617_v57 }
 0xaf8   :  { %v4661_v24 = vmax.f32 %v4618_v30, 0.0 }
 0xafa   :  { %5997 = vmatmul.msk.f32.gmra.mxu0 %vm346_vm3, %v4661_v24 }
 0xafd   :  { %v4620_v5 = vpop.f32.mrf.mxu3 }
 0xafe   :  { %v4621_v47 = vadd.f32 %v8214_v59, %v4620_v5 }
 0xb00   :  { %v4662_v48 = vmax.f32 %v4621_v47, 0.0 }
 0xb02   :  { %5998 = vmatmul.msk.f32.gmra.mxu0 %vm346_vm3, %v4662_v48 }
 0xb05   :  { %v4623_v39 = vpop.f32.mrf.mxu3 }
 0xb06   :  { %v4624_v7 = vadd.f32 %v8214_v59, %v4623_v39 }
 0xb08   :  { %v4663_v6 = vmax.f32 %v4624_v7, 0.0 }
 0xb0a   :  { %5999 = vmatmul.msk.f32.gmra.mxu0 %vm346_vm3, %v4663_v6 }
 0xb0d   :  { %v4626_v17 = vpop.f32.mrf.mxu3 }
 0xb0e   :  { %v4627_v61 = vadd.f32 %v8214_v59, %v4626_v17 }
 0xb10   :  { %v4664_v43 = vmax.f32 %v4627_v61, 0.0 }
 0xb12   :  { %6000 = vmatmul.msk.f32.gmra.mxu0 %vm346_vm3, %v4664_v43 }
 0xb15   :  { %v4629_v28 = vpop.f32.mrf.mxu3 }
 0xb16   :  { %v4630_v41 = vadd.f32 %v8214_v59, %v4629_v28 }
 0xb18   :  { %v4665_v45 = vmax.f32 %v4630_v41, 0.0 }
 0xb1a   :  { %6001 = vmatmul.msk.f32.gmra.mxu0 %vm346_vm3, %v4665_v45 }
 0xb1d   :  { %v4632_v32 = vpop.f32.mrf.mxu3 }
 0xb1e   :  { %v4633_v21 = vadd.f32 %v8214_v59, %v4632_v32 }
 0xb20   :  { %v4666_v53 = vmax.f32 %v4633_v21, 0.0 }
 0xb22   :  { %6002 = vmatmul.msk.f32.gmra.mxu0 %vm346_vm3, %v4666_v53 }
 0xb25   :  { %v4635_v49 = vpop.f32.mrf.mxu3 }
 0xb26   :  { %v4636_v27 = vadd.f32 %v8214_v59, %v4635_v49 }
 0xb28   :  { %v4667_v16 = vmax.f32 %v4636_v27, 0.0 }
 0xb2a   :  { %6003 = vmatmul.msk.f32.gmra.mxu0 %vm346_vm3, %v4667_v16 }
 0xb2d   :  { %v4638_v54 = vpop.f32.mrf.mxu3 }
 0xb2e   :  { %v4639_v23 = vadd.f32 %v8214_v59, %v4638_v54  ;;  %v4964_v54 = vld [vmem:[%s8608_s2 + $0x510] sm:$0xff] }
 0xb2f   :  { %5027 = vmatpush.msrb.mxu1 %v4964_v54 }
 0xb30   :  { %v4668_v9 = vmax.f32 %v4639_v23, 0.0 }
 0xb31   :  { %5028 = vmatpush.msrb.mxu1 %v4963_v11 }
 0xb32   :  { %6004 = vmatmul.msk.f32.gmra.mxu0 %vm346_vm3, %v4668_v9 }
 0xb35   :  { %v4641_v19 = vpop.f32.mrf.mxu3 }
 0xb36   :  { %v4642_v63 = vadd.f32 %v8214_v59, %v4641_v19 }
 0xb38   :  { %v4669_v20 = vmax.f32 %v4642_v63, 0.0 }
 0xb3a   :  { %6005 = vmatmul.msk.f32.gmra.mxu0 %vm346_vm3, %v4669_v20 }
 0xb3d   :  { %v4644_v1 = vpop.f32.mrf.mxu3 }
 0xb3e   :  { %v4645_v40 = vadd.f32 %v8214_v59, %v4644_v1 }
 0xb40   :  { %v4670_v14 = vmax.f32 %v4645_v40, 0.0 }
 0xb42   :  { %6006 = vmatmul.msk.f32.gmra.mxu0 %vm346_vm3, %v4670_v14 }
 0xb45   :  { %v4647_v12 = vpop.f32.mrf.mxu3 }
 0xb46   :  { %v4648_v35 = vadd.f32 %v8214_v59, %v4647_v12 }
 0xb48   :  { %v4671_v55 = vmax.f32 %v4648_v35, 0.0 }
 0xb4a   :  { %6007 = vmatmul.msk.f32.gmra.mxu0 %vm346_vm3, %v4671_v55 }
 0xb4d   :  { %v4650_v33 = vpop.f32.mrf.mxu3 }
 0xb4e   :  { %v4651_v42 = vadd.f32 %v8214_v59, %v4650_v33 }
 0xb50   :  { %v4672_v15 = vmax.f32 %v4651_v42, 0.0 }
 0xb52   :  { %6008 = vmatmul.msk.f32.gmra.mxu0 %vm346_vm3, %v4672_v15 }
 0xb55   :  { %v4653_v18 = vpop.f32.mrf.mxu3 }
 0xb56   :  { %v4654_v0 = vadd.f32 %v8214_v59, %v4653_v18 }
 0xb58   :  { %v4673_v22 = vmax.f32 %v4654_v0, 0.0 }
 0xb5a   :  { %6009 = vmatmul.msk.f32.gmra.mxu0 %vm346_vm3, %v4673_v22 }
 0xb5d   :  { %v4656_v51 = vpop.f32.mrf.mxu3 }
 0xb5e   :  { %v4657_v10 = vadd.f32 %v8214_v59, %v4656_v51 }
 0xb60   :  { %v4674_v29 = vmax.f32 %v4657_v10, 0.0  ;;  %v4962_v10 = vld [vmem:[%s8608_s2 + $0x500] sm:$0xff] }
 0xb61   :  { %5029 = vmatpush.msrb.mxu1 %v4962_v10 }
 0xb62   :  { %6010 = vmatmul.msk.f32.gmra.mxu0 %vm346_vm3, %v4674_v29 }
 0xb67   :  { %v4746_v57 = vpop.f32.mrf.mxu0 }
 0xb68   :  { %v4747_v30 = vadd.f32 %v8263_v26, %v4746_v57 }
 0xb6a   :  { %v8267_v24 = vadd.f32 %v4747_v30, %v8105_v38 }
 0xb6c   :  { %v4810_v5 = vmax.f32 %v8267_v24, 0.0 }
 0xb6e   :  { %6011 = vmatmul.msk.f32.vlgmr.msrb.gmra.mxu2 %vm346_vm3, %v4810_v5 }
 0xb6f   :  { %v4749_v47 = vpop.f32.mrf.mxu0 }
 0xb70   :  { %v4750_v59 = vadd.f32 %v8263_v26, %v4749_v47 }
 0xb72   :  { %v8273_v48 = vadd.f32 %v4750_v59, %v8111_v58 }
 0xb74   :  { %v4811_v39 = vmax.f32 %v8273_v48, 0.0 }
 0xb76   :  { %6012 = vmatmul.msk.f32.gmra.mxu2 %vm346_vm3, %v4811_v39 }
 0xb77   :  { %v4752_v7 = vpop.f32.mrf.mxu0 }
 0xb78   :  { %v4753_v6 = vadd.f32 %v8263_v26, %v4752_v7 }
 0xb7a   :  { %v8279_v38 = vadd.f32 %v4753_v6, %v8117_v31  ;;  %v8376_v6 = vld [vmem:[%s8608_s2 + $0x4f0] ss:$0 sm:$0xff] }
 0xb7c   :  { %v4812_v17 = vmax.f32 %v8279_v38, 0.0 }
 0xb7e   :  { %6013 = vmatmul.msk.f32.gmra.mxu2 %vm346_vm3, %v4812_v17 }
 0xb7f   :  { %v4755_v61 = vpop.f32.mrf.mxu0 }
 0xb80   :  { %v4756_v43 = vadd.f32 %v8263_v26, %v4755_v61 }
 0xb82   :  { %v8285_v58 = vadd.f32 %v4756_v43, %v8123_v2 }
 0xb84   :  { %v4813_v46 = vmax.f32 %v8285_v58, 0.0 }
 0xb86   :  { %6014 = vmatmul.msk.f32.gmra.mxu2 %vm346_vm3, %v4813_v46 }
 0xb87   :  { %v4758_v28 = vpop.f32.mrf.mxu0 }
 0xb88   :  { %v4759_v41 = vadd.f32 %v8263_v26, %v4758_v28 }
 0xb8a   :  { %v8291_v31 = vadd.f32 %v4759_v41, %v8129_v56 }
 0xb8c   :  { %v4814_v45 = vmax.f32 %v8291_v31, 0.0 }
 0xb8e   :  { %6015 = vmatmul.msk.f32.gmra.mxu2 %vm346_vm3, %v4814_v45 }
 0xb8f   :  { %v4761_v32 = vpop.f32.mrf.mxu0 }
 0xb90   :  { %v4762_v21 = vadd.f32 %v8263_v26, %v4761_v32 }
 0xb92   :  { %v8297_v2 = vadd.f32 %v4762_v21, %v8135_v62 }
 0xb94   :  { %v4815_v53 = vmax.f32 %v8297_v2, 0.0 }
 0xb96   :  { %6016 = vmatmul.msk.f32.gmra.mxu2 %vm346_vm3, %v4815_v53 }
 0xb97   :  { %v4764_v49 = vpop.f32.mrf.mxu0 }
 0xb98   :  { %v4765_v27 = vadd.f32 %v8263_v26, %v4764_v49 }
 0xb9a   :  { %v8303_v56 = vadd.f32 %v4765_v27, %v8141_v50 }
 0xb9c   :  { %v4816_v16 = vmax.f32 %v8303_v56, 0.0 }
 0xb9e   :  { %6017 = vmatmul.msk.f32.gmra.mxu2 %vm346_vm3, %v4816_v16 }
 0xb9f   :  { %v4767_v62 = vpop.f32.mrf.mxu0 }
 0xba0   :  { %v4768_v23 = vadd.f32 %v8263_v26, %v4767_v62 }
 0xba2   :  { %v8312_v9 = vadd.f32 %v4768_v23, %v8150_v3  ;;  %v5115_v23 = vld [vmem:[%s8608_s2 + $0x538] sm:$0xff] }
 0xba3   :  { %5178 = vmatpush.msrb.mxu3 %v5115_v23 }
 0xba4   :  { %v4817_v36 = vmax.f32 %v8312_v9, 0.0 }
 0xba6   :  { %6018 = vmatmul.msk.f32.gmra.mxu2 %vm346_vm3, %v4817_v36 }
 0xba7   :  { %v4770_v50 = vpop.f32.mrf.mxu0 }
 0xba8   :  { %v4771_v19 = vadd.f32 %v8263_v26, %v4770_v50 }
 0xbaa   :  { %v8318_v63 = vadd.f32 %v4771_v19, %v8156_v44 }
 0xbac   :  { %v4818_v20 = vmax.f32 %v8318_v63, 0.0 }
 0xbae   :  { %6019 = vmatmul.msk.f32.gmra.mxu2 %vm346_vm3, %v4818_v20 }
 0xbaf   :  { %v4773_v1 = vpop.f32.mrf.mxu0 }
 0xbb0   :  { %v4774_v40 = vadd.f32 %v8263_v26, %v4773_v1 }
 0xbb2   :  { %v8324_v3 = vadd.f32 %v4774_v40, %v8162_v52 }
 0xbb4   :  { %v4819_v14 = vmax.f32 %v8324_v3, 0.0 }
 0xbb6   :  { %6020 = vmatmul.msk.f32.gmra.mxu2 %vm346_vm3, %v4819_v14 }
 0xbb7   :  { %v4776_v12 = vpop.f32.mrf.mxu0 }
 0xbb8   :  { %v4777_v35 = vadd.f32 %v8263_v26, %v4776_v12 }
 0xbba   :  { %v8330_v44 = vadd.f32 %v4777_v35, %v8168_v8 }
 0xbbc   :  { %v4820_v55 = vmax.f32 %v8330_v44, 0.0 }
 0xbbe   :  { %6021 = vmatmul.msk.f32.gmra.mxu2 %vm346_vm3, %v4820_v55 }
 0xbbf   :  { %v4779_v52 = vpop.f32.mrf.mxu0 }
 0xbc0   :  { %v4780_v13 = vadd.f32 %v8263_v26, %v4779_v52 }
 0xbc2   :  { %v8339_v33 = vadd.f32 %v4780_v13, %v8177_v25  ;;  %v5114_v13 = vld [vmem:[%s8608_s2 + $0x530] sm:$0xff] }
 0xbc3   :  { %5179 = vmatpush.msrb.mxu3 %v5114_v13 }
 0xbc4   :  { %v4821_v42 = vmax.f32 %v8339_v33, 0.0 }
 0xbc6   :  { %6022 = vmatmul.msk.f32.gmra.mxu2 %vm346_vm3, %v4821_v42 }
 0xbc7   :  { %v4782_v8 = vpop.f32.mrf.mxu0 }
 0xbc8   :  { %v4783_v15 = vadd.f32 %v8263_v26, %v4782_v8 }
 0xbca   :  { %v8345_v18 = vadd.f32 %v4783_v15, %v8183_v34  ;;  %v4961_v34 = vld [vmem:[%s8608_s2 + $0x4f8] sm:$0xff] }
 0xbcb   :  { %5030 = vmatpush.msrb.mxu1 %v4961_v34 }
 0xbcc   :  { %v4822_v0 = vmax.f32 %v8345_v18, 0.0 }
 0xbce   :  { %6023 = vmatmul.msk.f32.gmra.mxu2 %vm346_vm3, %v4822_v0 }
 0xbcf   :  { %v4785_v22 = vpop.f32.mrf.mxu0 }
 0xbd0   :  { %v4786_v51 = vadd.f32 %v8263_v26, %v4785_v22 }
 0xbd2   :  { %v8351_v25 = vadd.f32 %v4786_v51, %v8189_v37 }
 0xbd4   :  { %v4823_v29 = vmax.f32 %v8351_v25, 0.0 }
 0xbd6   :  { %6024 = vmatmul.msk.f32.gmra.mxu2 %vm346_vm3, %v4823_v29 }
 0xbd7   :  { %v4788_v57 = vpop.f32.mrf.mxu0 }
 0xbd8   :  { %v4789_v30 = vadd.f32 %v8263_v26, %v4788_v57  ;;  %v5113_v57 = vld [vmem:[%s8608_s2 + $0x528] sm:$0xff] }
 0xbd9   :  { %5180 = vmatpush.msrb.mxu3 %v5113_v57  ;;  %v5249_v57 = vld [vmem:[%s8608_s2 + $0x558] sm:$0xff] }
 0xbda   :  { %v8363_v37 = vadd.f32 %v4789_v30, %v8201_v4  ;;  %v5112_v30 = vld [vmem:[%s8608_s2 + $0x520] sm:$0xff] }
 0xbdb   :  { %5181 = vmatpush.msrb.mxu3 %v5112_v30 }
 0xbdc   :  { %v4824_v5 = vmax.f32 %v8363_v37, 0.0 }
 0xbde   :  { %6025 = vmatmul.msk.f32.gmra.mxu2 %vm346_vm3, %v4824_v5 }
 0xbdf   :  { %v4791_v47 = vpop.f32.mrf.mxu0 }
 0xbe0   :  { %v4792_v59 = vadd.f32 %v8263_v26, %v4791_v47 }
 0xbe2   :  { %v8369_v39 = vadd.f32 %v4792_v59, %v8207_v60 }
 0xbe4   :  { %v4825_v7 = vmax.f32 %v8369_v39, 0.0 }
 0xbe6   :  { %6026 = vmatmul.msk.f32.gmra.mxu2 %vm346_vm3, %v4825_v7 }
 0xbf1   :  { %v4897_v4 = vpop.f32.mrf.mxu2 }
 0xbf2   :  { %v4898_v17 = vadd.f32 %v8376_v6, %v4897_v4 }
 0xbf4   :  { %v4945_v61 = vmax.f32 %v4898_v17, 0.0 }
 0xbf6   :  { %6027 = vmatmul.msk.f32.vlgmr.msrb.gmra.mxu1 %vm346_vm3, %v4945_v61 }
 0xbf9   :  { %v4900_v43 = vpop.f32.mrf.mxu2 }
 0xbfa   :  { %v4901_v26 = vadd.f32 %v8376_v6, %v4900_v43 }
 0xbfc   :  { %v4946_v60 = vmax.f32 %v4901_v26, 0.0 }
 0xbfe   :  { %6028 = vmatmul.msk.f32.gmra.mxu1 %vm346_vm3, %v4946_v60  ;;  %v8425_v60 = vld [vmem:[%s8608_s2 + $0x518] ss:$0 sm:$0xff] }
 0xc01   :  { %v4903_v46 = vpop.f32.mrf.mxu2 }
 0xc02   :  { %v4904_v28 = vadd.f32 %v8376_v6, %v4903_v46 }
 0xc04   :  { %v4947_v41 = vmax.f32 %v4904_v28, 0.0 }
 0xc06   :  { %6029 = vmatmul.msk.f32.gmra.mxu1 %vm346_vm3, %v4947_v41 }
 0xc09   :  { %v4906_v45 = vpop.f32.mrf.mxu2 }
 0xc0a   :  { %v4907_v32 = vadd.f32 %v8376_v6, %v4906_v45 }
 0xc0c   :  { %v4948_v21 = vmax.f32 %v4907_v32, 0.0 }
 0xc0e   :  { %6030 = vmatmul.msk.f32.gmra.mxu1 %vm346_vm3, %v4948_v21 }
 0xc11   :  { %v4909_v53 = vpop.f32.mrf.mxu2 }
 0xc12   :  { %v4910_v49 = vadd.f32 %v8376_v6, %v4909_v53 }
 0xc14   :  { %v4949_v27 = vmax.f32 %v4910_v49, 0.0 }
 0xc16   :  { %6031 = vmatmul.msk.f32.gmra.mxu1 %vm346_vm3, %v4949_v27 }
 0xc19   :  { %v4912_v16 = vpop.f32.mrf.mxu2 }
 0xc1a   :  { %v4913_v54 = vadd.f32 %v8376_v6, %v4912_v16 }
 0xc1c   :  { %v4950_v62 = vmax.f32 %v4913_v54, 0.0 }
 0xc1e   :  { %6032 = vmatmul.msk.f32.gmra.mxu1 %vm346_vm3, %v4950_v62 }
 0xc21   :  { %v4915_v36 = vpop.f32.mrf.mxu2 }
 0xc22   :  { %v4916_v50 = vadd.f32 %v8376_v6, %v4915_v36 }
 0xc24   :  { %v4951_v19 = vmax.f32 %v4916_v50, 0.0 }
 0xc26   :  { %6033 = vmatmul.msk.f32.gmra.mxu1 %vm346_vm3, %v4951_v19 }
 0xc29   :  { %v4918_v20 = vpop.f32.mrf.mxu2 }
 0xc2a   :  { %v4919_v1 = vadd.f32 %v8376_v6, %v4918_v20 }
 0xc2c   :  { %v4952_v40 = vmax.f32 %v4919_v1, 0.0 }
 0xc2e   :  { %6034 = vmatmul.msk.f32.gmra.mxu1 %vm346_vm3, %v4952_v40 }
 0xc31   :  { %v4921_v14 = vpop.f32.mrf.mxu2 }
 0xc32   :  { %v4922_v12 = vadd.f32 %v8376_v6, %v4921_v14 }
 0xc34   :  { %v4953_v35 = vmax.f32 %v4922_v12, 0.0 }
 0xc36   :  { %6035 = vmatmul.msk.f32.gmra.mxu1 %vm346_vm3, %v4953_v35 }
 0xc39   :  { %v4924_v55 = vpop.f32.mrf.mxu2 }
 0xc3a   :  { %v4925_v11 = vadd.f32 %v8376_v6, %v4924_v55  ;;  %v5250_v55 = vld [vmem:[%s8608_s2 + $0x560] sm:$0xff] }
 0xc3b   :  { %5313 = vmatpush.msrb.mxu0 %v5250_v55 }
 0xc3c   :  { %v4954_v52 = vmax.f32 %v4925_v11, 0.0 }
 0xc3d   :  { %5314 = vmatpush.msrb.mxu0 %v5249_v57 }
 0xc3e   :  { %6036 = vmatmul.msk.f32.gmra.mxu1 %vm346_vm3, %v4954_v52 }
 0xc41   :  { %v4927_v42 = vpop.f32.mrf.mxu2 }
 0xc42   :  { %v4928_v8 = vadd.f32 %v8376_v6, %v4927_v42 }
 0xc44   :  { %v4955_v15 = vmax.f32 %v4928_v8, 0.0 }
 0xc46   :  { %6037 = vmatmul.msk.f32.gmra.mxu1 %vm346_vm3, %v4955_v15 }
 0xc49   :  { %v4930_v0 = vpop.f32.mrf.mxu2 }
 0xc4a   :  { %v4931_v22 = vadd.f32 %v8376_v6, %v4930_v0 }
 0xc4c   :  { %v4956_v51 = vmax.f32 %v4931_v22, 0.0 }
 0xc4e   :  { %6038 = vmatmul.msk.f32.gmra.mxu1 %vm346_vm3, %v4956_v51 }
 0xc51   :  { %v4933_v10 = vpop.f32.mrf.mxu2 }
 0xc52   :  { %v4934_v29 = vadd.f32 %v8376_v6, %v4933_v10 }
 0xc54   :  { %v4957_v34 = vmax.f32 %v4934_v29, 0.0 }
 0xc56   :  { %6039 = vmatmul.msk.f32.gmra.mxu1 %vm346_vm3, %v4957_v34 }
 0xc59   :  { %v4936_v5 = vpop.f32.mrf.mxu2 }
 0xc5a   :  { %v4937_v47 = vadd.f32 %v8376_v6, %v4936_v5 }
 0xc5c   :  { %v4958_v59 = vmax.f32 %v4937_v47, 0.0 }
 0xc5e   :  { %6040 = vmatmul.msk.f32.gmra.mxu1 %vm346_vm3, %v4958_v59 }
 0xc61   :  { %v4939_v7 = vpop.f32.mrf.mxu2 }
 0xc62   :  { %v4940_v4 = vadd.f32 %v8376_v6, %v4939_v7 }
 0xc64   :  { %v4959_v17 = vmax.f32 %v4940_v4, 0.0 }
 0xc66   :  { %6041 = vmatmul.msk.f32.gmra.mxu1 %vm346_vm3, %v4959_v17 }
 0xc69   :  { %v4942_v61 = vpop.f32.mrf.mxu2 }
 0xc6a   :  { %v4943_v43 = vadd.f32 %v8376_v6, %v4942_v61 }
 0xc6c   :  { %v4960_v26 = vmax.f32 %v4943_v43, 0.0  ;;  %v5248_v43 = vld [vmem:[%s8608_s2 + $0x550] sm:$0xff] }
 0xc6d   :  { %5315 = vmatpush.msrb.mxu0 %v5248_v43 }
 0xc6e   :  { %6042 = vmatmul.msk.f32.gmra.mxu1 %vm346_vm3, %v4960_v26 }
 0xc73   :  { %v5032_v46 = vpop.f32.mrf.mxu1 }
 0xc74   :  { %v5033_v28 = vadd.f32 %v8425_v60, %v5032_v46 }
 0xc76   :  { %v8429_v41 = vadd.f32 %v5033_v28, %v8267_v24 }
 0xc78   :  { %v5096_v45 = vmax.f32 %v8429_v41, 0.0 }
 0xc7a   :  { %6043 = vmatmul.msk.f32.vlgmr.msrb.gmra.mxu3 %vm346_vm3, %v5096_v45 }
 0xc7b   :  { %v5035_v32 = vpop.f32.mrf.mxu1 }
 0xc7c   :  { %v5036_v6 = vadd.f32 %v8425_v60, %v5035_v32 }
 0xc7e   :  { %v8435_v21 = vadd.f32 %v5036_v6, %v8273_v48 }
 0xc80   :  { %v5097_v53 = vmax.f32 %v8435_v21, 0.0 }
 0xc82   :  { %6044 = vmatmul.msk.f32.gmra.mxu3 %vm346_vm3, %v5097_v53 }
 0xc83   :  { %v5038_v49 = vpop.f32.mrf.mxu1 }
 0xc84   :  { %v5039_v27 = vadd.f32 %v8425_v60, %v5038_v49 }
 0xc86   :  { %v8441_v24 = vadd.f32 %v5039_v27, %v8279_v38  ;;  %v6119_v27 = vld [vmem:[%s8608_s2 + $0x540] ss:$0 sm:$0xff] }
 0xc88   :  { %v5098_v16 = vmax.f32 %v8441_v24, 0.0 }
 0xc8a   :  { %6045 = vmatmul.msk.f32.gmra.mxu3 %vm346_vm3, %v5098_v16 }
 0xc8b   :  { %v5041_v54 = vpop.f32.mrf.mxu1 }
 0xc8c   :  { %v5042_v62 = vadd.f32 %v8425_v60, %v5041_v54 }
 0xc8e   :  { %v8447_v48 = vadd.f32 %v5042_v62, %v8285_v58 }
 0xc90   :  { %v5099_v23 = vmax.f32 %v8447_v48, 0.0 }
 0xc92   :  { %6046 = vmatmul.msk.f32.gmra.mxu3 %vm346_vm3, %v5099_v23 }
 0xc93   :  { %v5044_v36 = vpop.f32.mrf.mxu1 }
 0xc94   :  { %v5045_v50 = vadd.f32 %v8425_v60, %v5044_v36 }
 0xc96   :  { %v8453_v38 = vadd.f32 %v5045_v50, %v8291_v31 }
 0xc98   :  { %v5100_v19 = vmax.f32 %v8453_v38, 0.0 }
 0xc9a   :  { %6047 = vmatmul.msk.f32.gmra.mxu3 %vm346_vm3, %v5100_v19 }
 0xc9b   :  { %v5047_v20 = vpop.f32.mrf.mxu1 }
 0xc9c   :  { %v5048_v1 = vadd.f32 %v8425_v60, %v5047_v20 }
 0xc9e   :  { %v8459_v58 = vadd.f32 %v5048_v1, %v8297_v2 }
 0xca0   :  { %v5101_v40 = vmax.f32 %v8459_v58, 0.0 }
 0xca2   :  { %6048 = vmatmul.msk.f32.gmra.mxu3 %vm346_vm3, %v5101_v40 }
 0xca3   :  { %v5050_v14 = vpop.f32.mrf.mxu1 }
 0xca4   :  { %v5051_v12 = vadd.f32 %v8425_v60, %v5050_v14 }
 0xca6   :  { %v8465_v31 = vadd.f32 %v5051_v12, %v8303_v56 }
 0xca8   :  { %v5102_v35 = vmax.f32 %v8465_v31, 0.0 }
 0xcaa   :  { %6049 = vmatmul.msk.f32.gmra.mxu3 %vm346_vm3, %v5102_v35 }
 0xcab   :  { %v5053_v2 = vpop.f32.mrf.mxu1 }
 0xcac   :  { %v5054_v11 = vadd.f32 %v8425_v60, %v5053_v2 }
 0xcae   :  { %v8474_v52 = vadd.f32 %v5054_v11, %v8312_v9 }
 0xcb0   :  { %v5103_v13 = vmax.f32 %v8474_v52, 0.0 }
 0xcb2   :  { %6050 = vmatmul.msk.f32.gmra.mxu3 %vm346_vm3, %v5103_v13 }
 0xcb3   :  { %v5056_v56 = vpop.f32.mrf.mxu1 }
 0xcb4   :  { %v5057_v42 = vadd.f32 %v8425_v60, %v5056_v56 }
 0xcb6   :  { %v8480_v8 = vadd.f32 %v5057_v42, %v8318_v63 }
 0xcb8   :  { %v5104_v15 = vmax.f32 %v8480_v8, 0.0 }
 0xcba   :  { %6051 = vmatmul.msk.f32.gmra.mxu3 %vm346_vm3, %v5104_v15 }
 0xcbb   :  { %v5059_v0 = vpop.f32.mrf.mxu1 }
 0xcbc   :  { %v5060_v22 = vadd.f32 %v8425_v60, %v5059_v0 }
 0xcbe   :  { %v8486_v9 = vadd.f32 %v5060_v22, %v8324_v3 }
 0xcc0   :  { %v5105_v51 = vmax.f32 %v8486_v9, 0.0 }
 0xcc2   :  { %6052 = vmatmul.msk.f32.gmra.mxu3 %vm346_vm3, %v5105_v51 }
 0xcc3   :  { %v5062_v10 = vpop.f32.mrf.mxu1 }
 0xcc4   :  { %v5063_v29 = vadd.f32 %v8425_v60, %v5062_v10 }
 0xcc6   :  { %v8492_v63 = vadd.f32 %v5063_v29, %v8330_v44 }
 0xcc8   :  { %v5106_v34 = vmax.f32 %v8492_v63, 0.0 }
 0xcca   :  { %6053 = vmatmul.msk.f32.gmra.mxu3 %vm346_vm3, %v5106_v34 }
 0xccb   :  { %v5065_v3 = vpop.f32.mrf.mxu1 }
 0xccc   :  { %v5066_v30 = vadd.f32 %v8425_v60, %v5065_v3 }
 0xcce   :  { %v8501_v5 = vadd.f32 %v5066_v30, %v8339_v33 }
 0xcd0   :  { %v5107_v47 = vmax.f32 %v8501_v5, 0.0 }
 0xcd2   :  { %6054 = vmatmul.msk.f32.gmra.mxu3 %vm346_vm3, %v5107_v47 }
 0xcd3   :  { %v5068_v44 = vpop.f32.mrf.mxu1 }
 0xcd4   :  { %v5069_v59 = vadd.f32 %v8425_v60, %v5068_v44 }
 0xcd6   :  { %v8507_v7 = vadd.f32 %v5069_v59, %v8345_v18  ;;  %v5247_v18 = vld [vmem:[%s8608_s2 + $0x548] sm:$0xff] }
 0xcd7   :  { %5316 = vmatpush.msrb.mxu0 %v5247_v18 }
 0xcd8   :  { %v5108_v4 = vmax.f32 %v8507_v7, 0.0 }
 0xcda   :  { %6055 = vmatmul.msk.f32.gmra.mxu3 %vm346_vm3, %v5108_v4 }
 0xcdb   :  { %v5071_v17 = vpop.f32.mrf.mxu1 }
 0xcdc   :  { %v5072_v61 = vadd.f32 %v8425_v60, %v5071_v17 }
 0xcde   :  { %v8513_v33 = vadd.f32 %v5072_v61, %v8351_v25 }
 0xce0   :  { %v5109_v26 = vmax.f32 %v8513_v33, 0.0 }
 0xce2   :  { %6056 = vmatmul.msk.f32.gmra.mxu3 %vm346_vm3, %v5109_v26 }
 0xce3   :  { %v5074_v46 = vpop.f32.mrf.mxu1 }
 0xce4   :  { %v5075_v28 = vadd.f32 %v8425_v60, %v5074_v46 }
 0xce6   :  { %v8525_v25 = vadd.f32 %v5075_v28, %v8363_v37 }
 0xce8   :  { %v5110_v45 = vmax.f32 %v8525_v25, 0.0 }
 0xcea   :  { %6057 = vmatmul.msk.f32.gmra.mxu3 %vm346_vm3, %v5110_v45 }
 0xceb   :  { %v5077_v32 = vpop.f32.mrf.mxu1 }
 0xcec   :  { %v5078_v6 = vadd.f32 %v8425_v60, %v5077_v32 }
 0xcee   :  { %v8531_v53 = vadd.f32 %v5078_v6, %v8369_v39 }
 0xcf0   :  { %v5111_v49 = vmax.f32 %v8531_v53, 0.0 }
 0xcf2   :  { %6058 = vmatmul.msk.f32.gmra.mxu3 %vm346_vm3, %v5111_v49 }
 0xcfd   :  { %v5183_v37 = vpop.f32.mrf.mxu3 }
 0xcfe   :  { %v5184_v16 = vadd.f32 %v6119_v27, %v5183_v37 }
 0xd00   :  { %v5231_v54 = vmax.f32 %v5184_v16, 0.0 }
 0xd02   :  { %6059 = vmatmul.msk.f32.vlgmr.msrb.gmra.mxu0 %vm346_vm3, %v5231_v54 }
 0xd05   :  { %v5186_v62 = vpop.f32.mrf.mxu3 }
 0xd06   :  { %v5187_v23 = vadd.f32 %v6119_v27, %v5186_v62 }
 0xd08   :  { %v5232_v36 = vmax.f32 %v5187_v23, 0.0 }
 0xd0a   :  { %6060 = vmatmul.msk.f32.gmra.mxu0 %vm346_vm3, %v5232_v36 }
 0xd0d   :  { %v5189_v39 = vpop.f32.mrf.mxu3 }
 0xd0e   :  { %v5190_v60 = vadd.f32 %v6119_v27, %v5189_v39 }
 0xd10   :  { %v5233_v50 = vmax.f32 %v5190_v60, 0.0 }
 0xd12   :  { %6061 = vmatmul.msk.f32.gmra.mxu0 %vm346_vm3, %v5233_v50 }
 0xd15   :  { %v5192_v19 = vpop.f32.mrf.mxu3 }
 0xd16   :  { %v5193_v20 = vadd.f32 %v6119_v27, %v5192_v19 }
 0xd18   :  { %v5234_v1 = vmax.f32 %v5193_v20, 0.0 }
 0xd1a   :  { %6062 = vmatmul.msk.f32.gmra.mxu0 %vm346_vm3, %v5234_v1 }
 0xd1d   :  { %v5195_v40 = vpop.f32.mrf.mxu3 }
 0xd1e   :  { %v5196_v14 = vadd.f32 %v6119_v27, %v5195_v40 }
 0xd20   :  { %v5235_v12 = vmax.f32 %v5196_v14, 0.0 }
 0xd22   :  { %6063 = vmatmul.msk.f32.gmra.mxu0 %vm346_vm3, %v5235_v12 }
 0xd25   :  { %v5198_v35 = vpop.f32.mrf.mxu3 }
 0xd26   :  { %v5199_v55 = vadd.f32 %v6119_v27, %v5198_v35  ;;  %v6120_v35 = vld [vmem:[%s8608_s2 + $0x568] ss:$0 sm:$0xff] }
 0xd28   :  { %v5236_v2 = vmax.f32 %v5199_v55, 0.0 }
 0xd2a   :  { %6064 = vmatmul.msk.f32.gmra.mxu0 %vm346_vm3, %v5236_v2 }
 0xd2d   :  { %v5201_v11 = vpop.f32.mrf.mxu3 }
 0xd2e   :  { %v5202_v13 = vadd.f32 %v6119_v27, %v5201_v11 }
 0xd30   :  { %v5237_v56 = vmax.f32 %v5202_v13, 0.0 }
 0xd32   :  { %6065 = vmatmul.msk.f32.gmra.mxu0 %vm346_vm3, %v5237_v56 }
 0xd35   :  { %v5204_v42 = vpop.f32.mrf.mxu3 }
 0xd36   :  { %v5205_v15 = vadd.f32 %v6119_v27, %v5204_v42 }
 0xd38   :  { %v5238_v0 = vmax.f32 %v5205_v15, 0.0 }
 0xd3a   :  { %6066 = vmatmul.msk.f32.gmra.mxu0 %vm346_vm3, %v5238_v0 }
 0xd3d   :  { %v5207_v22 = vpop.f32.mrf.mxu3 }
 0xd3e   :  { %v5208_v51 = vadd.f32 %v6119_v27, %v5207_v22 }
 0xd40   :  { %v5239_v10 = vmax.f32 %v5208_v51, 0.0 }
 0xd42   :  { %6067 = vmatmul.msk.f32.gmra.mxu0 %vm346_vm3, %v5239_v10 }
 0xd45   :  { %v5210_v29 = vpop.f32.mrf.mxu3 }
 0xd46   :  { %v5211_v34 = vadd.f32 %v6119_v27, %v5210_v29 }
 0xd48   :  { %v5240_v57 = vmax.f32 %v5211_v34, 0.0 }
 0xd4a   :  { %6068 = vmatmul.msk.f32.gmra.mxu0 %vm346_vm3, %v5240_v57 }
 0xd4d   :  { %v5213_v3 = vpop.f32.mrf.mxu3 }
 0xd4e   :  { %v5214_v30 = vadd.f32 %v6119_v27, %v5213_v3 }
 0xd50   :  { %v5241_v47 = vmax.f32 %v5214_v30, 0.0 }
 0xd52   :  { %6069 = vmatmul.msk.f32.gmra.mxu0 %vm346_vm3, %v5241_v47 }
 0xd55   :  { %v5216_v44 = vpop.f32.mrf.mxu3 }
 0xd56   :  { %v5217_v59 = vadd.f32 %v6119_v27, %v5216_v44 }
 0xd58   :  { %v5242_v4 = vmax.f32 %v5217_v59, 0.0 }
 0xd5a   :  { %6070 = vmatmul.msk.f32.gmra.mxu0 %vm346_vm3, %v5242_v4 }
 0xd5d   :  { %v5219_v17 = vpop.f32.mrf.mxu3 }
 0xd5e   :  { %v5220_v61 = vadd.f32 %v6119_v27, %v5219_v17 }
 0xd60   :  { %v5243_v43 = vmax.f32 %v5220_v61, 0.0 }
 0xd62   :  { %6071 = vmatmul.msk.f32.gmra.mxu0 %vm346_vm3, %v5243_v43 }
 0xd65   :  { %v5222_v26 = vpop.f32.mrf.mxu3 }
 0xd66   :  { %v5223_v18 = vadd.f32 %v6119_v27, %v5222_v26 }
 0xd68   :  { %v5244_v46 = vmax.f32 %v5223_v18, 0.0 }
 0xd6a   :  { %6072 = vmatmul.msk.f32.gmra.mxu0 %vm346_vm3, %v5244_v46 }
 0xd6d   :  { %v5225_v28 = vpop.f32.mrf.mxu3 }
 0xd6e   :  { %v5226_v45 = vadd.f32 %v6119_v27, %v5225_v28 }
 0xd70   :  { %v5245_v32 = vmax.f32 %v5226_v45, 0.0 }
 0xd72   :  { %6073 = vmatmul.msk.f32.gmra.mxu0 %vm346_vm3, %v5245_v32 }
 0xd75   :  { %v5228_v6 = vpop.f32.mrf.mxu3 }
 0xd76   :  { %v5229_v49 = vadd.f32 %v6119_v27, %v5228_v6 }
 0xd78   :  { %v5246_v37 = vmax.f32 %v5229_v49, 0.0 }
 0xd7a   :  { %6074 = vmatmul.msk.f32.gmra.mxu0 %vm346_vm3, %v5246_v37 }
 0xd7f   :  { %v8554_v16 = vpop.f32.mrf.mxu0 }
 0xd87   :  { %v8556_v54 = vpop.f32.mrf.mxu0 }
 0xd8f   :  { %v8558_v62 = vpop.f32.mrf.mxu0 }
 0xd90   :  { %v5325_v6 = vadd.f32 %v6120_v35, %v8558_v62 }
 0xd97   :  { %v5327_v23 = vpop.f32.mrf.mxu0 }
 0xd98   :  { %v5328_v45 = vadd.f32 %v6120_v35, %v5327_v23  ;;  %v5319_v23 = vadd.f32 %v6120_v35, %v8554_v16 }
 0xd9a   :  { %v5369_v49 = vadd.f32 %v5328_v45, %v8447_v48  ;;  %v5366_v62 = vadd.f32 %v5319_v23, %v8429_v41 }
 0xd9f   :  { %v5330_v36 = vpop.f32.mrf.mxu0 }
 0xda0   :  { %v5331_v46 = vadd.f32 %v6120_v35, %v5330_v36  ;;  %v5322_v36 = vadd.f32 %v6120_v35, %v8556_v54 }
 0xda2   :  { %v5370_v32 = vadd.f32 %v5331_v46, %v8453_v38  ;;  %v5367_v38 = vadd.f32 %v5322_v36, %v8435_v21 }
 0xda4   :  { %v5387_v37 = vmax.f32 %v5370_v32, 0.0  ;;  %v5384_v48 = vmax.f32 %v5367_v38, 0.0 }
 0xda7   :  { %v5333_v39 = vpop.f32.mrf.mxu0 }
 0xdaf   :  { %v5336_v60 = vpop.f32.mrf.mxu0 }
 0xdb7   :  { %v5339_v50 = vpop.f32.mrf.mxu0 }
 0xdbf   :  { %v5342_v19 = vpop.f32.mrf.mxu0 }
 0xdc7   :  { %v5345_v20 = vpop.f32.mrf.mxu0 }
 0xdcf   :  { %v5348_v1 = vpop.f32.mrf.mxu0 }
 0xdd0   :  { %v5349_v57 = vadd.f32 %v6120_v35, %v5348_v1 }
 0xdd2   :  { %v5376_v30 = vadd.f32 %v5349_v57, %v8492_v63  ;;  %v5334_v63 = vadd.f32 %v6120_v35, %v5333_v39  ;;  %v5386_v39 = vmax.f32 %v5369_v49, 0.0 }
 0xdd4   :  { %v5393_v59 = vmax.f32 %v5376_v30, 0.0  ;;  %v5371_v28 = vadd.f32 %v5334_v63, %v8459_v58  ;;  %v5368_v58 = vadd.f32 %v5325_v6, %v8441_v24  ;;  %v5382_v24 = vld [vmem:[%s8608_s2 + $0x570] sm:$0x1] }
 0xdd7   :  { %v5351_v40 = vpop.f32.mrf.mxu0 }
 0xdd8   :  { %v5352_v10 = vadd.f32 %v6120_v35, %v5351_v40 }
 0xddf   :  { %v5354_v14 = vpop.f32.mrf.mxu0 }
 0xde0   :  { %v5355_v0 = vadd.f32 %v6120_v35, %v5354_v14 }
 0xde2   :  { %v5378_v29 = vadd.f32 %v5355_v0, %v8507_v7  ;;  %v5340_v7 = vadd.f32 %v6120_v35, %v5339_v50  ;;  %v5383_v50 = vmax.f32 %v5366_v62, 0.0 }
 0xde4   :  { %v5395_v3 = vmax.f32 %v5378_v29, 0.0  ;;  %v5373_v61 = vadd.f32 %v5340_v7, %v8474_v52 }
 0xde6   :  { %v5390_v18 = vmax.f32 %v5373_v61, 0.0 }
 0xde7   :  { %v5357_v27 = vpop.f32.mrf.mxu0 }
 0xde8   :  { %v5358_v56 = vadd.f32 %v6120_v35, %v5357_v27 }
 0xdea   :  { %v5379_v22 = vadd.f32 %v5358_v56, %v8513_v33  ;;  %v5343_v33 = vadd.f32 %v6120_v35, %v5342_v19 }
 0xdec   :  { %v5396_v34 = vmax.f32 %v5379_v22, 0.0  ;;  %v5374_v4 = vadd.f32 %v5343_v33, %v8480_v8  ;;  %v6121_v8 = vmov 0  }
 0xded   :  { %6096 = vset.pattern.permute.xlu0 %v6121_v8 }
 0xdee   :  { %v5391_v43 = vmax.f32 %v5374_v4, 0.0 }
 0xdef   :  { %v5360_v12 = vpop.f32.mrf.mxu0 }
 0xdf0   :  { %v5361_v2 = vadd.f32 %v6120_v35, %v5360_v12 }
 0xdf2   :  { %v5380_v42 = vadd.f32 %v5361_v2, %v8525_v25  ;;  %v5346_v25 = vadd.f32 %v6120_v35, %v5345_v20 }
 0xdf4   :  { %v5397_v51 = vmax.f32 %v5380_v42, 0.0  ;;  %v5375_v44 = vadd.f32 %v5346_v25, %v8486_v9  ;;  %v5399_v9 = vld [vmem:[%s8608_s2 + $0x578] sm:$0x1] }
 0xdf5   :  { %5402 = vperm.xlu0 %6096, %v5399_v9  }
 0xdf6   :  { %v5392_v17 = vmax.f32 %v5375_v44, 0.0 }
 0xdf7   :  { %v5363_v55 = vpop.f32.mrf.mxu0 }
 0xdf8   :  { %v5364_v11 = vadd.f32 %v6120_v35, %v5363_v55 }
 0xdfa   :  { %v5381_v13 = vadd.f32 %v5364_v11, %v8531_v53  ;;  %v5377_v53 = vadd.f32 %v5352_v10, %v8501_v5  ;;  %v5337_v5 = vadd.f32 %v6120_v35, %v5336_v60  ;;  %v5385_v60 = vmax.f32 %v5368_v58, 0.0 }
 0xdfc   :  { %v5398_v15 = vmax.f32 %v5381_v13, 0.0  ;;  %v5394_v47 = vmax.f32 %v5377_v53, 0.0  ;;  %v5372_v26 = vadd.f32 %v5337_v5, %v8465_v31  ;;  %v5388_v31 = vmax.f32 %v5371_v28, 0.0 }
 0xdfe   :  { %6075 = vmatpush.xpose.msk.msra.mxu2 %vm346_vm3, %v5398_v15  ;;  %v5389_v52 = vmax.f32 %v5372_v26, 0.0 }
 0xe02   :  { %6076 = vmatpush.xpose.msk.msra.mxu2 %vm346_vm3, %v5397_v51 }
 0xe06   :  { %6077 = vmatpush.xpose.msk.msra.mxu2 %vm346_vm3, %v5396_v34 }
 0xe0a   :  { %6078 = vmatpush.xpose.msk.msra.mxu2 %vm346_vm3, %v5395_v3 }
 0xe0e   :  { %6079 = vmatpush.xpose.msk.msra.mxu2 %vm346_vm3, %v5394_v47 }
 0xe12   :  { %6080 = vmatpush.xpose.msk.msra.mxu2 %vm346_vm3, %v5393_v59 }
 0xe16   :  { %6081 = vmatpush.xpose.msk.msra.mxu2 %vm346_vm3, %v5392_v17 }
 0xe1a   :  { %6082 = vmatpush.xpose.msk.msra.mxu2 %vm346_vm3, %v5391_v43 }
 0xe1e   :  { %6083 = vmatpush.xpose.msk.msra.mxu2 %vm346_vm3, %v5390_v18 }
 0xe22   :  { %6084 = vmatpush.xpose.msk.msra.mxu2 %vm346_vm3, %v5389_v52 }
 0xe26   :  { %6085 = vmatpush.xpose.msk.msra.mxu2 %vm346_vm3, %v5388_v31 }
 0xe2a   :  { %6086 = vmatpush.xpose.msk.msra.mxu2 %vm346_vm3, %v5387_v37 }
 0xe2e   :  { %6087 = vmatpush.xpose.msk.msra.mxu2 %vm346_vm3, %v5386_v39 }
 0xe32   :  { %6088 = vmatpush.xpose.msk.msra.mxu2 %vm346_vm3, %v5385_v60 }
 0xe36   :  { %6089 = vmatpush.xpose.msk.msra.mxu2 %vm346_vm3, %v5384_v48 }
 0xe3a   :  { %6090 = vmatpush.xpose.msk.msra.mxu2 %vm346_vm3, %v5383_v50 }
 0xe3d   :  { %6091 = vmatmul.msk.f32.vlgmr.msra.gmra.mxu2 %vm346_vm3, %v5382_v24 }
 0xe67   :  { %v5403_v16 = vpop.permute.xlu0 %5402 }
 0xec0   :  { %v5473_v54 = vpop.f32.mrf.mxu2 }
 0xec1   :  { %v5474_v21 = vadd.f32 %v5473_v54, %v5403_v16 }
 0xec3   :  { %5476 = vst [vmem:[%s8611_s3] sm:$0x1] %v5474_v21 }

</bundles_post_ra>
